<compile_context>
chip_gen: v6e
topology: v6e:2x2x1
jax: 0.10.0
libtpu: 0.0.40
codegen_flags: <defaults>
</compile_context>

<pallas_src>
import jax
import jax.numpy as jnp
import numpy as np
from jax.experimental import pallas as pl
from jax.experimental.pallas import tpu as pltpu

_EPS = 1e-5


def _unet_down_kernel(x_ref, w1_ref, g1_ref, bt1_ref,
                      w2_ref, g2_ref, bt2_ref, o_ref, h1pad_ref):
    # x_ref: (N, H+4, W+4, Cin) -- NHWC, zero-padded by 2 on each spatial side.
    n, hpad, wpad, cin = x_ref.shape
    hp2, wp2 = hpad // 2, wpad // 2          # pooled-with-ring dims (Hp+2, Wp+2)
    hp, wp = hp2 - 2, wp2 - 2                # conv output spatial dims (Hp, Wp)
    cout = w1_ref.shape[-1]
    rows = n * hp * wp

    # ---- MaxPool2d(2,2): strided ref reads for the W pairs, leading-dim split
    # for the H pairs.  The border 2x2 windows are pure padding -> 0, i.e.
    # exactly the zero ring conv1's padding=1 needs.
    w_even = x_ref[:, :, pl.ds(0, wp2, stride=2), :]      # (n, hpad, wp2, cin)
    w_odd = x_ref[:, :, pl.ds(1, wp2, stride=2), :]
    wmax = jnp.maximum(w_even, w_odd)
    xh = wmax.reshape(n, hp2, 2, wp2, cin)                # split H (layout-free)
    pooled = jnp.maximum(xh[:, :, 0], xh[:, :, 1])        # (n, hp2, wp2, cin)

    def conv3x3_bn_relu(xpad4, w_ref, g_ref, bt_ref):
        # xpad4: (n, hp+2, wp+2, c) with a zero ring; returns (rows, cout) f32.
        c = xpad4.shape[-1]
        taps = []
        for dh in range(3):                               # tap offsets, static
            for dw in range(3):
                t = xpad4[:, dh:dh + hp, dw:dw + wp, :]   # free static slice
                taps.append(t.reshape(rows, c))
        col = jnp.concatenate(taps, axis=-1)              # im2col: (rows, 9*c)
        acc = jnp.dot(col.astype(jnp.bfloat16), w_ref[...],
                      preferred_element_type=jnp.float32)  # single MXU matmul
        # Training-mode BatchNorm2d in one pass (biased variance), f32 math.
        mean = jnp.mean(acc, axis=0, keepdims=True)
        ex2 = jnp.mean(acc * acc, axis=0, keepdims=True)
        var = ex2 - mean * mean
        scale = g_ref[...] * jax.lax.rsqrt(var + _EPS)    # fold BN affine
        shift = bt_ref[...] - mean * scale
        return jnp.maximum(acc * scale + shift, 0.0)      # FMA + ReLU

    h1 = conv3x3_bn_relu(pooled, w1_ref, g1_ref, bt1_ref)          # (rows, cout)

    # Zero-pad h1 with a 1-px ring in VMEM scratch for the second conv.
    h1pad_ref[...] = jnp.zeros_like(h1pad_ref)
    h1pad_ref[:, 1:hp + 1, 1:wp + 1, :] = h1.reshape(n, hp, wp, cout)

    h2 = conv3x3_bn_relu(h1pad_ref[...], w2_ref, g2_ref, bt2_ref)  # (rows, cout)

    # Note: with Cout=8 only 8/128 lanes are live; repacking to a 128-multiple
    # lane slab costs a relayout comparable to the masked stores it removes at
    # these shapes, so the (rows, Cout) slab is stored directly and the wrapper
    # un-flattens it (pure XLA layout glue).
    o_ref[...] = h2


def unet_down(x_nchw, params):
    N, Cin, H, W = x_nchw.shape
    assert H % 2 == 0 and W % 2 == 0
    Cout = params["w1"].shape[0]
    Hp, Wp = H // 2, W // 2
    rows = N * Hp * Wp

    # Layout glue (no compute): NCHW -> NHWC, pad by 2 so pooling the padded
    # tensor directly yields the pooled map with conv1's zero ring.
    x = jnp.transpose(x_nchw, (0, 2, 3, 1))
    xpad = jnp.pad(x, ((0, 0), (2, 2), (2, 2), (0, 0)))

    # Conv weights (Cout,Cin,3,3) -> im2col layout (9*Cin, Cout), bf16 operands.
    w1 = jnp.transpose(params["w1"], (2, 3, 1, 0)).reshape(9 * Cin, Cout)
    w2 = jnp.transpose(params["w2"], (2, 3, 1, 0)).reshape(9 * Cout, Cout)
    w1 = w1.astype(jnp.bfloat16)
    w2 = w2.astype(jnp.bfloat16)
    g1 = params["g1"].reshape(1, Cout).astype(jnp.float32)
    bt1 = params["bt1"].reshape(1, Cout).astype(jnp.float32)
    g2 = params["g2"].reshape(1, Cout).astype(jnp.float32)
    bt2 = params["bt2"].reshape(1, Cout).astype(jnp.float32)
    # Conv biases b1/b2 are intentionally NOT passed: training-mode BN subtracts
    # the per-channel mean, which cancels a constant per-channel bias exactly.

    # TODO(synk): for production UNet shapes, tile the grid over batch / H-row
    # blocks (2-row halo for the two stacked 3x3 convs), mark that axis
    # "parallel" (2 TCs on v7x), accumulate BN sum / sum-sq per tile in VMEM
    # scratch with a second normalize pass, and set vmem_limit_bytes per
    # generation (v7x has only 64 MiB physical VMEM).
    out2d = pl.pallas_call(
        _unet_down_kernel,
        out_shape=jax.ShapeDtypeStruct((rows, Cout), jnp.float32),
        grid=(1,),
        in_specs=[
            pl.BlockSpec((N, H + 4, W + 4, Cin), lambda i: (0, 0, 0, 0)),
            pl.BlockSpec((9 * Cin, Cout), lambda i: (0, 0)),
            pl.BlockSpec((1, Cout), lambda i: (0, 0)),
            pl.BlockSpec((1, Cout), lambda i: (0, 0)),
            pl.BlockSpec((9 * Cout, Cout), lambda i: (0, 0)),
            pl.BlockSpec((1, Cout), lambda i: (0, 0)),
            pl.BlockSpec((1, Cout), lambda i: (0, 0)),
        ],
        out_specs=pl.BlockSpec((rows, Cout), lambda i: (0, 0)),
        scratch_shapes=[pltpu.VMEM((N, Hp + 2, Wp + 2, Cout), jnp.float32)],
        compiler_params=pltpu.CompilerParams(dimension_semantics=("arbitrary",)),
    )(xpad, w1, g1, bt1, w2, g2, bt2)

    out = out2d.reshape(N, Hp, Wp, Cout)
    return jnp.transpose(out, (0, 3, 1, 2))                # back to NCHW


def unet_down_reference(x, params):
    """Pure-JAX/XLA reference matching PyTorch UNetDown.forward (training mode)."""
    p = jax.lax.reduce_window(x, -jnp.inf, jax.lax.max,
                              (1, 1, 2, 2), (1, 1, 2, 2), "VALID")

    def block(y, w, b, g, bt):
        y = jax.lax.conv_general_dilated(
            y, w, window_strides=(1, 1), padding=((1, 1), (1, 1)),
            dimension_numbers=("NCHW", "OIHW", "NCHW"))
        y = y + b[None, :, None, None]
        mean = jnp.mean(y, axis=(0, 2, 3), keepdims=True)
        var = jnp.mean((y - mean) ** 2, axis=(0, 2, 3), keepdims=True)
        y = (y - mean) * jax.lax.rsqrt(var + _EPS)
        y = y * g[None, :, None, None] + bt[None, :, None, None]
        return jnp.maximum(y, 0.0)

    y = block(p, params["w1"], params["b1"], params["g1"], params["bt1"])
    y = block(y, params["w2"], params["b2"], params["g2"], params["bt2"])
    return y


if __name__ == "__main__":
    key = jax.random.PRNGKey(0)
    ks = jax.random.split(key, 9)
    N, Cin, Cout, H, W = 2, 4, 8, 16, 16

    x = jax.random.normal(ks[0], (N, Cin, H, W), jnp.float32)
    # Deterministic synthetic parameters (shapes per UNetDown.__init__).
    # The conv biases are random here to demonstrate the BN-cancellation
    # argument (the kernel never sees them, the reference applies them).
    params = {
        "w1": jax.random.normal(ks[1], (Cout, Cin, 3, 3), jnp.float32) / 6.0,
        "b1": 0.1 * jax.random.normal(ks[2], (Cout,), jnp.float32),
        "g1": 1.0 + 0.1 * jax.random.normal(ks[3], (Cout,), jnp.float32),
        "bt1": 0.1 * jax.random.normal(ks[4], (Cout,), jnp.float32),
        "w2": jax.random.normal(ks[5], (Cout, Cout, 3, 3), jnp.float32) / 8.5,
        "b2": 0.1 * jax.random.normal(ks[6], (Cout,), jnp.float32),
        "g2": 1.0 + 0.1 * jax.random.normal(ks[7], (Cout,), jnp.float32),
        "bt2": 0.1 * jax.random.normal(ks[8], (Cout,), jnp.float32),
    }

    out = unet_down(x, params)
    jax.block_until_ready(out)

    ref = unet_down_reference(x, params)
    np.testing.assert_allclose(np.asarray(out), np.asarray(ref),
                               rtol=2e-2, atol=2e-2)
    print("KERNEL_OK")
</pallas_src>

<mosaic_0001>
module attributes {stable_mosaic.version = 11 : i64} {
  func.func @_unet_down_kernel(%arg0: i32, %arg1: memref<2x20x20x4xf32, #tpu.memory_space<vmem>>, %arg2: memref<36x8xbf16, #tpu.memory_space<vmem>>, %arg3: memref<1x8xf32, #tpu.memory_space<vmem>>, %arg4: memref<1x8xf32, #tpu.memory_space<vmem>>, %arg5: memref<72x8xbf16, #tpu.memory_space<vmem>>, %arg6: memref<1x8xf32, #tpu.memory_space<vmem>>, %arg7: memref<1x8xf32, #tpu.memory_space<vmem>>, %arg8: memref<128x8xf32, #tpu.memory_space<vmem>>, %arg9: memref<2x10x10x8xf32, #tpu.memory_space<vmem>>) attributes {dimension_semantics = [#tpu.dimension_semantics<arbitrary>], iteration_bounds = array<i64: 1>, scalar_prefetch = 0 : i64, scratch_operands = 1 : i64, tpu.core_type = #tpu.core_type<tc>, window_params = [{pipeline_mode = #tpu.pipeline_mode<synchronous>, transform_indices = @transform_0, window_bounds = array<i64: 2, 20, 20, 4>}, {pipeline_mode = #tpu.pipeline_mode<synchronous>, transform_indices = @transform_1, window_bounds = array<i64: 36, 8>}, {pipeline_mode = #tpu.pipeline_mode<synchronous>, transform_indices = @transform_2, window_bounds = array<i64: 1, 8>}, {pipeline_mode = #tpu.pipeline_mode<synchronous>, transform_indices = @transform_3, window_bounds = array<i64: 1, 8>}, {pipeline_mode = #tpu.pipeline_mode<synchronous>, transform_indices = @transform_4, window_bounds = array<i64: 72, 8>}, {pipeline_mode = #tpu.pipeline_mode<synchronous>, transform_indices = @transform_5, window_bounds = array<i64: 1, 8>}, {pipeline_mode = #tpu.pipeline_mode<synchronous>, transform_indices = @transform_6, window_bounds = array<i64: 1, 8>}, {pipeline_mode = #tpu.pipeline_mode<synchronous>, transform_indices = @transform_7, window_bounds = array<i64: 128, 8>}]} {
    %c0 = arith.constant 0 : index
    %c0_0 = arith.constant 0 : index
    %c0_1 = arith.constant 0 : index
    %c0_2 = arith.constant 0 : index
    %0 = tpu.strided_load %arg1[%c0, %c0_0, %c0_1, %c0_2] {strides = array<i32: 1, 1, 2, 1>} : memref<2x20x20x4xf32, #tpu.memory_space<vmem>>, vector<2x20x10x4xf32>
    %c0_3 = arith.constant 0 : index
    %c0_4 = arith.constant 0 : index
    %c1 = arith.constant 1 : index
    %c0_5 = arith.constant 0 : index
    %1 = tpu.strided_load %arg1[%c0_3, %c0_4, %c1, %c0_5] {strides = array<i32: 1, 1, 2, 1>} : memref<2x20x20x4xf32, #tpu.memory_space<vmem>>, vector<2x20x10x4xf32>
    %2 = arith.maximumf %0, %1 : vector<2x20x10x4xf32>
    %3 = vector.shape_cast %2 : vector<2x20x10x4xf32> to vector<2x10x2x10x4xf32>
    %4 = vector.extract_strided_slice %3 {offsets = [0, 0, 0, 0, 0], sizes = [2, 10, 1, 10, 4], strides = [1, 1, 1, 1, 1]} : vector<2x10x2x10x4xf32> to vector<2x10x1x10x4xf32>
    %5 = vector.shape_cast %4 : vector<2x10x1x10x4xf32> to vector<2x10x10x4xf32>
    %6 = vector.extract_strided_slice %3 {offsets = [0, 0, 1, 0, 0], sizes = [2, 10, 1, 10, 4], strides = [1, 1, 1, 1, 1]} : vector<2x10x2x10x4xf32> to vector<2x10x1x10x4xf32>
    %7 = vector.shape_cast %6 : vector<2x10x1x10x4xf32> to vector<2x10x10x4xf32>
    %8 = arith.maximumf %5, %7 : vector<2x10x10x4xf32>
    %9 = vector.extract_strided_slice %8 {offsets = [0, 0, 0, 0], sizes = [2, 8, 8, 4], strides = [1, 1, 1, 1]} : vector<2x10x10x4xf32> to vector<2x8x8x4xf32>
    %10 = vector.shape_cast %9 : vector<2x8x8x4xf32> to vector<128x4xf32>
    %11 = vector.extract_strided_slice %8 {offsets = [0, 0, 1, 0], sizes = [2, 8, 8, 4], strides = [1, 1, 1, 1]} : vector<2x10x10x4xf32> to vector<2x8x8x4xf32>
    %12 = vector.shape_cast %11 : vector<2x8x8x4xf32> to vector<128x4xf32>
    %13 = vector.extract_strided_slice %8 {offsets = [0, 0, 2, 0], sizes = [2, 8, 8, 4], strides = [1, 1, 1, 1]} : vector<2x10x10x4xf32> to vector<2x8x8x4xf32>
    %14 = vector.shape_cast %13 : vector<2x8x8x4xf32> to vector<128x4xf32>
    %15 = vector.extract_strided_slice %8 {offsets = [0, 1, 0, 0], sizes = [2, 8, 8, 4], strides = [1, 1, 1, 1]} : vector<2x10x10x4xf32> to vector<2x8x8x4xf32>
    %16 = vector.shape_cast %15 : vector<2x8x8x4xf32> to vector<128x4xf32>
    %17 = vector.extract_strided_slice %8 {offsets = [0, 1, 1, 0], sizes = [2, 8, 8, 4], strides = [1, 1, 1, 1]} : vector<2x10x10x4xf32> to vector<2x8x8x4xf32>
    %18 = vector.shape_cast %17 : vector<2x8x8x4xf32> to vector<128x4xf32>
    %19 = vector.extract_strided_slice %8 {offsets = [0, 1, 2, 0], sizes = [2, 8, 8, 4], strides = [1, 1, 1, 1]} : vector<2x10x10x4xf32> to vector<2x8x8x4xf32>
    %20 = vector.shape_cast %19 : vector<2x8x8x4xf32> to vector<128x4xf32>
    %21 = vector.extract_strided_slice %8 {offsets = [0, 2, 0, 0], sizes = [2, 8, 8, 4], strides = [1, 1, 1, 1]} : vector<2x10x10x4xf32> to vector<2x8x8x4xf32>
    %22 = vector.shape_cast %21 : vector<2x8x8x4xf32> to vector<128x4xf32>
    %23 = vector.extract_strided_slice %8 {offsets = [0, 2, 1, 0], sizes = [2, 8, 8, 4], strides = [1, 1, 1, 1]} : vector<2x10x10x4xf32> to vector<2x8x8x4xf32>
    %24 = vector.shape_cast %23 : vector<2x8x8x4xf32> to vector<128x4xf32>
    %25 = vector.extract_strided_slice %8 {offsets = [0, 2, 2, 0], sizes = [2, 8, 8, 4], strides = [1, 1, 1, 1]} : vector<2x10x10x4xf32> to vector<2x8x8x4xf32>
    %26 = vector.shape_cast %25 : vector<2x8x8x4xf32> to vector<128x4xf32>
    %27 = tpu.concatenate %10, %12, %14, %16, %18, %20, %22, %24, %26 in 1 : vector<128x4xf32>, vector<128x4xf32>, vector<128x4xf32>, vector<128x4xf32>, vector<128x4xf32>, vector<128x4xf32>, vector<128x4xf32>, vector<128x4xf32>, vector<128x4xf32> -> vector<128x36xf32>
    %28 = arith.truncf %27 : vector<128x36xf32> to vector<128x36xbf16>
    %c0_6 = arith.constant 0 : index
    %c0_7 = arith.constant 0 : index
    %29 = vector.load %arg2[%c0_6, %c0_7] : memref<36x8xbf16, #tpu.memory_space<vmem>>, vector<36x8xbf16>
    %cst = arith.constant dense<0.000000e+00> : vector<128x8xf32>
    %30 = tpu.matmul %28, %29, %cst {dimension_numbers = #tpu.dot_dimension_numbers<[1], [0], [0], [1], [0, 0, 1, 1], [], []>} : vector<128x36xbf16>, vector<36x8xbf16>, vector<128x8xf32> -> vector<128x8xf32>
    %cst_8 = arith.constant dense<0.000000e+00> : vector<8xf32>
    %31 = vector.multi_reduction <add>, %30, %cst_8 [0] : vector<128x8xf32> to vector<8xf32>
    %32 = vector.shape_cast %31 : vector<8xf32> to vector<1x8xf32>
    %cst_9 = arith.constant 1.280000e+02 : f32
    %33 = vector.broadcast %cst_9 : f32 to vector<1x8xf32>
    %34 = arith.divf %32, %33 : vector<1x8xf32>
    %35 = arith.mulf %30, %30 : vector<128x8xf32>
    %cst_10 = arith.constant dense<0.000000e+00> : vector<8xf32>
    %36 = vector.multi_reduction <add>, %35, %cst_10 [0] : vector<128x8xf32> to vector<8xf32>
    %37 = vector.shape_cast %36 : vector<8xf32> to vector<1x8xf32>
    %cst_11 = arith.constant 1.280000e+02 : f32
    %38 = vector.broadcast %cst_11 : f32 to vector<1x8xf32>
    %39 = arith.divf %37, %38 : vector<1x8xf32>
    %40 = arith.mulf %34, %34 : vector<1x8xf32>
    %41 = arith.subf %39, %40 : vector<1x8xf32>
    %c0_12 = arith.constant 0 : index
    %c0_13 = arith.constant 0 : index
    %42 = vector.load %arg3[%c0_12, %c0_13] : memref<1x8xf32, #tpu.memory_space<vmem>>, vector<1x8xf32>
    %cst_14 = arith.constant 9.99999974E-6 : f32
    %43 = vector.broadcast %cst_14 : f32 to vector<1x8xf32>
    %44 = arith.addf %41, %43 : vector<1x8xf32>
    %45 = math.rsqrt %44 : vector<1x8xf32>
    %46 = arith.mulf %42, %45 : vector<1x8xf32>
    %c0_15 = arith.constant 0 : index
    %c0_16 = arith.constant 0 : index
    %47 = vector.load %arg4[%c0_15, %c0_16] : memref<1x8xf32, #tpu.memory_space<vmem>>, vector<1x8xf32>
    %48 = arith.mulf %34, %46 : vector<1x8xf32>
    %49 = arith.subf %47, %48 : vector<1x8xf32>
    %50 = vector.broadcast %46 : vector<1x8xf32> to vector<128x8xf32>
    %51 = arith.mulf %30, %50 : vector<128x8xf32>
    %52 = vector.broadcast %49 : vector<1x8xf32> to vector<128x8xf32>
    %53 = arith.addf %51, %52 : vector<128x8xf32>
    %cst_17 = arith.constant 0.000000e+00 : f32
    %54 = vector.broadcast %cst_17 : f32 to vector<128x8xf32>
    %55 = arith.maximumf %53, %54 : vector<128x8xf32>
    %cst_18 = arith.constant 0.000000e+00 : f32
    %56 = vector.broadcast %cst_18 : f32 to vector<2x10x10x8xf32>
    %c0_19 = arith.constant 0 : index
    %c0_20 = arith.constant 0 : index
    %c0_21 = arith.constant 0 : index
    %c0_22 = arith.constant 0 : index
    %57 = vector.load %arg9[%c0_19, %c0_20, %c0_21, %c0_22] : memref<2x10x10x8xf32, #tpu.memory_space<vmem>>, vector<2x10x10x8xf32>
    tpu.vector_store %arg9[%c0_19, %c0_20, %c0_21, %c0_22], %56 {strides = array<i32>} : memref<2x10x10x8xf32, #tpu.memory_space<vmem>>, vector<2x10x10x8xf32>,
    %58 = vector.shape_cast %55 : vector<128x8xf32> to vector<2x8x8x8xf32>
    %c0_23 = arith.constant 0 : index
    %c1_24 = arith.constant 1 : index
    %c1_25 = arith.constant 1 : index
    %c0_26 = arith.constant 0 : index
    %59 = vector.load %arg9[%c0_23, %c1_24, %c1_25, %c0_26] : memref<2x10x10x8xf32, #tpu.memory_space<vmem>>, vector<2x8x8x8xf32>
    tpu.vector_store %arg9[%c0_23, %c1_24, %c1_25, %c0_26], %58 {strides = array<i32>} : memref<2x10x10x8xf32, #tpu.memory_space<vmem>>, vector<2x8x8x8xf32>,
    %c0_27 = arith.constant 0 : index
    %c0_28 = arith.constant 0 : index
    %c0_29 = arith.constant 0 : index
    %c0_30 = arith.constant 0 : index
    %60 = vector.load %arg9[%c0_27, %c0_28, %c0_29, %c0_30] : memref<2x10x10x8xf32, #tpu.memory_space<vmem>>, vector<2x10x10x8xf32>
    %61 = vector.extract_strided_slice %60 {offsets = [0, 0, 0, 0], sizes = [2, 8, 8, 8], strides = [1, 1, 1, 1]} : vector<2x10x10x8xf32> to vector<2x8x8x8xf32>
    %62 = vector.shape_cast %61 : vector<2x8x8x8xf32> to vector<128x8xf32>
    %63 = vector.extract_strided_slice %60 {offsets = [0, 0, 1, 0], sizes = [2, 8, 8, 8], strides = [1, 1, 1, 1]} : vector<2x10x10x8xf32> to vector<2x8x8x8xf32>
    %64 = vector.shape_cast %63 : vector<2x8x8x8xf32> to vector<128x8xf32>
    %65 = vector.extract_strided_slice %60 {offsets = [0, 0, 2, 0], sizes = [2, 8, 8, 8], strides = [1, 1, 1, 1]} : vector<2x10x10x8xf32> to vector<2x8x8x8xf32>
    %66 = vector.shape_cast %65 : vector<2x8x8x8xf32> to vector<128x8xf32>
    %67 = vector.extract_strided_slice %60 {offsets = [0, 1, 0, 0], sizes = [2, 8, 8, 8], strides = [1, 1, 1, 1]} : vector<2x10x10x8xf32> to vector<2x8x8x8xf32>
    %68 = vector.shape_cast %67 : vector<2x8x8x8xf32> to vector<128x8xf32>
    %69 = vector.extract_strided_slice %60 {offsets = [0, 1, 1, 0], sizes = [2, 8, 8, 8], strides = [1, 1, 1, 1]} : vector<2x10x10x8xf32> to vector<2x8x8x8xf32>
    %70 = vector.shape_cast %69 : vector<2x8x8x8xf32> to vector<128x8xf32>
    %71 = vector.extract_strided_slice %60 {offsets = [0, 1, 2, 0], sizes = [2, 8, 8, 8], strides = [1, 1, 1, 1]} : vector<2x10x10x8xf32> to vector<2x8x8x8xf32>
    %72 = vector.shape_cast %71 : vector<2x8x8x8xf32> to vector<128x8xf32>
    %73 = vector.extract_strided_slice %60 {offsets = [0, 2, 0, 0], sizes = [2, 8, 8, 8], strides = [1, 1, 1, 1]} : vector<2x10x10x8xf32> to vector<2x8x8x8xf32>
    %74 = vector.shape_cast %73 : vector<2x8x8x8xf32> to vector<128x8xf32>
    %75 = vector.extract_strided_slice %60 {offsets = [0, 2, 1, 0], sizes = [2, 8, 8, 8], strides = [1, 1, 1, 1]} : vector<2x10x10x8xf32> to vector<2x8x8x8xf32>
    %76 = vector.shape_cast %75 : vector<2x8x8x8xf32> to vector<128x8xf32>
    %77 = vector.extract_strided_slice %60 {offsets = [0, 2, 2, 0], sizes = [2, 8, 8, 8], strides = [1, 1, 1, 1]} : vector<2x10x10x8xf32> to vector<2x8x8x8xf32>
    %78 = vector.shape_cast %77 : vector<2x8x8x8xf32> to vector<128x8xf32>
    %79 = tpu.concatenate %62, %64, %66, %68, %70, %72, %74, %76, %78 in 1 : vector<128x8xf32>, vector<128x8xf32>, vector<128x8xf32>, vector<128x8xf32>, vector<128x8xf32>, vector<128x8xf32>, vector<128x8xf32>, vector<128x8xf32>, vector<128x8xf32> -> vector<128x72xf32>
    %80 = arith.truncf %79 : vector<128x72xf32> to vector<128x72xbf16>
    %c0_31 = arith.constant 0 : index
    %c0_32 = arith.constant 0 : index
    %81 = vector.load %arg5[%c0_31, %c0_32] : memref<72x8xbf16, #tpu.memory_space<vmem>>, vector<72x8xbf16>
    %cst_33 = arith.constant dense<0.000000e+00> : vector<128x8xf32>
    %82 = tpu.matmul %80, %81, %cst_33 {dimension_numbers = #tpu.dot_dimension_numbers<[1], [0], [0], [1], [0, 0, 1, 1], [], []>} : vector<128x72xbf16>, vector<72x8xbf16>, vector<128x8xf32> -> vector<128x8xf32>
    %cst_34 = arith.constant dense<0.000000e+00> : vector<8xf32>
    %83 = vector.multi_reduction <add>, %82, %cst_34 [0] : vector<128x8xf32> to vector<8xf32>
    %84 = vector.shape_cast %83 : vector<8xf32> to vector<1x8xf32>
    %cst_35 = arith.constant 1.280000e+02 : f32
    %85 = vector.broadcast %cst_35 : f32 to vector<1x8xf32>
    %86 = arith.divf %84, %85 : vector<1x8xf32>
    %87 = arith.mulf %82, %82 : vector<128x8xf32>
    %cst_36 = arith.constant dense<0.000000e+00> : vector<8xf32>
    %88 = vector.multi_reduction <add>, %87, %cst_36 [0] : vector<128x8xf32> to vector<8xf32>
    %89 = vector.shape_cast %88 : vector<8xf32> to vector<1x8xf32>
    %cst_37 = arith.constant 1.280000e+02 : f32
    %90 = vector.broadcast %cst_37 : f32 to vector<1x8xf32>
    %91 = arith.divf %89, %90 : vector<1x8xf32>
    %92 = arith.mulf %86, %86 : vector<1x8xf32>
    %93 = arith.subf %91, %92 : vector<1x8xf32>
    %c0_38 = arith.constant 0 : index
    %c0_39 = arith.constant 0 : index
    %94 = vector.load %arg6[%c0_38, %c0_39] : memref<1x8xf32, #tpu.memory_space<vmem>>, vector<1x8xf32>
    %cst_40 = arith.constant 9.99999974E-6 : f32
    %95 = vector.broadcast %cst_40 : f32 to vector<1x8xf32>
    %96 = arith.addf %93, %95 : vector<1x8xf32>
    %97 = math.rsqrt %96 : vector<1x8xf32>
    %98 = arith.mulf %94, %97 : vector<1x8xf32>
    %c0_41 = arith.constant 0 : index
    %c0_42 = arith.constant 0 : index
    %99 = vector.load %arg7[%c0_41, %c0_42] : memref<1x8xf32, #tpu.memory_space<vmem>>, vector<1x8xf32>
    %100 = arith.mulf %86, %98 : vector<1x8xf32>
    %101 = arith.subf %99, %100 : vector<1x8xf32>
    %102 = vector.broadcast %98 : vector<1x8xf32> to vector<128x8xf32>
    %103 = arith.mulf %82, %102 : vector<128x8xf32>
    %104 = vector.broadcast %101 : vector<1x8xf32> to vector<128x8xf32>
    %105 = arith.addf %103, %104 : vector<128x8xf32>
    %cst_43 = arith.constant 0.000000e+00 : f32
    %106 = vector.broadcast %cst_43 : f32 to vector<128x8xf32>
    %107 = arith.maximumf %105, %106 : vector<128x8xf32>
    %c0_44 = arith.constant 0 : index
    %c0_45 = arith.constant 0 : index
    %108 = vector.load %arg8[%c0_44, %c0_45] : memref<128x8xf32, #tpu.memory_space<vmem>>, vector<128x8xf32>
    tpu.vector_store %arg8[%c0_44, %c0_45], %107 {strides = array<i32>} : memref<128x8xf32, #tpu.memory_space<vmem>>, vector<128x8xf32>,
    return
  }
  func.func @transform_0(%arg0: i32) -> (i32, i32, i32, i32) {
    %c0_i32 = arith.constant 0 : i32
    %c0_i32_0 = arith.constant 0 : i32
    %c0_i32_1 = arith.constant 0 : i32
    %c0_i32_2 = arith.constant 0 : i32
    %c0_i32_3 = arith.constant 0 : i32
    return %c0_i32, %c0_i32_0, %c0_i32_1, %c0_i32_2 : i32, i32, i32, i32
  }
  func.func @transform_1(%arg0: i32) -> (i32, i32) {
    %c0_i32 = arith.constant 0 : i32
    %c0_i32_0 = arith.constant 0 : i32
    %c0_i32_1 = arith.constant 0 : i32
    return %c0_i32, %c0_i32_0 : i32, i32
  }
  func.func @transform_2(%arg0: i32) -> (i32, i32) {
    %c0_i32 = arith.constant 0 : i32
    %c0_i32_0 = arith.constant 0 : i32
    %c0_i32_1 = arith.constant 0 : i32
    return %c0_i32, %c0_i32_0 : i32, i32
  }
  func.func @transform_3(%arg0: i32) -> (i32, i32) {
    %c0_i32 = arith.constant 0 : i32
    %c0_i32_0 = arith.constant 0 : i32
    %c0_i32_1 = arith.constant 0 : i32
    return %c0_i32, %c0_i32_0 : i32, i32
  }
  func.func @transform_4(%arg0: i32) -> (i32, i32) {
    %c0_i32 = arith.constant 0 : i32
    %c0_i32_0 = arith.constant 0 : i32
    %c0_i32_1 = arith.constant 0 : i32
    return %c0_i32, %c0_i32_0 : i32, i32
  }
  func.func @transform_5(%arg0: i32) -> (i32, i32) {
    %c0_i32 = arith.constant 0 : i32
    %c0_i32_0 = arith.constant 0 : i32
    %c0_i32_1 = arith.constant 0 : i32
    return %c0_i32, %c0_i32_0 : i32, i32
  }
  func.func @transform_6(%arg0: i32) -> (i32, i32) {
    %c0_i32 = arith.constant 0 : i32
    %c0_i32_0 = arith.constant 0 : i32
    %c0_i32_1 = arith.constant 0 : i32
    return %c0_i32, %c0_i32_0 : i32, i32
  }
  func.func @transform_7(%arg0: i32) -> (i32, i32) {
    %c0_i32 = arith.constant 0 : i32
    %c0_i32_0 = arith.constant 0 : i32
    %c0_i32_1 = arith.constant 0 : i32
    return %c0_i32, %c0_i32_0 : i32, i32
  }
}

</mosaic_0001>

<bundles_post_ra>
// kernel: tpu_custom_call.1
= control target key start
LH: loop header
LB: loop body
LE: loop exit
PB: predicated region body
PF: predicated region fallthrough
CT: control target
= control target key end

     0   :  { %vm547_vm0 = vcmask 1045504   ;;  %vm498_vm1 = vcmask 1046528   ;;  %s3515_s26 = smov 12   ;;  %s3516_s16 = smov 8   ;;  %vm1201_vm2 = vcmask 1041408   ;;  %vm1012_vm3 = vcmask 31744   ;;  %s5383_s0 = inlined_call_operand.vmem [shape: f32[2,20,20,4], index: 0, kind: input, shape index: {}]   ;;  %s5384_s1 = inlined_call_operand.vmem [shape: bf16[36,8], index: 1, kind: input, shape index: {}]   ;;  %s5385_s2 = inlined_call_operand.vmem [shape: f32[1,8], index: 2, kind: input, shape index: {}]   ;;  %s5386_s3 = inlined_call_operand.vmem [shape: f32[1,8], index: 3, kind: input, shape index: {}]   ;;  %s5387_s4 = inlined_call_operand.vmem [shape: bf16[72,8], index: 4, kind: input, shape index: {}]   ;;  %s5388_s5 = inlined_call_operand.vmem [shape: f32[1,8], index: 5, kind: input, shape index: {}]   ;;  %s5389_s6 = inlined_call_operand.vmem [shape: f32[1,8], index: 6, kind: input, shape index: {}]   ;;  %s5390_s7 = inlined_call_operand.vmem [shape: f32[128,8], index: 7, kind: output, shape index: {}]  }
   0x1   :  { %v2600_v0 = vld [vmem:[%s5383_s0 + $0x90] ss:$2 sm:$0xff]  ;;  %v2604_v2 = vld [vmem:[%s5383_s0 + $0xc0] ss:$2 sm:$0xff]  ;;  %v2680_v4 = vld [vmem:[%s5383_s0 + $0x91] ss:$2 sm:$0xff] }
   0x2   :  { %v2602_v1 = vld [vmem:[%s5383_s0 + $0xa8] ss:$2 sm:$0xff]  ;;  %v2606_v3 = vld [vmem:[%s5383_s0 + $0xd8] ss:$2 sm:$0xff]  ;;  %v2682_v5 = vld [vmem:[%s5383_s0 + $0xa9] ss:$2 sm:$0xff]  ;;  %v358_v8 = vmax.f32 %v2600_v0, %v2680_v4 }
   0x3   :  { %v2684_v6 = vld [vmem:[%s5383_s0 + $0xc1] ss:$2 sm:$0xff]  ;;  %v360_v9 = vmax.f32 %v2602_v1, %v2682_v5  ;;  %v2592_v10 = vld [vmem:[%s5383_s0 + $0x30] ss:$2 sm:$0xff]  ;;  %v2596_v14 = vld [vmem:[%s5383_s0 + $0x60] ss:$2 sm:$0xff] }
   0x4   :  { %v2686_v7 = vld [vmem:[%s5383_s0 + $0xd9] ss:$2 sm:$0xff]  ;;  %v362_v11 = vmax.f32 %v2604_v2, %v2684_v6  ;;  %v2594_v13 = vld [vmem:[%s5383_s0 + $0x48] ss:$2 sm:$0xff]  ;;  %v2598_v15 = vld [vmem:[%s5383_s0 + $0x78] ss:$2 sm:$0xff] }
   0x5   :  { %v364_v12 = vmax.f32 %v2606_v3, %v2686_v7  ;;  %v3604_v16 = vmax.f32 %v358_v8, %v360_v9  ;;  %v2672_v17 = vld [vmem:[%s5383_s0 + $0x31] ss:$2 sm:$0xff]  ;;  %v2676_v19 = vld [vmem:[%s5383_s0 + $0x61] ss:$2 sm:$0xff]  ;;  %v27_v25 = vld [vmem:[%s5383_s0] ss:$2 sm:$0xff] }
   0x6   :  { %v2674_v18 = vld [vmem:[%s5383_s0 + $0x49] ss:$2 sm:$0xff]  ;;  %v2678_v21 = vld [vmem:[%s5383_s0 + $0x79] ss:$2 sm:$0xff]  ;;  %v350_v22 = vmax.f32 %v2592_v10, %v2672_v17  ;;  %v354_v24 = vmax.f32 %v2596_v14, %v2676_v19  ;;  %v2590_v26 = vld [vmem:[%s5383_s0 + $0x18] ss:$2 sm:$0xff] }
   0x7   :  { %v3615_v20 = vmax.f32 %v362_v11, %v364_v12  ;;  %v352_v23 = vmax.f32 %v2594_v13, %v2674_v18  ;;  %v356_v27 = vmax.f32 %v2598_v15, %v2678_v21  ;;  %v2589_v28 = vld [vmem:[%s5383_s0 + $0x10] ss:$2 sm:$0x3]  ;;  %v2591_v29 = vld [vmem:[%s5383_s0 + $0x28] ss:$2 sm:$0x3] }
   0x8   :  { %v2593_v32 = vld [vmem:[%s5383_s0 + $0x40] ss:$2 sm:$0x3]  ;;  %v2595_v33 = vld [vmem:[%s5383_s0 + $0x58] ss:$2 sm:$0x3] }
   0x9   :  { %v2864_v30 = vpack.i.bf16 %v3615_v20, %v3604_v16  ;;  %v3634_v31 = vmax.f32 %v350_v22, %v352_v23  ;;  %v3642_v34 = vmax.f32 %v354_v24, %v356_v27  ;;  %v2668_v35 = vld [vmem:[%s5383_s0 + $0x1] ss:$2 sm:$0xff]  ;;  %v2669_v36 = vld [vmem:[%s5383_s0 + $0x11] ss:$2 sm:$0x3]  ;;  %v557_v3 = vrot.slane %v3604_v16, 2 }
   0xa   :  { %v2670_v37 = vld [vmem:[%s5383_s0 + $0x19] ss:$2 sm:$0xff]  ;;  %v2671_v38 = vld [vmem:[%s5383_s0 + $0x29] ss:$2 sm:$0x3]  ;;  %v346_v39 = vmax.f32 %v27_v25, %v2668_v35  ;;  %v347_v40 = vmax.f32 %v2589_v28, %v2669_v36  ;;  %v508_v24 = vrot.slane %v3604_v16, 1 }
   0xb   :  { %2865 = vrot.lane.b32.xlu1 %v2864_v30, %s3515_s26  ;;  %v551_v41 = vrot.slane %v3634_v31, 2  ;;  %v2859_v42 = vpack.i.bf16 %v3642_v34, %v3634_v31  ;;  %v2673_v43 = vld [vmem:[%s5383_s0 + $0x41] ss:$2 sm:$0x3]  ;;  %v348_v45 = vmax.f32 %v2590_v26, %v2670_v37  ;;  %v349_v46 = vmax.f32 %v2591_v29, %v2671_v38  ;;  %v2608_v22 = vld [vmem:[%s5383_s0 + $0xf0] ss:$2 sm:$0xff] }
   0xc   :  { %v2675_v44 = vld [vmem:[%s5383_s0 + $0x59] ss:$2 sm:$0x3]  ;;  %v351_v47 = vmax.f32 %v2593_v32, %v2673_v43  ;;  %v502_v49 = vrot.slane %v3634_v31, 1  ;;  %v554_v51 = vrot.slane %v3642_v34, 2  ;;  %v505_v19 = vrot.slane %v3642_v34, 1 }
   0xd   :  { %v353_v48 = vmax.f32 %v2595_v33, %v2675_v44  ;;  %v2597_v50 = vld [vmem:[%s5383_s0 + $0x70] ss:$2 sm:$0x3]  ;;  %2860 = vrot.lane.b32.xlu0 %v2859_v42, %s3515_s26  ;;  %v3672_v52 = vmax.f32 %v346_v39, %v348_v45  ;;  %v427_v53 = vmax.f32 %v347_v40, %v349_v46  ;;  %v2599_v54 = vld [vmem:[%s5383_s0 + $0x88] ss:$2 sm:$0x3] }
   0xe   :  { %v2601_v55 = vld [vmem:[%s5383_s0 + $0xa0] ss:$2 sm:$0x3]  ;;  %v2603_v57 = vld [vmem:[%s5383_s0 + $0xb8] ss:$2 sm:$0x3] }
   0xf   :  { %v429_v56 = vmax.f32 %v351_v47, %v353_v48  ;;  %v2677_v58 = vld [vmem:[%s5383_s0 + $0x71] ss:$2 sm:$0x3]  ;;  %v548_v59 = vrot.slane %v3672_v52, 2  ;;  %v549_v60 = vrot.slane %v427_v53, 2  ;;  %v499_v61 = vrot.slane %v3672_v52, 1 }
  0x10   :  { %v500_v62 = vrot.slane %v427_v53, 1  ;;  %v2679_v1 = vld [vmem:[%s5383_s0 + $0x89] ss:$2 sm:$0x3]  ;;  %v355_v2 = vmax.f32 %v2597_v50, %v2677_v58  ;;  %v511_v27 = vrot.slane %v3615_v20, 1  ;;  %s3517_s17 = smov 4  }
  0x11   :  { %v552_v63 = vrot.slane %v429_v56, 2  ;;  %v503_v0 = vrot.slane %v429_v56, 1  ;;  %v550_v4 = vsel %vm547_vm0, %v548_v59, %v549_v60  ;;  %v2681_v6 = vld [vmem:[%s5383_s0 + $0xa1] ss:$2 sm:$0x3]  ;;  %v357_v8 = vmax.f32 %v2599_v54, %v2679_v1  ;;  %s3518_s14 = smov 16  }
  0x12   :  { %v501_v5 = vsel %vm498_vm1, %v499_v61, %v500_v62  ;;  %v2683_v7 = vld [vmem:[%s5383_s0 + $0xb9] ss:$2 sm:$0x3]  ;;  %v359_v11 = vmax.f32 %v2601_v55, %v2681_v6  ;;  %v2605_v13 = vld [vmem:[%s5383_s0 + $0xd0] ss:$2 sm:$0x3] }
  0x13   :  { %v3701_v9 = vsel %vm547_vm0, %v551_v41, %v552_v63  ;;  %v3704_v10 = vsel %vm498_vm1, %v502_v49, %v503_v0  ;;  %v361_v12 = vmax.f32 %v2603_v57, %v2683_v7  ;;  %v2607_v14 = vld [vmem:[%s5383_s0 + $0xe8] ss:$2 sm:$0x3]  ;;  %v431_v18 = vmax.f32 %v355_v2, %v357_v8  ;;  %v2685_v21 = vld [vmem:[%s5383_s0 + $0xd1] ss:$2 sm:$0x3] }
  0x14   :  { %v2879_v15 = vpack.i.bf16 %v3701_v9, %v550_v4  ;;  %v2869_v17 = vpack.i.bf16 %v3704_v10, %v501_v5  ;;  %v2687_v25 = vld [vmem:[%s5383_s0 + $0xe9] ss:$2 sm:$0x3]  ;;  %v363_v26 = vmax.f32 %v2605_v13, %v2685_v21  ;;  %v560_v32 = vrot.slane %v3615_v20, 2  ;;  %v2610_v33 = vld [vmem:[%s5383_s0 + $0x108] ss:$2 sm:$0xff] }
  0x15   :  { %v433_v23 = vmax.f32 %v359_v11, %v361_v12  ;;  %v555_v28 = vrot.slane %v431_v18, 2  ;;  %v506_v29 = vrot.slane %v431_v18, 1  ;;  %v365_v30 = vmax.f32 %v2607_v14, %v2687_v25  ;;  %v2688_v37 = vld [vmem:[%s5383_s0 + $0xf1] ss:$2 sm:$0xff]  ;;  %v2612_v57 = vld [vmem:[%s5383_s0 + $0x120] ss:$2 sm:$0xff] }
  0x16   :  { %2880 = vrot.lane.b32.xlu1 %v2879_v15, %s3516_s16  ;;  %2870 = vrot.lane.b32.xlu0 %v2869_v17, %s3517_s17  ;;  %v2690_v38 = vld [vmem:[%s5383_s0 + $0x109] ss:$2 sm:$0xff]  ;;  %v2609_v42 = vld [vmem:[%s5383_s0 + $0x100] ss:$2 sm:$0x3]  ;;  %v366_v46 = vmax.f32 %v2608_v22, %v2688_v37  ;;  %s3519_s25 = smov 20  }
  0x17   :  { %v558_v35 = vrot.slane %v433_v23, 2  ;;  %v509_v36 = vrot.slane %v433_v23, 1  ;;  %v556_v39 = vsel %vm547_vm0, %v554_v51, %v555_v28  ;;  %v507_v40 = vsel %vm498_vm1, %v505_v19, %v506_v29  ;;  %v2611_v43 = vld [vmem:[%s5383_s0 + $0x118] ss:$2 sm:$0x3]  ;;  %s3520_s12 = smov 24  }
  0x18   :  { %v435_v41 = vmax.f32 %v363_v26, %v365_v30  ;;  %v2689_v47 = vld [vmem:[%s5383_s0 + $0x101] ss:$2 sm:$0x3]  ;;  %v2691_v48 = vld [vmem:[%s5383_s0 + $0x119] ss:$2 sm:$0x3]  ;;  %v368_v54 = vmax.f32 %v2610_v33, %v2690_v38  ;;  %v2889_v61 = vpack.i.bf16 %v507_v40, %v3704_v10  ;;  %v2899_v11 = vpack.i.bf16 %v556_v39, %v3701_v9 }
  0x19   :  { %v559_v44 = vsel %vm547_vm0, %v557_v3, %v558_v35  ;;  %v510_v45 = vsel %vm498_vm1, %v508_v24, %v509_v36  ;;  %v367_v55 = vmax.f32 %v2609_v42, %v2689_v47  ;;  %v369_v56 = vmax.f32 %v2611_v43, %v2691_v48  ;;  %v2613_v58 = vld [vmem:[%s5383_s0 + $0x130] ss:$2 sm:$0x3]  ;;  %v2614_v59 = vld [vmem:[%s5383_s0 + $0x138] ss:$2 sm:$0xff]  ;;  %s3521_s24 = smov 28  }
  0x1a   :  { %v3754_v49 = vpack.i.bf16 %v559_v44, %v556_v39  ;;  %v3756_v50 = vpack.i.bf16 %v510_v45, %v507_v40  ;;  %v512_v51 = vrot.slane %v435_v41, 1  ;;  %v561_v53 = vrot.slane %v435_v41, 2  ;;  %v2615_v63 = vld [vmem:[%s5383_s0 + $0x148] ss:$2 sm:$0x3]  ;;  %s3522_s27 = smov 32  }
  0x1b   :  { %v2616_v0 = vld [vmem:[%s5383_s0 + $0x150] ss:$2 sm:$0xff]  ;;  %v2617_v1 = vld [vmem:[%s5383_s0 + $0x160] ss:$2 sm:$0x3]  ;;  %v3785_v3 = vmax.f32 %v366_v46, %v368_v54  ;;  %v437_v4 = vmax.f32 %v367_v55, %v369_v56  ;;  %v2909_v29 = vpack.i.bf16 %v3604_v16, %v3642_v34  ;;  %vm1029_vm4 = vcmask 64512  }
  0x1c   :  { %2885 = vrot.lane.b32.xlu1 %v3754_v49, %s3516_s16  ;;  %2875 = vrot.lane.b32.xlu0 %v3756_v50, %s3517_s17  ;;  %v513_v60 = vsel %vm498_vm1, %v511_v27, %v512_v51  ;;  %v3774_v62 = vsel %vm547_vm0, %v560_v32, %v561_v53  ;;  %v2618_v5 = vld [vmem:[%s5383_s0 + $0x168] ss:$2 sm:$0xff]  ;;  %v2619_v6 = vld [vmem:[%s5383_s0 + $0x178] ss:$2 sm:$0x3]  ;;  %vm1046_vm5 = vcmask 97280  }
  0x1d   :  { %v2894_v2 = vpack.i.bf16 %v513_v60, %v510_v45  ;;  %v2692_v7 = vld [vmem:[%s5383_s0 + $0x121] ss:$2 sm:$0xff]  ;;  %v2693_v8 = vld [vmem:[%s5383_s0 + $0x131] ss:$2 sm:$0x3]  ;;  %v2904_v10 = vpack.i.bf16 %v3774_v62, %v559_v44  ;;  %v514_v12 = vrot.slane %v3785_v3, 1  ;;  %v2914_v30 = vpack.i.bf16 %v3785_v3, %v3615_v20 }
  0x1e   :  { %v2694_v13 = vld [vmem:[%s5383_s0 + $0x139] ss:$2 sm:$0xff]  ;;  %v2695_v15 = vld [vmem:[%s5383_s0 + $0x149] ss:$2 sm:$0x3]  ;;  %v370_v17 = vmax.f32 %v2612_v57, %v2692_v7  ;;  %v371_v18 = vmax.f32 %v2613_v58, %v2693_v8  ;;  %v515_v21 = vrot.slane %v437_v4, 1 }
  0x1f   :  { %v2696_v14 = vld [vmem:[%s5383_s0 + $0x151] ss:$2 sm:$0xff]  ;;  %v2697_v9 = vld [vmem:[%s5383_s0 + $0x161] ss:$2 sm:$0x3]  ;;  %v372_v19 = vmax.f32 %v2614_v59, %v2694_v13  ;;  %v373_v24 = vmax.f32 %v2615_v63, %v2695_v15  ;;  %v563_v40 = vrot.slane %v3785_v3, 2 }
  0x20   :  { %2895 = vrot.lane.b32.xlu1 %v2894_v2, %s3518_s14  ;;  %2890 = vrot.lane.b32.xlu0 %v2889_v61, %s3518_s14  ;;  %v2698_v22 = vld [vmem:[%s5383_s0 + $0x169] ss:$2 sm:$0xff]  ;;  %v2699_v23 = vld [vmem:[%s5383_s0 + $0x179] ss:$2 sm:$0x3]  ;;  %v374_v25 = vmax.f32 %v2616_v0, %v2696_v14  ;;  %v375_v26 = vmax.f32 %v2617_v1, %v2697_v9  ;;  %v3831_v35 = vsel %vm498_vm1, %v514_v12, %v515_v21  ;;  %v564_v41 = vrot.slane %v437_v4, 2 }
  0x21   :  { %v376_v27 = vmax.f32 %v2618_v5, %v2698_v22  ;;  %v377_v28 = vmax.f32 %v2619_v6, %v2699_v23  ;;  %v3828_v32 = vmax.f32 %v370_v17, %v372_v19  ;;  %v439_v33 = vmax.f32 %v371_v18, %v373_v24  ;;  %v2620_v38 = vld [vmem:[%s5383_s0 + $0x180] ss:$2 sm:$0xff]  ;;  %v2700_v42 = vld [vmem:[%s5383_s0 + $0x181] ss:$2 sm:$0xff]  ;;  %s3525_s29 = smov 40   ;;  %s3526_s9 = smov 56  }
  0x22   :  { %v2622_v39 = vld [vmem:[%s5383_s0 + $0x198] ss:$2 sm:$0xff]  ;;  %v2702_v43 = vld [vmem:[%s5383_s0 + $0x199] ss:$2 sm:$0xff]  ;;  %v2924_v44 = vpack.i.bf16 %v3831_v35, %v513_v60  ;;  %v3866_v56 = vsel %vm547_vm0, %v563_v40, %v564_v41  ;;  %v378_v57 = vmax.f32 %v2620_v38, %v2700_v42  ;;  %v2706_v12 = vld [vmem:[%s5383_s0 + $0x1c9] ss:$2 sm:$0xff] }
  0x23   :  { %v3833_v36 = vmax.f32 %v374_v25, %v376_v27  ;;  %v441_v37 = vmax.f32 %v375_v26, %v377_v28  ;;  %v517_v45 = vrot.slane %v3828_v32, 1  ;;  %v518_v46 = vrot.slane %v439_v33, 1  ;;  %v2621_v47 = vld [vmem:[%s5383_s0 + $0x190] ss:$2 sm:$0x3] }
  0x24   :  { %2905 = vrot.lane.b32.xlu1 %v2904_v10, %s3519_s25  ;;  %2900 = vrot.lane.b32.xlu0 %v2899_v11, %s3519_s25  ;;  %v2623_v53 = vld [vmem:[%s5383_s0 + $0x1a8] ss:$2 sm:$0x3]  ;;  %v2701_v54 = vld [vmem:[%s5383_s0 + $0x191] ss:$2 sm:$0x3]  ;;  %v380_v58 = vmax.f32 %v2622_v39, %v2702_v43  ;;  %v2939_v5 = vpack.i.bf16 %v3866_v56, %v3774_v62  ;;  %v2959_v40 = vpack.i.bf16 %v3828_v32, %v3785_v3 }
  0x25   :  { %v520_v48 = vrot.slane %v3833_v36, 1  ;;  %v521_v51 = vrot.slane %v441_v37, 1  ;;  %v2703_v55 = vld [vmem:[%s5383_s0 + $0x1a9] ss:$2 sm:$0x3]  ;;  %v3872_v59 = vsel %vm498_vm1, %v517_v45, %v518_v46  ;;  %v566_v60 = vrot.slane %v3828_v32, 2 }
  0x26   :  { %v567_v61 = vrot.slane %v439_v33, 2  ;;  %v569_v63 = vrot.slane %v3833_v36, 2  ;;  %v570_v1 = vrot.slane %v441_v37, 2  ;;  %v379_v2 = vmax.f32 %v2621_v47, %v2701_v54  ;;  %v2626_v11 = vld [vmem:[%s5383_s0 + $0x1c8] ss:$2 sm:$0xff] }
  0x27   :  { %v3877_v0 = vsel %vm498_vm1, %v520_v48, %v521_v51  ;;  %v381_v4 = vmax.f32 %v2623_v53, %v2703_v55  ;;  %v3888_v6 = vmax.f32 %v378_v57, %v380_v58  ;;  %v2704_v62 = vld [vmem:[%s5383_s0 + $0x1b1] ss:$2 sm:$0xff]  ;;  %v2625_v13 = vld [vmem:[%s5383_s0 + $0x1c0] ss:$2 sm:$0x3]  ;;  %v384_v22 = vmax.f32 %v2626_v11, %v2706_v12 }
  0x28   :  { %2915 = vrot.lane.b32.xlu1 %v2914_v30, %s3520_s12  ;;  %2910 = vrot.lane.b32.xlu0 %v2909_v29, %s3520_s12  ;;  %v3891_v7 = vsel %vm547_vm0, %v566_v60, %v567_v61  ;;  %v3894_v8 = vsel %vm547_vm0, %v569_v63, %v570_v1  ;;  %v2627_v14 = vld [vmem:[%s5383_s0 + $0x1d8] ss:$2 sm:$0x3]  ;;  %v2705_v15 = vld [vmem:[%s5383_s0 + $0x1c1] ss:$2 sm:$0x3] }
  0x29   :  { %v3896_v10 = vmax.f32 %v379_v2, %v381_v4  ;;  %v3924_v9 = vpack.i.bf16 %v3894_v8, %v3891_v7  ;;  %v600_v17 = vrot.slane %v3888_v6, 1  ;;  %v2707_v18 = vld [vmem:[%s5383_s0 + $0x1d9] ss:$2 sm:$0x3]  ;;  %v2628_v23 = vld [vmem:[%s5383_s0 + $0x1e0] ss:$2 sm:$0xff]  ;;  %v2964_v43 = vpack.i.bf16 %v3888_v6, %v3833_v36 }
  0x2a   :  { %v2629_v24 = vld [vmem:[%s5383_s0 + $0x1f0] ss:$2 sm:$0x3]  ;;  %v2630_v25 = vld [vmem:[%s5383_s0 + $0x1f8] ss:$2 sm:$0xff]  ;;  %v385_v45 = vmax.f32 %v2627_v14, %v2707_v18  ;;  %v606_v51 = vrot.slane %v3888_v6, 2 }
  0x2b   :  { %v601_v19 = vrot.slane %v3896_v10, 1  ;;  %v2631_v26 = vld [vmem:[%s5383_s0 + $0x208] ss:$2 sm:$0x3]  ;;  %v2708_v27 = vld [vmem:[%s5383_s0 + $0x1e1] ss:$2 sm:$0xff] }
  0x2c   :  { %2925 = vrot.lane.b32.xlu1 %v2924_v44, %s3521_s24  ;;  %2920 = vrot.lane.b32.xlu0 %v3756_v50, %s3521_s24  ;;  %v3884_v50 = vpack.i.bf16 %v3877_v0, %v3872_v59  ;;  %v2709_v28 = vld [vmem:[%s5383_s0 + $0x1f1] ss:$2 sm:$0x3]  ;;  %v2632_v29 = vld [vmem:[%s5383_s0 + $0x210] ss:$2 sm:$0xff]  ;;  %v607_v53 = vrot.slane %v3896_v10, 2  ;;  %v386_v55 = vmax.f32 %v2628_v23, %v2708_v27  ;;  %v2979_v23 = vpack.i.bf16 %v3891_v7, %v3866_v56 }
  0x2d   :  { %v2633_v30 = vld [vmem:[%s5383_s0 + $0x220] ss:$2 sm:$0x3]  ;;  %v2634_v33 = vld [vmem:[%s5383_s0 + $0x228] ss:$2 sm:$0xff]  ;;  %v3987_v48 = vsel %vm498_vm1, %v600_v17, %v601_v19  ;;  %v387_v57 = vmax.f32 %v2629_v24, %v2709_v28  ;;  %vm1063_vm6 = vcmask 130048  }
  0x2e   :  { %v2635_v37 = vld [vmem:[%s5383_s0 + $0x238] ss:$2 sm:$0x3]  ;;  %v2710_v38 = vld [vmem:[%s5383_s0 + $0x1f9] ss:$2 sm:$0xff]  ;;  %v2974_v12 = vpack.i.bf16 %v3987_v48, %v3877_v0  ;;  %v4038_v19 = vsel %vm547_vm0, %v606_v51, %v607_v53  ;;  %v2989_v53 = vpack.i.bf16 %v3833_v36, %v3828_v32  ;;  %vm1080_vm7 = vcmask 162816  }
  0x2f   :  { %v2711_v39 = vld [vmem:[%s5383_s0 + $0x209] ss:$2 sm:$0x3]  ;;  %v2712_v41 = vld [vmem:[%s5383_s0 + $0x211] ss:$2 sm:$0xff]  ;;  %v388_v58 = vmax.f32 %v2630_v25, %v2710_v38  ;;  %v2984_v7 = vpack.i.bf16 %v4038_v19, %v3894_v8  ;;  %vm1097_vm8 = vcmask 195584  }
  0x30   :  { %2935 = vrot.lane.b32.xlu1 %v2924_v44, %s3517_s17  ;;  %2930 = vrot.lane.b32.xlu0 %v3754_v49, %s3522_s27  ;;  %v2624_v49 = vld [vmem:[%s5383_s0 + $0x1b0] ss:$2 sm:$0xff]  ;;  %v2713_v42 = vld [vmem:[%s5383_s0 + $0x221] ss:$2 sm:$0x3]  ;;  %v383_v44 = vmax.f32 %v2625_v13, %v2705_v15  ;;  %v389_v60 = vmax.f32 %v2631_v26, %v2711_v39  ;;  %v390_v1 = vmax.f32 %v2632_v29, %v2712_v41  ;;  %vm1114_vm9 = vcmask 228352  }
  0x31   :  { %v382_v21 = vmax.f32 %v2624_v49, %v2704_v62  ;;  %v2714_v46 = vld [vmem:[%s5383_s0 + $0x229] ss:$2 sm:$0xff]  ;;  %v2715_v47 = vld [vmem:[%s5383_s0 + $0x239] ss:$2 sm:$0x3]  ;;  %v391_v2 = vmax.f32 %v2633_v30, %v2713_v42  ;;  %v2969_v13 = vpack.i.bf16 %v3872_v59, %v3831_v35  ;;  %v4049_v25 = vmax.f32 %v386_v55, %v388_v58 }
  0x32   :  { %v2636_v61 = vld [vmem:[%s5383_s0 + $0x240] ss:$2 sm:$0xff]  ;;  %v392_v4 = vmax.f32 %v2634_v33, %v2714_v46  ;;  %v2637_v10 = vld [vmem:[%s5383_s0 + $0x250] ss:$2 sm:$0x3]  ;;  %v4017_v14 = vmax.f32 %v383_v44, %v385_v45  ;;  %v4051_v26 = vmax.f32 %v387_v57, %v389_v60  ;;  %vm1131_vm10 = vcmask 261120  }
  0x33   :  { %v3991_v54 = vmax.f32 %v382_v21, %v384_v22  ;;  %v2638_v63 = vld [vmem:[%s5383_s0 + $0x258] ss:$2 sm:$0xff]  ;;  %v2639_v49 = vld [vmem:[%s5383_s0 + $0x268] ss:$2 sm:$0x3]  ;;  %v523_v44 = vrot.slane %v4049_v25, 1 }
  0x34   :  { %2945 = vrot.lane.b32.xlu1 %v3884_v50, %s3517_s17  ;;  %2940 = vrot.lane.b32.xlu0 %v2939_v5, %s3522_s27  ;;  %v2716_v11 = vld [vmem:[%s5383_s0 + $0x241] ss:$2 sm:$0xff]  ;;  %v2717_v62 = vld [vmem:[%s5383_s0 + $0x251] ss:$2 sm:$0x3]  ;;  %v4059_v29 = vmax.f32 %v390_v1, %v392_v4  ;;  %v524_v45 = vrot.slane %v4051_v26, 1 }
  0x35   :  { %v2640_v15 = vld [vmem:[%s5383_s0 + $0x270] ss:$2 sm:$0xff]  ;;  %v2641_v17 = vld [vmem:[%s5383_s0 + $0x280] ss:$2 sm:$0x3]  ;;  %v616_v24 = vrot.slane %v3991_v54, 1  ;;  %v394_v33 = vmax.f32 %v2636_v61, %v2716_v11  ;;  %v395_v38 = vmax.f32 %v2637_v10, %v2717_v62  ;;  %v2994_v8 = vpack.i.bf16 %v3991_v54, %v3888_v6 }
  0x36   :  { %v2642_v18 = vld [vmem:[%s5383_s0 + $0x288] ss:$2 sm:$0xff]  ;;  %v2643_v0 = vld [vmem:[%s5383_s0 + $0x298] ss:$2 sm:$0x3]  ;;  %v526_v46 = vrot.slane %v4059_v29, 1 }
  0x37   :  { %v2718_v35 = vld [vmem:[%s5383_s0 + $0x259] ss:$2 sm:$0xff]  ;;  %v2719_v59 = vld [vmem:[%s5383_s0 + $0x269] ss:$2 sm:$0x3]  ;;  %v622_v61 = vrot.slane %v3991_v54, 2 }
  0x38   :  { %2955 = vrot.lane.b32.xlu1 %v3924_v9, %s3516_s16  ;;  %2950 = vrot.lane.b32.xlu0 %v2939_v5, %s3516_s16  ;;  %v393_v5 = vmax.f32 %v2635_v37, %v2715_v47  ;;  %v2720_v21 = vld [vmem:[%s5383_s0 + $0x271] ss:$2 sm:$0xff]  ;;  %v2721_v22 = vld [vmem:[%s5383_s0 + $0x281] ss:$2 sm:$0x3]  ;;  %v396_v56 = vmax.f32 %v2638_v63, %v2718_v35  ;;  %v617_v37 = vrot.slane %v4017_v14, 1  ;;  %v397_v39 = vmax.f32 %v2639_v49, %v2719_v59 }
  0x39   :  { %v2722_v27 = vld [vmem:[%s5383_s0 + $0x289] ss:$2 sm:$0xff]  ;;  %v2723_v28 = vld [vmem:[%s5383_s0 + $0x299] ss:$2 sm:$0x3]  ;;  %v399_v41 = vmax.f32 %v2641_v17, %v2721_v22  ;;  %v623_v63 = vrot.slane %v4017_v14, 2 }
  0x3a   :  { %v4061_v30 = vmax.f32 %v391_v2, %v393_v5  ;;  %v400_v42 = vmax.f32 %v2642_v18, %v2722_v27  ;;  %v4072_v51 = vmax.f32 %v394_v33, %v396_v56  ;;  %v451_v55 = vmax.f32 %v395_v38, %v397_v39  ;;  %v2644_v1 = vld [vmem:[%s5383_s0 + $0x2a0] ss:$2 sm:$0xff]  ;;  %v2724_v54 = vld [vmem:[%s5383_s0 + $0x2a1] ss:$2 sm:$0xff] }
  0x3b   :  { %v618_v57 = vsel %vm498_vm1, %v616_v24, %v617_v37  ;;  %v525_v2 = vsel %vm498_vm1, %v523_v44, %v524_v45  ;;  %v572_v5 = vrot.slane %v4049_v25, 2  ;;  %v2646_v10 = vld [vmem:[%s5383_s0 + $0x2b8] ss:$2 sm:$0xff]  ;;  %v2726_v62 = vld [vmem:[%s5383_s0 + $0x2b9] ss:$2 sm:$0xff]  ;;  %v624_v18 = vsel %vm547_vm0, %v622_v61, %v623_v63 }
  0x3c   :  { %2965 = vrot.lane.b32.xlu1 %v2964_v43, %s3515_s26  ;;  %2960 = vrot.lane.b32.xlu0 %v2959_v40, %s3515_s26  ;;  %v398_v40 = vmax.f32 %v2640_v15, %v2720_v21  ;;  %v401_v43 = vmax.f32 %v2643_v0, %v2723_v28  ;;  %v527_v47 = vrot.slane %v4061_v30, 1  ;;  %v529_v4 = vrot.slane %v4072_v51, 1  ;;  %v2647_v17 = vld [vmem:[%s5383_s0 + $0x2c8] ss:$2 sm:$0x3] }
  0x3d   :  { %v3004_v49 = vpack.i.bf16 %v618_v57, %v3987_v48  ;;  %v530_v11 = vrot.slane %v451_v55, 1  ;;  %v573_v15 = vrot.slane %v4051_v26, 2  ;;  %v2725_v0 = vld [vmem:[%s5383_s0 + $0x2b1] ss:$2 sm:$0x3]  ;;  %v578_v59 = vrot.slane %v4072_v51, 2 }
  0x3e   :  { %v4081_v58 = vmax.f32 %v398_v40, %v400_v42  ;;  %v453_v60 = vmax.f32 %v399_v41, %v401_v43  ;;  %v4090_v6 = vsel %vm498_vm1, %v526_v46, %v527_v47  ;;  %v2727_v35 = vld [vmem:[%s5383_s0 + $0x2c9] ss:$2 sm:$0x3]  ;;  %v575_v21 = vrot.slane %v4059_v29, 2  ;;  %v2650_v43 = vld [vmem:[%s5383_s0 + $0x2e8] ss:$2 sm:$0xff] }
  0x3f   :  { %v3014_v48 = vpack.i.bf16 %v4090_v6, %v525_v2  ;;  %v576_v22 = vrot.slane %v4061_v30, 2  ;;  %v4129_v24 = vsel %vm498_vm1, %v529_v4, %v530_v11  ;;  %v579_v26 = vrot.slane %v451_v55, 2  ;;  %v2728_v44 = vld [vmem:[%s5383_s0 + $0x2d1] ss:$2 sm:$0xff]  ;;  %v3500_v2 = vld [vmem:[%s5384_s1 + $0x8] sm:$0xff]  }
  0x40   :  { %2975 = vrot.lane.b32.xlu1 %v2974_v12, %s3518_s14  ;;  %2970 = vrot.lane.b32.xlu0 %v2969_v13, %s3518_s14  ;;  %v2645_v12 = vld [vmem:[%s5383_s0 + $0x2b0] ss:$2 sm:$0x3]  ;;  %v532_v13 = vrot.slane %v4081_v58, 1  ;;  %v533_v14 = vrot.slane %v453_v60, 1  ;;  %v581_v27 = vrot.slane %v4081_v58, 2  ;;  %v404_v28 = vmax.f32 %v2646_v10, %v2726_v62 }
  0x41   :  { %v582_v56 = vrot.slane %v453_v60, 2  ;;  %v405_v37 = vmax.f32 %v2647_v17, %v2727_v35  ;;  %v3019_v30 = vpack.i.bf16 %v624_v18, %v4038_v19  ;;  %v574_v38 = vsel %vm547_vm0, %v572_v5, %v573_v15  ;;  %v2730_v45 = vld [vmem:[%s5383_s0 + $0x2e9] ss:$2 sm:$0xff]  ;;  %v2649_v46 = vld [vmem:[%s5383_s0 + $0x2e0] ss:$2 sm:$0x3] }
  0x42   :  { %v4133_v33 = vsel %vm498_vm1, %v532_v13, %v533_v14  ;;  %v4145_v39 = vsel %vm547_vm0, %v575_v21, %v576_v22  ;;  %v4148_v40 = vsel %vm547_vm0, %v578_v59, %v579_v26  ;;  %v2651_v47 = vld [vmem:[%s5383_s0 + $0x2f8] ss:$2 sm:$0x3]  ;;  %v2729_v55 = vld [vmem:[%s5383_s0 + $0x2e1] ss:$2 sm:$0x3]  ;;  %v3039_v5 = vpack.i.bf16 %v4072_v51, %v4059_v29 }
  0x43   :  { %v4151_v41 = vsel %vm547_vm0, %v581_v27, %v582_v56  ;;  %v2731_v57 = vld [vmem:[%s5383_s0 + $0x2f9] ss:$2 sm:$0x3]  ;;  %v407_v11 = vmax.f32 %v2649_v46, %v2729_v55  ;;  %v2652_v14 = vld [vmem:[%s5383_s0 + $0x300] ss:$2 sm:$0xff]  ;;  %v3049_v15 = vpack.i.bf16 %v4129_v24, %v4090_v6  ;;  %vm1176_vm11 = vcmask 293888  }
  0x44   :  { %2985 = vrot.lane.b32.xlu1 %v2984_v7, %s3519_s25  ;;  %2980 = vrot.lane.b32.xlu0 %v2979_v23, %s3519_s25  ;;  %v402_v23 = vmax.f32 %v2644_v1, %v2724_v54  ;;  %v403_v7 = vmax.f32 %v2645_v12, %v2725_v0  ;;  %v3499_v1 = vld [vmem:[%s5384_s1 + $0x10] ss:$0 sps:$4 sm:$0x33]   ;;  %v408_v54 = vmax.f32 %v2650_v43, %v2730_v45  ;;  %v2654_v18 = vld [vmem:[%s5383_s0 + $0x318] ss:$2 sm:$0xff]  ;;  %vm1465_vm12 = vcmask 58368  }
  0x45   :  { %v409_v62 = vmax.f32 %v2651_v47, %v2731_v57  ;;  %v1203_v12 = vsel %vm1201_vm2, %v3499_v1, 0  ;;  %2844 = vmatprep.subr.msk.bf16.mxu0 %vm1201_vm2, %v3499_v1  ;;  %v2655_v0 = vld [vmem:[%s5383_s0 + $0x328] ss:$2 sm:$0x3]  ;;  %v2732_v35 = vld [vmem:[%s5383_s0 + $0x301] ss:$2 sm:$0xff] }
  0x46   :  { %v4153_v19 = vmax.f32 %v402_v23, %v404_v28  ;;  %v455_v42 = vmax.f32 %v403_v7, %v405_v37  ;;  %2797 = vmatpush3.bf16.msra.mxu0 %v1203_v12  ;;  %v2733_v6 = vld [vmem:[%s5383_s0 + $0x311] ss:$2 sm:$0x3]  ;;  %v3501_v59 = vld [vmem:[%s5384_s1] sm:$0xff]   ;;  %v2658_v27 = vld [vmem:[%s5383_s0 + $0x348] ss:$2 sm:$0xff] }
  0x47   :  { %2798 = vmatprep.subr.bf16.mxu0 %v3500_v2  ;;  %v457_v23 = vmax.f32 %v407_v11, %v409_v62  ;;  %v2657_v26 = vld [vmem:[%s5383_s0 + $0x340] ss:$2 sm:$0x3]  ;;  %v2659_v28 = vld [vmem:[%s5383_s0 + $0x358] ss:$2 sm:$0x3] }
  0x48   :  { %2995 = vrot.lane.b32.xlu1 %v2994_v8, %s3520_s12  ;;  %2990 = vrot.lane.b32.xlu0 %v2989_v53, %s3520_s12  ;;  %v4178_v8 = vpack.i.bf16 %v4151_v41, %v4148_v40  ;;  %v3029_v53 = vpack.i.bf16 %v4145_v39, %v574_v38  ;;  %v535_v60 = vrot.slane %v4153_v19, 1  ;;  %v536_v61 = vrot.slane %v455_v42, 1  ;;  %v2735_v56 = vld [vmem:[%s5383_s0 + $0x329] ss:$2 sm:$0x3] }
  0x49   :  { %v584_v63 = vrot.slane %v4153_v19, 2  ;;  %v3044_v4 = vpack.i.bf16 %v4153_v19, %v4081_v58  ;;  %v2736_v7 = vld [vmem:[%s5383_s0 + $0x331] ss:$2 sm:$0xff]  ;;  %v2737_v37 = vld [vmem:[%s5383_s0 + $0x341] ss:$2 sm:$0x3] }
  0x4a   :  { %v537_v13 = vsel %vm498_vm1, %v535_v60, %v536_v61  ;;  %v2739_v38 = vld [vmem:[%s5383_s0 + $0x359] ss:$2 sm:$0x3]  ;;  %2799 = vmatpush3.bf16.msra.mxu0 %v3500_v2  ;;  %v539_v45 = vrot.slane %v457_v23, 1  ;;  %v415_v57 = vmax.f32 %v2657_v26, %v2737_v37  ;;  %vm2307_vm13 = vcmask 1043456  }
  0x4b   :  { %v3054_v21 = vpack.i.bf16 %v537_v13, %v4133_v33  ;;  %2800 = vmatprep.subr.bf16.mxu0 %v3501_v59  ;;  %v417_v61 = vmax.f32 %v2659_v28, %v2739_v38  ;;  %vm2170_vm14 = vcmask 326656   ;;  %vm2187_vm15 = vcmask 392192  }
  0x4c   :  { %3005 = vrot.lane.b32.xlu1 %v3004_v49, %s3521_s24  ;;  %3000 = vrot.lane.b32.xlu0 %v3884_v50, %s3521_s24  ;;  %v4141_v50 = vpack.i.bf16 %v4133_v33, %v4129_v24  ;;  %v585_v49 = vrot.slane %v455_v42, 2  ;;  %v2656_v24 = vld [vmem:[%s5383_s0 + $0x330] ss:$2 sm:$0xff]  ;;  %v2734_v33 = vld [vmem:[%s5383_s0 + $0x319] ss:$2 sm:$0xff]  ;;  %vm2282_vm2 = vcmask 588800  }
  0x4d   :  { %v412_v47 = vmax.f32 %v2654_v18, %v2734_v33  ;;  %v414_v55 = vmax.f32 %v2656_v24, %v2736_v7 }
  0x4e   :  { %v4232_v22 = vsel %vm547_vm0, %v584_v63, %v585_v49  ;;  %2801 = vmatpush3.bf16.msra.mxu0 %v3501_v59  ;;  %v2740_v49 = vld [vmem:[%s5383_s0 + $0x361] ss:$2 sm:$0xff] }
  0x4f   :  { %v3064_v42 = vpack.i.bf16 %v4232_v22, %v4151_v41 }
  0x50   :  { %3015 = vrot.lane.b32.xlu1 %v3014_v48, %s3517_s17  ;;  %3010 = vrot.lane.b32.xlu0 %v3924_v9, %s3522_s27  ;;  %v2648_v9 = vld [vmem:[%s5383_s0 + $0x2d0] ss:$2 sm:$0xff] }
  0x51   :  { %v406_v10 = vmax.f32 %v2648_v9, %v2728_v44  ;;  %v2653_v48 = vld [vmem:[%s5383_s0 + $0x310] ss:$2 sm:$0x3]  ;;  %v3059_v9 = vpack.i.bf16 %v4148_v40, %v4145_v39  ;;  %v410_v44 = vmax.f32 %v2652_v14, %v2732_v35  ;;  %v3069_v39 = vpack.i.bf16 %v4081_v58, %v4072_v51  ;;  %v2662_v14 = vld [vmem:[%s5383_s0 + $0x378] ss:$2 sm:$0xff] }
  0x52   :  { %v411_v46 = vmax.f32 %v2653_v48, %v2733_v6  ;;  %v2661_v48 = vld [vmem:[%s5383_s0 + $0x370] ss:$2 sm:$0x3]  ;;  %v2741_v35 = vld [vmem:[%s5383_s0 + $0x371] ss:$2 sm:$0x3] }
  0x53   :  { %v4208_v17 = vmax.f32 %v406_v10, %v408_v54  ;;  %v4277_v41 = vmax.f32 %v410_v44, %v412_v47  ;;  %v588_v10 = vrot.slane %v457_v23, 2  ;;  %v2660_v54 = vld [vmem:[%s5383_s0 + $0x360] ss:$2 sm:$0xff]  ;;  %v2743_v6 = vld [vmem:[%s5383_s0 + $0x389] ss:$2 sm:$0x3]  ;;  %v419_v7 = vmax.f32 %v2661_v48, %v2741_v35 }
  0x54   :  { %3025 = vrot.lane.b32.xlu1 %v4141_v50, %s3517_s17  ;;  %3020 = vrot.lane.b32.xlu0 %v3019_v30, %s3522_s27  ;;  %v2738_v30 = vld [vmem:[%s5383_s0 + $0x349] ss:$2 sm:$0xff]  ;;  %v418_v28 = vmax.f32 %v2660_v54, %v2740_v49  ;;  %v2664_v44 = vld [vmem:[%s5383_s0 + $0x390] ss:$2 sm:$0xff] }
  0x55   :  { %v538_v43 = vrot.slane %v4208_v17, 1  ;;  %v416_v60 = vmax.f32 %v2658_v27, %v2738_v30  ;;  %v3074_v40 = vpack.i.bf16 %v4208_v17, %v4153_v19  ;;  %v541_v62 = vrot.slane %v4277_v41, 1  ;;  %v2665_v47 = vld [vmem:[%s5383_s0 + $0x3a0] ss:$2 sm:$0x3] }
  0x57   :  { %v4280_v1 = vsel %vm498_vm1, %v538_v43, %v539_v45  ;;  %v4282_v2 = vmax.f32 %v414_v55, %v416_v60  ;;  %v2666_v45 = vld [vmem:[%s5383_s0 + $0x3a8] ss:$2 sm:$0xff]  ;;  %v2745_v60 = vld [vmem:[%s5383_s0 + $0x3a1] ss:$2 sm:$0x3] }
  0x58   :  { %3035 = vrot.lane.b32.xlu1 %v4178_v8, %s3516_s16  ;;  %3030 = vrot.lane.b32.xlu0 %v3029_v53, %s3516_s16  ;;  %v413_v53 = vmax.f32 %v2655_v0, %v2735_v56  ;;  %v3084_v11 = vpack.i.bf16 %v4280_v1, %v537_v13  ;;  %v2663_v13 = vld [vmem:[%s5383_s0 + $0x388] ss:$2 sm:$0x3]  ;;  %v423_v49 = vmax.f32 %v2665_v47, %v2745_v60 }
  0x59   :  { %v544_v18 = vrot.slane %v4282_v2, 1  ;;  %v593_v26 = vrot.slane %v4282_v2, 2  ;;  %v421_v37 = vmax.f32 %v2663_v13, %v2743_v6 }
  0x5a   :  { %v459_v63 = vmax.f32 %v411_v46, %v413_v53  ;;  %v2746_v46 = vld [vmem:[%s5383_s0 + $0x3a9] ss:$2 sm:$0xff] }
  0x5b   :  { %v463_v43 = vmax.f32 %v419_v7, %v421_v37 }
  0x5c   :  { %3045 = vrot.lane.b32.xlu1 %v3044_v4, %s3515_s26  ;;  %3040 = vrot.lane.b32.xlu0 %v3039_v5, %s3515_s26  ;;  %v461_v4 = vmax.f32 %v415_v57, %v417_v61  ;;  %v587_v5 = vrot.slane %v4208_v17, 2  ;;  %v542_v12 = vrot.slane %v459_v63, 1  ;;  %v591_v23 = vrot.slane %v459_v63, 2  ;;  %v2667_v57 = vld [vmem:[%s5383_s0 + $0x3b8] ss:$2 sm:$0x3] }
  0x5d   :  { %v604_v55 = vrot.slane %v463_v43, 1  ;;  %v2747_v61 = vld [vmem:[%s5383_s0 + $0x3b9] ss:$2 sm:$0x3]  ;;  %v610_v54 = vrot.slane %v463_v43, 2 }
  0x5e   :  { %v545_v0 = vrot.slane %v461_v4, 1  ;;  %v589_v59 = vsel %vm547_vm0, %v587_v5, %v588_v10  ;;  %v543_v24 = vsel %vm498_vm1, %v541_v62, %v542_v12  ;;  %v594_v27 = vrot.slane %v461_v4, 2 }
  0x5f   :  { %v3099_v38 = vpack.i.bf16 %v589_v59, %v4232_v22  ;;  %v424_v5 = vmax.f32 %v2666_v45, %v2746_v46  ;;  %v3129_v12 = vpack.i.bf16 %v543_v24, %v4280_v1 }
  0x60   :  { %3055 = vrot.lane.b32.xlu1 %v3054_v21, %s3518_s14  ;;  %3050 = vrot.lane.b32.xlu0 %v3049_v15, %s3518_s14  ;;  %v2742_v15 = vld [vmem:[%s5383_s0 + $0x379] ss:$2 sm:$0xff]  ;;  %v590_v21 = vrot.slane %v4277_v41, 2  ;;  %v546_v33 = vsel %vm498_vm1, %v544_v18, %v545_v0 }
  0x61   :  { %v420_v56 = vmax.f32 %v2662_v14, %v2742_v15  ;;  %v3104_v30 = vpack.i.bf16 %v546_v33, %v543_v24 }
  0x64   :  { %3065 = vrot.lane.b32.xlu1 %v3064_v42, %s3519_s25  ;;  %3060 = vrot.lane.b32.xlu0 %v3059_v9, %s3519_s25  ;;  %v595_v42 = vsel %vm547_vm0, %v593_v26, %v594_v27  ;;  %v462_v9 = vmax.f32 %v418_v28, %v420_v56 }
  0x66   :  { %v603_v53 = vrot.slane %v462_v9, 1  ;;  %v609_v63 = vrot.slane %v462_v9, 2 }
  0x68   :  { %3075 = vrot.lane.b32.xlu1 %v3074_v40, %s3520_s12  ;;  %3070 = vrot.lane.b32.xlu0 %v3069_v39, %s3520_s12  ;;  %v3119_v39 = vpack.i.bf16 %v4277_v41, %v4208_v17  ;;  %v3124_v40 = vpack.i.bf16 %v462_v9, %v4282_v2  ;;  %v605_v10 = vsel %vm498_vm1, %v603_v53, %v604_v55 }
  0x69   :  { %v3134_v62 = vpack.i.bf16 %v605_v10, %v546_v33  ;;  %v611_v14 = vsel %vm547_vm0, %v609_v63, %v610_v54 }
  0x6a   :  { %v3144_v18 = vpack.i.bf16 %v611_v14, %v595_v42 }
  0x6c   :  { %3085 = vrot.lane.b32.xlu1 %v3084_v11, %s3521_s24  ;;  %3080 = vrot.lane.b32.xlu0 %v4141_v50, %s3521_s24  ;;  %v592_v50 = vsel %vm547_vm0, %v590_v21, %v591_v23  ;;  %v3149_v23 = vpack.i.bf16 %v4282_v2, %v4277_v41 }
  0x6d   :  { %v3114_v22 = vpack.i.bf16 %v595_v42, %v592_v50  ;;  %v3139_v0 = vpack.i.bf16 %v592_v50, %v589_v59 }
  0x70   :  { %3095 = vrot.lane.b32.xlu1 %v3084_v11, %s3517_s17  ;;  %3090 = vrot.lane.b32.xlu0 %v4178_v8, %s3522_s27  ;;  %v2744_v8 = vld [vmem:[%s5383_s0 + $0x391] ss:$2 sm:$0xff]  ;;  %v425_v11 = vmax.f32 %v2667_v57, %v2747_v61 }
  0x71   :  { %v422_v4 = vmax.f32 %v2664_v44, %v2744_v8 }
  0x72   :  { %v465_v48 = vmax.f32 %v423_v49, %v425_v11 }
  0x73   :  { %v464_v15 = vmax.f32 %v422_v4, %v424_v5 }
  0x74   :  { %3105 = vrot.lane.b32.xlu1 %v3104_v30, %s3517_s17  ;;  %3100 = vrot.lane.b32.xlu0 %v3099_v38, %s3522_s27  ;;  %v620_v35 = vrot.slane %v465_v48, 1  ;;  %v626_v27 = vrot.slane %v465_v48, 2 }
  0x75   :  { %v619_v13 = vrot.slane %v464_v15, 1  ;;  %v3154_v1 = vpack.i.bf16 %v464_v15, %v462_v9  ;;  %v625_v26 = vrot.slane %v464_v15, 2 }
  0x77   :  { %v621_v24 = vsel %vm498_vm1, %v619_v13, %v620_v35  ;;  %v627_v56 = vsel %vm547_vm0, %v625_v26, %v626_v27 }
  0x78   :  { %3115 = vrot.lane.b32.xlu1 %v3114_v22, %s3516_s16  ;;  %3110 = vrot.lane.b32.xlu0 %v3099_v38, %s3516_s16  ;;  %v3164_v33 = vpack.i.bf16 %v621_v24, %v605_v10  ;;  %v3174_v7 = vpack.i.bf16 %v627_v56, %v611_v14 }
  0x7c   :  { %3125 = vrot.lane.b32.xlu1 %v3124_v40, %s3515_s26  ;;  %3120 = vrot.lane.b32.xlu0 %v3119_v39, %s3515_s26 }
  0x7d   :  { %v4366_v6 = vpop.permute.xlu1 %2865 }
  0x7e   :  { %v2867_v4 = vunpack.i.l.bf16 %v4366_v6 }
  0x7f   :  { %v2861_v21 = vpop.permute.xlu0 %2860 }
  0x80   :  { %3135 = vrot.lane.b32.xlu1 %v3134_v62, %s3518_s14  ;;  %3130 = vrot.lane.b32.xlu0 %v3129_v12, %s3518_s14  ;;  %v2863_v5 = vunpack.i.h.bf16 %v2861_v21  ;;  %v2862_v10 = vunpack.i.l.bf16 %v2861_v21 }
  0x84   :  { %3145 = vrot.lane.b32.xlu1 %v3144_v18, %s3519_s25  ;;  %3140 = vrot.lane.b32.xlu0 %v3139_v0, %s3519_s25 }
  0x88   :  { %3155 = vrot.lane.b32.xlu1 %v3154_v1, %s3520_s12  ;;  %3150 = vrot.lane.b32.xlu0 %v3149_v23, %s3520_s12  ;;  %v2881_v59 = vpop.permute.xlu1 %2880  ;;  %v2871_v28 = vpop.permute.xlu0 %2870 }
  0x89   :  { %v2873_v9 = vunpack.i.h.bf16 %v2871_v28  ;;  %v2872_v43 = vunpack.i.l.bf16 %v2871_v28  ;;  %v2883_v47 = vunpack.i.h.bf16 %v2881_v59 }
  0x8b   :  { %v1014_v53 = vsel %vm1012_vm3, %v3634_v31, %v2873_v9 }
  0x8c   :  { %3165 = vrot.lane.b32.xlu1 %v3164_v33, %s3521_s24  ;;  %3160 = vrot.lane.b32.xlu0 %v3104_v30, %s3521_s24  ;;  %v2882_v30 = vunpack.i.l.bf16 %v2881_v59  ;;  %v1031_v63 = vsel %vm1029_vm4, %v1014_v53, %v2883_v47 }
  0x8d   :  { %v1048_v62 = vsel %vm1046_vm5, %v1031_v63, %v2863_v5 }
  0x8e   :  { %v2886_v37 = vpop.permute.xlu1 %2885  ;;  %v2876_v38 = vpop.permute.xlu0 %2875 }
  0x8f   :  { %v2878_v44 = vunpack.i.h.bf16 %v2876_v38  ;;  %v2877_v45 = vunpack.i.l.bf16 %v2876_v38  ;;  %v2888_v55 = vunpack.i.h.bf16 %v2886_v37  ;;  %v2887_v57 = vunpack.i.l.bf16 %v2886_v37 }
  0x90   :  { %3175 = vrot.lane.b32.xlu1 %v3174_v7, %s3522_s27  ;;  %3170 = vrot.lane.b32.xlu0 %v3114_v22, %s3522_s27  ;;  %v1013_v22 = vsel %vm1012_vm3, %v3672_v52, %v2872_v43  ;;  %v2868_v52 = vunpack.i.h.bf16 %v4366_v6 }
  0x91   :  { %v1016_v60 = vsel %vm1012_vm3, %v3604_v16, %v2878_v44  ;;  %v1015_v61 = vsel %vm1012_vm3, %v3642_v34, %v2877_v45  ;;  %v1030_v31 = vsel %vm1029_vm4, %v1013_v22, %v2882_v30 }
  0x92   :  { %v4380_v50 = vpop.permute.xlu1 %2895  ;;  %v2891_v42 = vpop.permute.xlu0 %2890  ;;  %v1033_v16 = vsel %vm1029_vm4, %v1016_v60, %v2888_v55  ;;  %v1032_v34 = vsel %vm1029_vm4, %v1015_v61, %v2887_v57  ;;  %v1047_v11 = vsel %vm1046_vm5, %v1030_v31, %v2862_v10 }
  0x93   :  { %v2893_v54 = vunpack.i.h.bf16 %v2891_v42  ;;  %v2892_v49 = vunpack.i.l.bf16 %v2891_v42  ;;  %v2898_v18 = vunpack.i.h.bf16 %v4380_v50  ;;  %v2897_v0 = vunpack.i.l.bf16 %v4380_v50 }
  0x94   :  { %v1049_v6 = vsel %vm1046_vm5, %v1032_v34, %v2867_v4  ;;  %v1050_v21 = vsel %vm1046_vm5, %v1033_v16, %v2868_v52 }
  0x95   :  { %v1064_v24 = vsel %vm1063_vm6, %v1047_v11, %v2892_v49  ;;  %v1065_v26 = vsel %vm1063_vm6, %v1048_v62, %v2893_v54  ;;  %v1066_v47 = vsel %vm1063_vm6, %v1049_v6, %v2897_v0  ;;  %v1067_v30 = vsel %vm1063_vm6, %v1050_v21, %v2898_v18 }
  0x96   :  { %v4382_v8 = vpop.permute.xlu1 %2905  ;;  %v2901_v46 = vpop.permute.xlu0 %2900 }
  0x97   :  { %v2903_v12 = vunpack.i.h.bf16 %v2901_v46  ;;  %v2902_v14 = vunpack.i.l.bf16 %v2901_v46  ;;  %v2908_v27 = vunpack.i.h.bf16 %v4382_v8  ;;  %v2907_v59 = vunpack.i.l.bf16 %v4382_v8 }
  0x99   :  { %v1081_v28 = vsel %vm1080_vm7, %v1064_v24, %v2902_v14  ;;  %v1082_v33 = vsel %vm1080_vm7, %v1065_v26, %v2903_v12  ;;  %v1083_v55 = vsel %vm1080_vm7, %v1066_v47, %v2907_v59  ;;  %v1084_v57 = vsel %vm1080_vm7, %v1067_v30, %v2908_v27 }
  0x9a   :  { %v2916_v39 = vpop.permute.xlu1 %2915  ;;  %v2911_v40 = vpop.permute.xlu0 %2910 }
  0x9b   :  { %v2913_v13 = vunpack.i.h.bf16 %v2911_v40  ;;  %v2912_v35 = vunpack.i.l.bf16 %v2911_v40  ;;  %v2918_v56 = vunpack.i.h.bf16 %v2916_v39  ;;  %v2917_v7 = vunpack.i.l.bf16 %v2916_v39 }
  0x9d   :  { %v1098_v9 = vsel %vm1097_vm8, %v1081_v28, %v2912_v35  ;;  %v1099_v43 = vsel %vm1097_vm8, %v1082_v33, %v2913_v13  ;;  %v1100_v40 = vsel %vm1097_vm8, %v1083_v55, %v2917_v7  ;;  %v1101_v63 = vsel %vm1097_vm8, %v1084_v57, %v2918_v56 }
  0x9e   :  { %v2926_v15 = vpop.permute.xlu1 %2925  ;;  %v2921_v48 = vpop.permute.xlu0 %2920 }
  0x9f   :  { %v2923_v1 = vunpack.i.h.bf16 %v2921_v48  ;;  %v2922_v23 = vunpack.i.l.bf16 %v2921_v48  ;;  %v2928_v44 = vunpack.i.h.bf16 %v2926_v15  ;;  %v2927_v45 = vunpack.i.l.bf16 %v2926_v15 }
  0xa1   :  { %v1115_v46 = vsel %vm1114_vm9, %v1098_v9, %v2922_v23  ;;  %v1116_v8 = vsel %vm1114_vm9, %v1099_v43, %v2923_v1  ;;  %v1117_v4 = vsel %vm1114_vm9, %v1100_v40, %v2927_v45  ;;  %v1118_v5 = vsel %vm1114_vm9, %v1101_v63, %v2928_v44 }
  0xa2   :  { %v2936_v37 = vpop.permute.xlu1 %2935  ;;  %v2931_v38 = vpop.permute.xlu0 %2930 }
  0xa3   :  { %v2933_v50 = vunpack.i.h.bf16 %v2931_v38  ;;  %v2932_v42 = vunpack.i.l.bf16 %v2931_v38  ;;  %v2938_v13 = vunpack.i.h.bf16 %v2936_v37  ;;  %v2937_v35 = vunpack.i.l.bf16 %v2936_v37 }
  0xa5   :  { %v1132_v53 = vsel %vm1131_vm10, %v1115_v46, %v2932_v42  ;;  %v1133_v22 = vsel %vm1131_vm10, %v1116_v8, %v2933_v50  ;;  %v1018_v38 = vsel %vm1012_vm3, %v3785_v3, %v2938_v13  ;;  %v1017_v37 = vsel %vm1012_vm3, %v3615_v20, %v2937_v35 }
  0xa6   :  { %v2946_v60 = vpop.permute.xlu1 %2945  ;;  %v2941_v61 = vpop.permute.xlu0 %2940  ;;  %v1148_v39 = vpack.c.bf16 %v1133_v22, %v1132_v53 }
  0xa7   :  { %v2943_v31 = vunpack.i.h.bf16 %v2941_v61  ;;  %v2942_v52 = vunpack.i.l.bf16 %v2941_v61  ;;  %v2948_v18 = vunpack.i.h.bf16 %v2946_v60  ;;  %v2947_v0 = vunpack.i.l.bf16 %v2946_v60 }
  0xa8   :  { %2802 = vmatprep.mubr.msk.bf16.mxu0 %vm1176_vm11, %v1148_v39 }
  0xa9   :  { %v1134_v10 = vsel %vm1131_vm10, %v1117_v4, %v2942_v52  ;;  %v1135_v16 = vsel %vm1131_vm10, %v1118_v5, %v2943_v31  ;;  %v1020_v28 = vsel %vm1012_vm3, %v3833_v36, %v2948_v18  ;;  %v1019_v33 = vsel %vm1012_vm3, %v3828_v32, %v2947_v0 }
  0xaa   :  { %v2956_v34 = vpop.permute.xlu1 %2955  ;;  %v2951_v54 = vpop.permute.xlu0 %2950  ;;  %v1149_v49 = vpack.c.bf16 %v1135_v16, %v1134_v10 }
  0xab   :  { %v2958_v6 = vunpack.i.h.bf16 %v2956_v34  ;;  %v2957_v21 = vunpack.i.l.bf16 %v2956_v34  ;;  %v2953_v1 = vunpack.i.h.bf16 %v2951_v54  ;;  %v2952_v23 = vunpack.i.l.bf16 %v2951_v54 }
  0xac   :  { %2803 = vmatmul.mubr.msk.bf16.vlgmr.msra.gmra.mxu0 %vm1176_vm11, %v1149_v49 }
  0xad   :  { %v1036_v50 = vsel %vm1029_vm4, %v1019_v33, %v2957_v21  ;;  %v1037_v42 = vsel %vm1029_vm4, %v1020_v28, %v2958_v6  ;;  %v1035_v9 = vsel %vm1029_vm4, %v1018_v38, %v2953_v1  ;;  %v1034_v43 = vsel %vm1029_vm4, %v1017_v37, %v2952_v23 }
  0xae   :  { %v2966_v11 = vpop.permute.xlu1 %2965  ;;  %v2961_v62 = vpop.permute.xlu0 %2960 }
  0xaf   :  { %v2968_v24 = vunpack.i.h.bf16 %v2966_v11  ;;  %v2967_v26 = vunpack.i.l.bf16 %v2966_v11  ;;  %v2963_v56 = vunpack.i.h.bf16 %v2961_v62  ;;  %v2962_v7 = vunpack.i.l.bf16 %v2961_v62 }
  0xb1   :  { %v1053_v32 = vsel %vm1046_vm5, %v1036_v50, %v2967_v26  ;;  %v1054_v45 = vsel %vm1046_vm5, %v1037_v42, %v2968_v24  ;;  %v1051_v20 = vsel %vm1046_vm5, %v1034_v43, %v2962_v7  ;;  %v1052_v30 = vsel %vm1046_vm5, %v1035_v9, %v2963_v56 }
  0xb2   :  { %v4428_v12 = vpop.permute.xlu1 %2975  ;;  %v2971_v14 = vpop.permute.xlu0 %2970 }
  0xb3   :  { %v2973_v36 = vunpack.i.h.bf16 %v2971_v14  ;;  %v2972_v44 = vunpack.i.l.bf16 %v2971_v14  ;;  %v2978_v55 = vunpack.i.h.bf16 %v4428_v12  ;;  %v2977_v57 = vunpack.i.l.bf16 %v4428_v12 }
  0xb5   :  { %v1068_v39 = vsel %vm1063_vm6, %v1051_v20, %v2972_v44  ;;  %v1069_v40 = vsel %vm1063_vm6, %v1052_v30, %v2973_v36  ;;  %v1070_v18 = vsel %vm1063_vm6, %v1053_v32, %v2977_v57  ;;  %v1071_v0 = vsel %vm1063_vm6, %v1054_v45, %v2978_v55 }
  0xb6   :  { %v4430_v15 = vpop.permute.xlu1 %2985  ;;  %v2981_v48 = vpop.permute.xlu0 %2980 }
  0xb7   :  { %v2983_v46 = vunpack.i.h.bf16 %v2981_v48  ;;  %v2982_v8 = vunpack.i.l.bf16 %v2981_v48  ;;  %v2988_v63 = vunpack.i.h.bf16 %v4430_v15  ;;  %v2987_v31 = vunpack.i.l.bf16 %v4430_v15 }
  0xb9   :  { %v1085_v52 = vsel %vm1080_vm7, %v1068_v39, %v2982_v8  ;;  %v1086_v4 = vsel %vm1080_vm7, %v1069_v40, %v2983_v46  ;;  %v1087_v6 = vsel %vm1080_vm7, %v1070_v18, %v2987_v31  ;;  %v1088_v21 = vsel %vm1080_vm7, %v1071_v0, %v2988_v63 }
  0xba   :  { %v2996_v27 = vpop.permute.xlu1 %2995  ;;  %v2991_v59 = vpop.permute.xlu0 %2990 }
  0xbb   :  { %v2993_v53 = vunpack.i.h.bf16 %v2991_v59  ;;  %v2992_v22 = vunpack.i.l.bf16 %v2991_v59  ;;  %v2998_v5 = vunpack.i.h.bf16 %v2996_v27  ;;  %v2997_v10 = vunpack.i.l.bf16 %v2996_v27 }
  0xbd   :  { %v1102_v54 = vsel %vm1097_vm8, %v1085_v52, %v2992_v22  ;;  %v1103_v49 = vsel %vm1097_vm8, %v1086_v4, %v2993_v53  ;;  %v1104_v26 = vsel %vm1097_vm8, %v1087_v6, %v2997_v10  ;;  %v1105_v27 = vsel %vm1097_vm8, %v1088_v21, %v2998_v5 }
  0xbe   :  { %v3006_v3 = vpop.permute.xlu1 %3005  ;;  %v3001_v47 = vpop.permute.xlu0 %3000 }
  0xbf   :  { %v3003_v60 = vunpack.i.h.bf16 %v3001_v47  ;;  %v3002_v61 = vunpack.i.l.bf16 %v3001_v47  ;;  %v3008_v12 = vunpack.i.h.bf16 %v3006_v3  ;;  %v3007_v14 = vunpack.i.l.bf16 %v3006_v3 }
  0xc1   :  { %v1119_v48 = vsel %vm1114_vm9, %v1102_v54, %v3002_v61  ;;  %v1120_v15 = vsel %vm1114_vm9, %v1103_v49, %v3003_v60  ;;  %v1121_v33 = vsel %vm1114_vm9, %v1104_v26, %v3007_v14  ;;  %v1122_v56 = vsel %vm1114_vm9, %v1105_v27, %v3008_v12 }
  0xc2   :  { %v3016_v16 = vpop.permute.xlu1 %3015  ;;  %v3011_v34 = vpop.permute.xlu0 %3010 }
  0xc3   :  { %v3013_v11 = vunpack.i.h.bf16 %v3011_v34  ;;  %v3012_v62 = vunpack.i.l.bf16 %v3011_v34  ;;  %v3018_v3 = vunpack.i.h.bf16 %v3016_v16  ;;  %v3017_v47 = vunpack.i.l.bf16 %v3016_v16 }
  0xc5   :  { %v1136_v13 = vsel %vm1131_vm10, %v1119_v48, %v3012_v62  ;;  %v1137_v35 = vsel %vm1131_vm10, %v1120_v15, %v3013_v11  ;;  %v1022_v52 = vsel %vm1012_vm3, %v4059_v29, %v3018_v3  ;;  %v1021_v4 = vsel %vm1012_vm3, %v4049_v25, %v3017_v47 }
  0xc6   :  { %v1150_v1 = vpack.c.bf16 %v1137_v35, %v1136_v13  ;;  %v3026_v23 = vpop.permute.xlu1 %3025  ;;  %v3021_v24 = vpop.permute.xlu0 %3020 }
  0xc7   :  { %v3023_v59 = vunpack.i.h.bf16 %v3021_v24  ;;  %v3022_v28 = vunpack.i.l.bf16 %v3021_v24  ;;  %v3028_v46 = vunpack.i.h.bf16 %v3026_v23  ;;  %v3027_v8 = vunpack.i.l.bf16 %v3026_v23 }
  0xc8   :  { %2806 = vmatprep.mubr.msk.bf16.mxu0 %vm1176_vm11, %v1150_v1 }
  0xc9   :  { %v1139_v7 = vsel %vm1131_vm10, %v1122_v56, %v3023_v59  ;;  %v1138_v38 = vsel %vm1131_vm10, %v1121_v33, %v3022_v28  ;;  %v1024_v39 = vsel %vm1012_vm3, %v4081_v58, %v3028_v46  ;;  %v1023_v40 = vsel %vm1012_vm3, %v4072_v51, %v3027_v8 }
  0xca   :  { %v1151_v37 = vpack.c.bf16 %v1139_v7, %v1138_v38  ;;  %v3036_v50 = vpop.permute.xlu1 %3035  ;;  %v3031_v42 = vpop.permute.xlu0 %3030 }
  0xcb   :  { %v3038_v20 = vunpack.i.h.bf16 %v3036_v50  ;;  %v3037_v30 = vunpack.i.l.bf16 %v3036_v50  ;;  %v3033_v53 = vunpack.i.h.bf16 %v3031_v42  ;;  %v3032_v22 = vunpack.i.l.bf16 %v3031_v42 }
  0xcc   :  { %2807 = vmatmul.mubr.msk.bf16.gmra.mxu0 %vm1176_vm11, %v1151_v37 }
  0xcd   :  { %v1040_v5 = vsel %vm1029_vm4, %v1023_v40, %v3037_v30  ;;  %v1041_v10 = vsel %vm1029_vm4, %v1024_v39, %v3038_v20  ;;  %v1039_v16 = vsel %vm1029_vm4, %v1022_v52, %v3033_v53  ;;  %v1038_v34 = vsel %vm1029_vm4, %v1021_v4, %v3032_v22 }
  0xce   :  { %v3046_v9 = vpop.permute.xlu1 %3045  ;;  %v3041_v43 = vpop.permute.xlu0 %3040 }
  0xcf   :  { %v3048_v55 = vunpack.i.h.bf16 %v3046_v9  ;;  %v3047_v57 = vunpack.i.l.bf16 %v3046_v9  ;;  %v3043_v63 = vunpack.i.h.bf16 %v3041_v43  ;;  %v3042_v31 = vunpack.i.l.bf16 %v3041_v43 }
  0xd1   :  { %v1057_v51 = vsel %vm1046_vm5, %v1040_v5, %v3047_v57  ;;  %v1058_v49 = vsel %vm1046_vm5, %v1041_v10, %v3048_v55  ;;  %v1055_v25 = vsel %vm1046_vm5, %v1038_v34, %v3042_v31  ;;  %v1056_v14 = vsel %vm1046_vm5, %v1039_v16, %v3043_v63 }
  0xd2   :  { %v4474_v36 = vpop.permute.xlu1 %3055  ;;  %v3051_v44 = vpop.permute.xlu0 %3050 }
  0xd3   :  { %v3053_v58 = vunpack.i.h.bf16 %v3051_v44  ;;  %v3052_v54 = vunpack.i.l.bf16 %v3051_v44  ;;  %v3058_v18 = vunpack.i.h.bf16 %v4474_v36  ;;  %v3057_v0 = vunpack.i.l.bf16 %v4474_v36 }
  0xd5   :  { %v1072_v6 = vsel %vm1063_vm6, %v1055_v25, %v3052_v54  ;;  %v1073_v21 = vsel %vm1063_vm6, %v1056_v14, %v3053_v58  ;;  %v1074_v36 = vsel %vm1063_vm6, %v1057_v51, %v3057_v0  ;;  %v1075_v44 = vsel %vm1063_vm6, %v1058_v49, %v3058_v18 }
  0xd6   :  { %v4476_v32 = vpop.permute.xlu1 %3065  ;;  %v3061_v45 = vpop.permute.xlu0 %3060 }
  0xd7   :  { %v3063_v11 = vunpack.i.h.bf16 %v3061_v45  ;;  %v3062_v62 = vunpack.i.l.bf16 %v3061_v45  ;;  %v3068_v1 = vunpack.i.h.bf16 %v4476_v32  ;;  %v3067_v23 = vunpack.i.l.bf16 %v4476_v32 }
  0xd9   :  { %v1089_v24 = vsel %vm1080_vm7, %v1072_v6, %v3062_v62  ;;  %v1090_v26 = vsel %vm1080_vm7, %v1073_v21, %v3063_v11  ;;  %v1091_v46 = vsel %vm1080_vm7, %v1074_v36, %v3067_v23  ;;  %v1092_v8 = vsel %vm1080_vm7, %v1075_v44, %v3068_v1 }
  0xda   :  { %v3076_v60 = vpop.permute.xlu1 %3075  ;;  %v3071_v61 = vpop.permute.xlu0 %3070 }
  0xdb   :  { %v3073_v48 = vunpack.i.h.bf16 %v3071_v61  ;;  %v3072_v15 = vunpack.i.l.bf16 %v3071_v61  ;;  %v3078_v27 = vunpack.i.h.bf16 %v3076_v60  ;;  %v3077_v59 = vunpack.i.l.bf16 %v3076_v60 }
  0xdd   :  { %v1106_v56 = vsel %vm1097_vm8, %v1089_v24, %v3072_v15  ;;  %v1107_v7 = vsel %vm1097_vm8, %v1090_v26, %v3073_v48  ;;  %v1108_v30 = vsel %vm1097_vm8, %v1091_v46, %v3077_v59  ;;  %v1109_v53 = vsel %vm1097_vm8, %v1092_v8, %v3078_v27 }
  0xde   :  { %v3086_v29 = vpop.permute.xlu1 %3085  ;;  %v3081_v12 = vpop.permute.xlu0 %3080 }
  0xdf   :  { %v3083_v13 = vunpack.i.h.bf16 %v3081_v12  ;;  %v3082_v35 = vunpack.i.l.bf16 %v3081_v12  ;;  %v3088_v50 = vunpack.i.h.bf16 %v3086_v29  ;;  %v3087_v42 = vunpack.i.l.bf16 %v3086_v29 }
  0xe1   :  { %v1123_v9 = vsel %vm1114_vm9, %v1106_v56, %v3082_v35  ;;  %v1124_v43 = vsel %vm1114_vm9, %v1107_v7, %v3083_v13  ;;  %v1125_v57 = vsel %vm1114_vm9, %v1108_v30, %v3087_v42  ;;  %v1126_v60 = vsel %vm1114_vm9, %v1109_v53, %v3088_v50 }
  0xe2   :  { %v3096_v28 = vpop.permute.xlu1 %3095  ;;  %v3091_v33 = vpop.permute.xlu0 %3090 }
  0xe3   :  { %v3093_v38 = vunpack.i.h.bf16 %v3091_v33  ;;  %v3092_v37 = vunpack.i.l.bf16 %v3091_v33  ;;  %v3098_v16 = vunpack.i.h.bf16 %v3096_v28  ;;  %v3097_v34 = vunpack.i.l.bf16 %v3096_v28 }
  0xe5   :  { %v1140_v32 = vsel %vm1131_vm10, %v1123_v9, %v3092_v37  ;;  %v1141_v45 = vsel %vm1131_vm10, %v1124_v43, %v3093_v38  ;;  %v1026_v18 = vsel %vm1012_vm3, %v4208_v17, %v3098_v16  ;;  %v1025_v0 = vsel %vm1012_vm3, %v4153_v19, %v3097_v34 }
  0xe6   :  { %v1152_v3 = vpack.c.bf16 %v1141_v45, %v1140_v32  ;;  %v3106_v47 = vpop.permute.xlu1 %3105  ;;  %v3101_v20 = vpop.permute.xlu0 %3100 }
  0xe7   :  { %v3103_v22 = vunpack.i.h.bf16 %v3101_v20  ;;  %v3102_v55 = vunpack.i.l.bf16 %v3101_v20  ;;  %v3108_v58 = vunpack.i.h.bf16 %v3106_v47  ;;  %v3107_v54 = vunpack.i.l.bf16 %v3106_v47 }
  0xe8   :  { %2810 = vmatprep.mubr.msk.bf16.mxu0 %vm1176_vm11, %v1152_v3 }
  0xe9   :  { %v1143_v61 = vsel %vm1131_vm10, %v1126_v60, %v3103_v22  ;;  %v1142_v39 = vsel %vm1131_vm10, %v1125_v57, %v3102_v55  ;;  %v1028_v13 = vsel %vm1012_vm3, %v4282_v2, %v3108_v58  ;;  %v1027_v35 = vsel %vm1012_vm3, %v4277_v41, %v3107_v54 }
  0xea   :  { %v1153_v40 = vpack.c.bf16 %v1143_v61, %v1142_v39  ;;  %v3116_v63 = vpop.permute.xlu1 %3115  ;;  %v3111_v31 = vpop.permute.xlu0 %3110 }
  0xeb   :  { %v3118_v51 = vunpack.i.h.bf16 %v3116_v63  ;;  %v3117_v49 = vunpack.i.l.bf16 %v3116_v63  ;;  %v3113_v11 = vunpack.i.h.bf16 %v3111_v31  ;;  %v3112_v62 = vunpack.i.l.bf16 %v3111_v31 }
  0xec   :  { %2811 = vmatmul.mubr.msk.bf16.gmra.mxu0 %vm1176_vm11, %v1153_v40 }
  0xed   :  { %v1044_v6 = vsel %vm1029_vm4, %v1027_v35, %v3117_v49  ;;  %v1045_v21 = vsel %vm1029_vm4, %v1028_v13, %v3118_v51  ;;  %v1043_v1 = vsel %vm1029_vm4, %v1026_v18, %v3113_v11  ;;  %v1042_v23 = vsel %vm1029_vm4, %v1025_v0, %v3112_v62 }
  0xee   :  { %v3126_v52 = vpop.permute.xlu1 %3125  ;;  %v3121_v4 = vpop.permute.xlu0 %3120 }
  0xef   :  { %v3128_v25 = vunpack.i.h.bf16 %v3126_v52  ;;  %v3127_v14 = vunpack.i.l.bf16 %v3126_v52  ;;  %v3123_v48 = vunpack.i.h.bf16 %v3121_v4  ;;  %v3122_v15 = vunpack.i.l.bf16 %v3121_v4 }
  0xf1   :  { %v1061_v28 = vsel %vm1046_vm5, %v1044_v6, %v3127_v14  ;;  %v1062_v2 = vsel %vm1046_vm5, %v1045_v21, %v3128_v25  ;;  %v1059_v41 = vsel %vm1046_vm5, %v1042_v23, %v3122_v15  ;;  %v1060_v33 = vsel %vm1046_vm5, %v1043_v1, %v3123_v48 }
  0xf2   :  { %v3136_v5 = vpop.permute.xlu1 %3135  ;;  %v3131_v10 = vpop.permute.xlu0 %3130  ;;  %v3523_v25 = vmov 0.0  }
  0xf3   :  { %v3138_v17 = vunpack.i.h.bf16 %v3136_v5  ;;  %v3137_v27 = vunpack.i.l.bf16 %v3136_v5  ;;  %v3133_v59 = vunpack.i.h.bf16 %v3131_v10  ;;  %v3132_v19 = vunpack.i.l.bf16 %v3131_v10  ;;  %1497 = vst.msk [vmem:[#allocation2 + $0x100] sm:$0xff] %vm1029_vm4, %v3523_v25  ;;  %1464 = vst.msk [vmem:[#allocation2] sm:$0xff] %vm1029_vm4, %v3523_v25 }
  0xf4   :  { %1498 = vst.msk [vmem:[#allocation2 + $0x108] sm:$0x3] %vm1465_vm12, %v3523_v25  ;;  %1466 = vst.msk [vmem:[#allocation2 + $0x8] sm:$0x3] %vm1465_vm12, %v3523_v25 }
  0xf5   :  { %v1078_v32 = vsel %vm1063_vm6, %v1061_v28, %v3137_v27  ;;  %v1079_v45 = vsel %vm1063_vm6, %v1062_v2, %v3138_v17  ;;  %v1076_v46 = vsel %vm1063_vm6, %v1059_v41, %v3132_v19  ;;  %v1077_v8 = vsel %vm1063_vm6, %v1060_v33, %v3133_v59  ;;  %1467 = vst.msk [vmem:[#allocation2 + $0x10] sm:$0xff] %vm1029_vm4, %v3523_v25 }
  0xf6   :  { %v3146_v29 = vpop.permute.xlu1 %3145  ;;  %v3141_v12 = vpop.permute.xlu0 %3140  ;;  %1468 = vst.msk [vmem:[#allocation2 + $0x18] sm:$0x3] %vm1465_vm12, %v3523_v25  ;;  %1470 = vst.msk [vmem:[#allocation2 + $0x28] sm:$0x3] %vm1465_vm12, %v3523_v25 }
  0xf7   :  { %v3148_v56 = vunpack.i.h.bf16 %v3146_v29  ;;  %v3147_v7 = vunpack.i.l.bf16 %v3146_v29  ;;  %v3143_v38 = vunpack.i.h.bf16 %v3141_v12  ;;  %v3142_v37 = vunpack.i.l.bf16 %v3141_v12  ;;  %1469 = vst.msk [vmem:[#allocation2 + $0x20] sm:$0xff] %vm1029_vm4, %v3523_v25  ;;  %1471 = vst.msk [vmem:[#allocation2 + $0x30] sm:$0xff] %vm1029_vm4, %v3523_v25 }
  0xf8   :  { %1472 = vst.msk [vmem:[#allocation2 + $0x38] sm:$0x3] %vm1465_vm12, %v3523_v25  ;;  %1474 = vst.msk [vmem:[#allocation2 + $0x48] sm:$0x3] %vm1465_vm12, %v3523_v25 }
  0xf9   :  { %v1095_v53 = vsel %vm1080_vm7, %v1078_v32, %v3147_v7  ;;  %v1096_v22 = vsel %vm1080_vm7, %v1079_v45, %v3148_v56  ;;  %v1093_v55 = vsel %vm1080_vm7, %v1076_v46, %v3142_v37  ;;  %v1094_v57 = vsel %vm1080_vm7, %v1077_v8, %v3143_v38  ;;  %1473 = vst.msk [vmem:[#allocation2 + $0x40] sm:$0xff] %vm1029_vm4, %v3523_v25 }
  0xfa   :  { %v3156_v24 = vpop.permute.xlu1 %3155  ;;  %v3151_v26 = vpop.permute.xlu0 %3150  ;;  %1475 = vst.msk [vmem:[#allocation2 + $0x50] sm:$0xff] %vm1029_vm4, %v3523_v25  ;;  %1477 = vst.msk [vmem:[#allocation2 + $0x60] sm:$0xff] %vm1029_vm4, %v3523_v25 }
  0xfb   :  { %v3158_v50 = vunpack.i.h.bf16 %v3156_v24  ;;  %v3157_v42 = vunpack.i.l.bf16 %v3156_v24  ;;  %v3153_v9 = vunpack.i.h.bf16 %v3151_v26  ;;  %v3152_v43 = vunpack.i.l.bf16 %v3151_v26  ;;  %1476 = vst.msk [vmem:[#allocation2 + $0x58] sm:$0x3] %vm1465_vm12, %v3523_v25  ;;  %1478 = vst.msk [vmem:[#allocation2 + $0x68] sm:$0x3] %vm1465_vm12, %v3523_v25 }
  0xfc   :  { %1479 = vst.msk [vmem:[#allocation2 + $0x70] sm:$0xff] %vm1029_vm4, %v3523_v25  ;;  %1481 = vst.msk [vmem:[#allocation2 + $0x80] sm:$0xff] %vm1029_vm4, %v3523_v25 }
  0xfd   :  { %v1112_v60 = vsel %vm1097_vm8, %v1095_v53, %v3157_v42  ;;  %v1113_v61 = vsel %vm1097_vm8, %v1096_v22, %v3158_v50  ;;  %v1110_v39 = vsel %vm1097_vm8, %v1093_v55, %v3152_v43  ;;  %v1111_v40 = vsel %vm1097_vm8, %v1094_v57, %v3153_v9  ;;  %1480 = vst.msk [vmem:[#allocation2 + $0x78] sm:$0x3] %vm1465_vm12, %v3523_v25 }
  0xfe   :  { %v3166_v36 = vpop.permute.xlu1 %3165  ;;  %v3161_v44 = vpop.permute.xlu0 %3160  ;;  %1482 = vst.msk [vmem:[#allocation2 + $0x88] sm:$0x3] %vm1465_vm12, %v3523_v25  ;;  %1484 = vst.msk [vmem:[#allocation2 + $0x98] sm:$0x3] %vm1465_vm12, %v3523_v25 }
  0xff   :  { %v3168_v3 = vunpack.i.h.bf16 %v3166_v36  ;;  %v3167_v47 = vunpack.i.l.bf16 %v3166_v36  ;;  %v3163_v20 = vunpack.i.h.bf16 %v3161_v44  ;;  %v3162_v30 = vunpack.i.l.bf16 %v3161_v44  ;;  %1483 = vst.msk [vmem:[#allocation2 + $0x90] sm:$0xff] %vm1029_vm4, %v3523_v25  ;;  %1485 = vst.msk [vmem:[#allocation2 + $0xa0] sm:$0xff] %vm1029_vm4, %v3523_v25 }
 0x100   :  { %1486 = vst.msk [vmem:[#allocation2 + $0xa8] sm:$0x3] %vm1465_vm12, %v3523_v25  ;;  %1488 = vst.msk [vmem:[#allocation2 + $0xb8] sm:$0x3] %vm1465_vm12, %v3523_v25 }
 0x101   :  { %v1129_v16 = vsel %vm1114_vm9, %v1112_v60, %v3167_v47  ;;  %v1130_v34 = vsel %vm1114_vm9, %v1113_v61, %v3168_v3  ;;  %v1127_v58 = vsel %vm1114_vm9, %v1110_v39, %v3162_v30  ;;  %v1128_v54 = vsel %vm1114_vm9, %v1111_v40, %v3163_v20  ;;  %1487 = vst.msk [vmem:[#allocation2 + $0xb0] sm:$0xff] %vm1029_vm4, %v3523_v25 }
 0x102   :  { %v3176_v63 = vpop.permute.xlu1 %3175  ;;  %v3171_v31 = vpop.permute.xlu0 %3170  ;;  %1489 = vst.msk [vmem:[#allocation2 + $0xc0] sm:$0xff] %vm1029_vm4, %v3523_v25  ;;  %1491 = vst.msk [vmem:[#allocation2 + $0xd0] sm:$0xff] %vm1029_vm4, %v3523_v25 }
 0x103   :  { %v3178_v52 = vunpack.i.h.bf16 %v3176_v63  ;;  %v3177_v4 = vunpack.i.l.bf16 %v3176_v63  ;;  %v3173_v5 = vunpack.i.h.bf16 %v3171_v31  ;;  %v3172_v10 = vunpack.i.l.bf16 %v3171_v31  ;;  %1490 = vst.msk [vmem:[#allocation2 + $0xc8] sm:$0x3] %vm1465_vm12, %v3523_v25  ;;  %1492 = vst.msk [vmem:[#allocation2 + $0xd8] sm:$0x3] %vm1465_vm12, %v3523_v25 }
 0x104   :  { %1493 = vst.msk [vmem:[#allocation2 + $0xe0] sm:$0xff] %vm1029_vm4, %v3523_v25  ;;  %1495 = vst.msk [vmem:[#allocation2 + $0xf0] sm:$0xff] %vm1029_vm4, %v3523_v25 }
 0x105   :  { %v1146_v51 = vsel %vm1131_vm10, %v1129_v16, %v3177_v4  ;;  %v1147_v49 = vsel %vm1131_vm10, %v1130_v34, %v3178_v52  ;;  %v1144_v11 = vsel %vm1131_vm10, %v1127_v58, %v3172_v10  ;;  %v1145_v62 = vsel %vm1131_vm10, %v1128_v54, %v3173_v5  ;;  %1494 = vst.msk [vmem:[#allocation2 + $0xe8] sm:$0x3] %vm1465_vm12, %v3523_v25 }
 0x106   :  { %v1155_v29 = vpack.c.bf16 %v1147_v49, %v1146_v51  ;;  %v1154_v12 = vpack.c.bf16 %v1145_v62, %v1144_v11  ;;  %1496 = vst.msk [vmem:[#allocation2 + $0xf8] sm:$0x3] %vm1465_vm12, %v3523_v25  ;;  %1500 = vst.msk [vmem:[#allocation2 + $0x118] sm:$0x3] %vm1465_vm12, %v3523_v25 }
 0x107   :  { %1499 = vst.msk [vmem:[#allocation2 + $0x110] sm:$0xff] %vm1029_vm4, %v3523_v25  ;;  %1501 = vst.msk [vmem:[#allocation2 + $0x120] sm:$0xff] %vm1029_vm4, %v3523_v25 }
 0x108   :  { %2814 = vmatprep.mubr.msk.bf16.mxu0 %vm1176_vm11, %v1154_v12  ;;  %1502 = vst.msk [vmem:[#allocation2 + $0x128] sm:$0x3] %vm1465_vm12, %v3523_v25  ;;  %1504 = vst.msk [vmem:[#allocation2 + $0x138] sm:$0x3] %vm1465_vm12, %v3523_v25 }
 0x109   :  { %2815 = vmatmul.mubr.msk.bf16.gmra.mxu0 %vm1176_vm11, %v1155_v29  ;;  %1503 = vst.msk [vmem:[#allocation2 + $0x130] sm:$0xff] %vm1029_vm4, %v3523_v25 }
 0x16c   :  { %v4598_v14 = vpop.f32.mrf.mxu0 }
 0x16d   :  { %v1343_v17 = vmul.f32 %v4598_v14, %v4598_v14  ;;  %v1305_v28 = vsel %vm1029_vm4, %v4598_v14, 0.0 }
 0x16e   :  { %v4600_v48 = vpop.f32.mrf.mxu0 }
 0x16f   :  { %v1341_v6 = vmul.f32 %v4600_v48, %v4600_v48  ;;  %v1302_v23 = vsel %vm1029_vm4, %v4600_v48, 0.0  ;;  %v1360_v33 = vsel %vm1029_vm4, %v1343_v17, 0.0 }
 0x170   :  { %v4602_v15 = vpop.f32.mrf.mxu0 }
 0x171   :  { %v1357_v27 = vsel %vm1029_vm4, %v1341_v6, 0.0  ;;  %v1344_v56 = vmul.f32 %v4602_v15, %v4602_v15  ;;  %v1307_v37 = vsel %vm1029_vm4, %v4602_v15, 0.0 }
 0x172   :  { %v4604_v18 = vpop.f32.mrf.mxu0 }
 0x173   :  { %v1342_v35 = vmul.f32 %v4604_v18, %v4604_v18  ;;  %v1303_v21 = vsel %vm1029_vm4, %v4604_v18, 0.0  ;;  %v1362_v36 = vsel %vm1029_vm4, %v1344_v56, 0.0 }
 0x174   :  { %v1304_v26 = vadd.f32 %v1303_v21, %v1302_v23 }
 0x175   :  { %v1358_v24 = vsel %vm1029_vm4, %v1342_v35, 0.0 }
 0x176   :  { %v1359_v59 = vadd.f32 %v1358_v24, %v1357_v27  ;;  %v1306_v2 = vadd.f32 %v1305_v28, %v1304_v26 }
 0x178   :  { %v1361_v38 = vadd.f32 %v1360_v33, %v1359_v59  ;;  %v1308_v9 = vadd.f32 %v1307_v37, %v1306_v2 }
 0x17a   :  { %v1363_v46 = vadd.f32 %v1362_v36, %v1361_v38 }
 0x18c   :  { %v4606_v0 = vpop.f32.mrf.mxu0 }
 0x18d   :  { %v1347_v30 = vmul.f32 %v4606_v0, %v4606_v0  ;;  %v1313_v22 = vsel %vm1029_vm4, %v4606_v0, 0.0 }
 0x18e   :  { %v4608_v13 = vpop.f32.mrf.mxu0 }
 0x18f   :  { %v1345_v7 = vmul.f32 %v4608_v13, %v4608_v13  ;;  %v1309_v50 = vsel %vm1029_vm4, %v4608_v13, 0.0  ;;  %v1368_v60 = vsel %vm1029_vm4, %v1347_v30, 0.0 }
 0x190   :  { %v4616_v1 = vpop.f32.mrf.mxu0  ;;  %v1310_v45 = vadd.f32 %v1309_v50, %v1308_v9 }
 0x191   :  { %v1364_v44 = vsel %vm1029_vm4, %v1345_v7, 0.0  ;;  %v1348_v61 = vmul.f32 %v4616_v1, %v4616_v1  ;;  %v1315_v63 = vsel %vm1029_vm4, %v4616_v1, 0.0 }
 0x192   :  { %v4624_v19 = vpop.f32.mrf.mxu0  ;;  %v1365_v3 = vadd.f32 %v1364_v44, %v1363_v46 }
 0x193   :  { %v1346_v42 = vmul.f32 %v4624_v19, %v4624_v19  ;;  %v1311_v32 = vsel %vm1029_vm4, %v4624_v19, 0.0  ;;  %v1370_v5 = vsel %vm1029_vm4, %v1348_v61, 0.0 }
 0x194   :  { %v1312_v47 = vadd.f32 %v1311_v32, %v1310_v45 }
 0x195   :  { %v1366_v8 = vsel %vm1029_vm4, %v1346_v42, 0.0 }
 0x196   :  { %v1367_v53 = vadd.f32 %v1366_v8, %v1365_v3  ;;  %v1314_v55 = vadd.f32 %v1313_v22, %v1312_v47 }
 0x198   :  { %v1369_v40 = vadd.f32 %v1368_v60, %v1367_v53  ;;  %v1316_v4 = vadd.f32 %v1315_v63, %v1314_v55 }
 0x19a   :  { %v1371_v58 = vadd.f32 %v1370_v5, %v1369_v40 }
 0x1ac   :  { %v4628_v41 = vpop.f32.mrf.mxu0 }
 0x1ad   :  { %v1351_v11 = vmul.f32 %v4628_v41, %v4628_v41  ;;  %v1321_v29 = vsel %vm1029_vm4, %v4628_v41, 0.0 }
 0x1ae   :  { %v4641_v43 = vpop.f32.mrf.mxu0 }
 0x1af   :  { %v1349_v39 = vmul.f32 %v4641_v43, %v4641_v43  ;;  %v1317_v31 = vsel %vm1029_vm4, %v4641_v43, 0.0  ;;  %v1376_v35 = vsel %vm1029_vm4, %v1351_v11, 0.0  ;;  %v1405_v11 = vlaneseq }
 0x1b0   :  { %v4648_v20 = vpop.f32.mrf.mxu0  ;;  %v1318_v34 = vadd.f32 %v1317_v31, %v1316_v4 }
 0x1b1   :  { %v1372_v10 = vsel %vm1029_vm4, %v1349_v39, 0.0  ;;  %v1352_v6 = vmul.f32 %v4648_v20, %v4648_v20  ;;  %v1323_v24 = vsel %vm1029_vm4, %v4648_v20, 0.0 }
 0x1b2   :  { %v4654_v57 = vpop.f32.mrf.mxu0  ;;  %v1373_v51 = vadd.f32 %v1372_v10, %v1371_v58 }
 0x1b3   :  { %v1350_v52 = vmul.f32 %v4654_v57, %v4654_v57  ;;  %v1319_v16 = vsel %vm1029_vm4, %v4654_v57, 0.0  ;;  %v1378_v28 = vsel %vm1029_vm4, %v1352_v6, 0.0 }
 0x1b4   :  { %v1320_v49 = vadd.f32 %v1319_v16, %v1318_v34 }
 0x1b5   :  { %v1374_v54 = vsel %vm1029_vm4, %v1350_v52, 0.0 }
 0x1b6   :  { %v1375_v62 = vadd.f32 %v1374_v54, %v1373_v51  ;;  %v1322_v12 = vadd.f32 %v1321_v29, %v1320_v49  ;;  %v1397_v29 = vld [vmem:[%s5385_s2] sm:$0x1]  ;;  %s3524_s2 = smov 48  }
 0x1b8   :  { %v1377_v21 = vadd.f32 %v1376_v35, %v1375_v62  ;;  %v1324_v27 = vadd.f32 %v1323_v24, %v1322_v12  ;;  %v1406_v62 = vshrl.u32 %v1405_v11, 7 }
 0x1ba   :  { %v1379_v56 = vadd.f32 %v1378_v28, %v1377_v21  ;;  %v4708_v12 = vsub.s32 0, %v1406_v62  ;;  %v1401_v21 = vld [vmem:[%s5386_s3] sm:$0x1] }
 0x1c9   :  { %v4676_v25 = vpop.f32.mrf.mxu0 }
 0x1ca   :  { %v1355_v38 = vmul.f32 %v4676_v25, %v4676_v25  ;;  %v1329_v36 = vsel %vm1029_vm4, %v4676_v25, 0.0 }
 0x1cb   :  { %v4681_v23 = vpop.f32.mrf.mxu0 }
 0x1cc   :  { %v1325_v26 = vsel %vm1029_vm4, %v4681_v23, 0.0  ;;  %v1353_v17 = vmul.f32 %v4681_v23, %v4681_v23  ;;  %v1384_v8 = vsel %vm1029_vm4, %v1355_v38, 0.0 }
 0x1cd   :  { %v4689_v59 = vpop.f32.mrf.mxu0  ;;  %v1326_v33 = vadd.f32 %v1325_v26, %v1324_v27 }
 0x1ce   :  { %v1380_v2 = vsel %vm1029_vm4, %v1353_v17, 0.0  ;;  %v1356_v44 = vmul.f32 %v4689_v59, %v4689_v59  ;;  %v1331_v3 = vsel %vm1029_vm4, %v4689_v59, 0.0 }
 0x1cf   :  { %v1290_v7 = vpop.f32.mrf.mxu0  ;;  %v1381_v42 = vadd.f32 %v1380_v2, %v1379_v56 }
 0x1d0   :  { %v1327_v37 = vsel %vm1029_vm4, %v1290_v7, 0.0  ;;  %v1354_v50 = vmul.f32 %v1290_v7, %v1290_v7  ;;  %v1386_v53 = vsel %vm1029_vm4, %v1356_v44, 0.0 }
 0x1d1   :  { %v1328_v9 = vadd.f32 %v1327_v37, %v1326_v33 }
 0x1d2   :  { %v1382_v32 = vsel %vm1029_vm4, %v1354_v50, 0.0 }
 0x1d3   :  { %v1330_v45 = vadd.f32 %v1329_v36, %v1328_v9  ;;  %v1383_v46 = vadd.f32 %v1382_v32, %v1381_v42 }
 0x1d5   :  { %v1332_v47 = vadd.f32 %v1331_v3, %v1330_v45  ;;  %v1385_v30 = vadd.f32 %v1384_v8, %v1383_v46 }
 0x1d7   :  { %v1333_v22 = vrot.slane %v1332_v47, 4  ;;  %v1387_v55 = vadd.f32 %v1386_v53, %v1385_v30 }
 0x1d9   :  { %v1334_v60 = vadd.f32 %v1333_v22, %v1332_v47  ;;  %v1388_v61 = vrot.slane %v1387_v55, 4 }
 0x1db   :  { %v1335_v39 = vrot.slane %v1334_v60, 2  ;;  %v1389_v40 = vadd.f32 %v1388_v61, %v1387_v55 }
 0x1dd   :  { %v1336_v63 = vadd.f32 %v1335_v39, %v1334_v60  ;;  %v1390_v31 = vrot.slane %v1389_v40, 2 }
 0x1df   :  { %v1337_v52 = vrot.slane %v1336_v63, 1  ;;  %v1391_v4 = vadd.f32 %v1390_v31, %v1389_v40 }
 0x1e1   :  { %v1338_v5 = vadd.f32 %v1337_v52, %v1336_v63  ;;  %v1392_v10 = vrot.slane %v1391_v4, 1 }
 0x1e3   :  { %v1340_v16 = vmul.f32 0.0078125, %v1338_v5  ;;  %v1393_v34 = vadd.f32 %v1392_v10, %v1391_v4 }
 0x1e5   :  { %v1394_v58 = vmul.f32 0.0078125, %v1393_v34  ;;  %v1395_v54 = vmul.f32 %v1340_v16, %v1340_v16 }
 0x1e7   :  { %v1396_v51 = vsub.f32 %v1394_v58, %v1395_v54 }
 0x1e9   :  { %v1398_v49 = vadd.f32 1e-05, %v1396_v51 }
 0x1eb   :  { %3507 = vrsqrt.f32 %v1398_v49 }
 0x1f8   :  { %v3508_v35 = vpop.eup %3507 }
 0x1f9   :  { %v1400_v6 = vmul.f32 %v3508_v35, %v1397_v29 }
 0x1fb   :  { %v1402_v24 = vmul.f32 %v1400_v6, %v1340_v16  ;;  %v1408_v26 = vrot.slane %v1400_v6, %v4708_v12 }
 0x1fd   :  { %v1403_v17 = vsub.f32 %v1401_v21, %v1402_v24  ;;  %v1423_v27 = vmul.f32 %v1408_v26, %v1290_v7  ;;  %v1412_v28 = vmul.f32 %v4598_v14, %v1408_v26  ;;  %v1413_v2 = vmul.f32 %v4602_v15, %v1408_v26 }
 0x1fe   :  { %v1410_v33 = vmul.f32 %v1408_v26, %v4600_v48  ;;  %v1411_v56 = vmul.f32 %v1408_v26, %v4604_v18  ;;  %v1414_v38 = vmul.f32 %v1408_v26, %v4608_v13  ;;  %v1416_v37 = vmul.f32 %v4606_v0, %v1408_v26 }
 0x1ff   :  { %v1430_v50 = vrot.slane %v1403_v17, %v4708_v12  ;;  %v1417_v42 = vmul.f32 %v4616_v1, %v1408_v26  ;;  %v1415_v9 = vmul.f32 %v1408_v26, %v4624_v19  ;;  %v1420_v7 = vmul.f32 %v4628_v41, %v1408_v26 }
 0x200   :  { %v1421_v14 = vmul.f32 %v4648_v20, %v1408_v26  ;;  %v1418_v15 = vmul.f32 %v1408_v26, %v4641_v43  ;;  %v1419_v48 = vmul.f32 %v1408_v26, %v4654_v57  ;;  %v1422_v18 = vmul.f32 %v1408_v26, %v4681_v23 }
 0x201   :  { %v1445_v36 = vadd.f32 %v1430_v50, %v1423_v27  ;;  %v1434_v13 = vadd.f32 %v1430_v50, %v1412_v28  ;;  %v1435_v44 = vadd.f32 %v1430_v50, %v1413_v2  ;;  %v1432_v0 = vadd.f32 %v1430_v50, %v1410_v33  ;;  %v4778_v27 = vld [vmem:[#allocation2 + $0x90] sm:$0xff] }
 0x202   :  { %v1433_v32 = vadd.f32 %v1430_v50, %v1411_v56  ;;  %v1436_v45 = vadd.f32 %v1430_v50, %v1414_v38  ;;  %v1438_v46 = vadd.f32 %v1430_v50, %v1416_v37  ;;  %v1439_v1 = vadd.f32 %v1430_v50, %v1417_v42 }
 0x203   :  { %v1461_v8 = vmax.f32 %v1445_v36, 0.0  ;;  %v1450_v19 = vmax.f32 %v1434_v13, 0.0  ;;  %v1451_v3 = vmax.f32 %v1435_v44, 0.0  ;;  %v1448_v41 = vmax.f32 %v1432_v0, 0.0 }
 0x204   :  { %v1449_v47 = vmax.f32 %v1433_v32, 0.0  ;;  %v1452_v20 = vmax.f32 %v1436_v45, 0.0  ;;  %v1454_v30 = vmax.f32 %v1438_v46, 0.0  ;;  %v1455_v43 = vmax.f32 %v1439_v1, 0.0 }
 0x205   :  { %1519 = vst.msk [vmem:[#allocation2 + $0x101] sm:$0xff] %vm1029_vm4, %v1461_v8  ;;  %1508 = vst.msk [vmem:[#allocation2 + $0x31] sm:$0xff] %vm1029_vm4, %v1450_v19  ;;  %v1437_v57 = vadd.f32 %v1430_v50, %v1415_v9  ;;  %v1442_v23 = vadd.f32 %v1430_v50, %v1420_v7  ;;  %v1443_v53 = vadd.f32 %v1430_v50, %v1421_v14 }
 0x206   :  { %1509 = vst.msk [vmem:[#allocation2 + $0x41] sm:$0xff] %vm1029_vm4, %v1451_v3  ;;  %1506 = vst.msk [vmem:[#allocation2 + $0x11] sm:$0xff] %vm1029_vm4, %v1448_v41  ;;  %v1440_v22 = vadd.f32 %v1430_v50, %v1418_v15  ;;  %v1441_v55 = vadd.f32 %v1430_v50, %v1419_v48  ;;  %v1444_v60 = vadd.f32 %v1430_v50, %v1422_v18  ;;  %v4806_v15 = vld [vmem:[#allocation2] sm:$0xff]  ;;  %v1523_v48 = vld [vmem:[#allocation2 + $0x8] sm:$0x3] }
 0x207   :  { %1507 = vst.msk [vmem:[#allocation2 + $0x21] sm:$0xff] %vm1029_vm4, %v1449_v47  ;;  %1510 = vst.msk [vmem:[#allocation2 + $0x51] sm:$0xff] %vm1029_vm4, %v1452_v20  ;;  %v1424_v61 = vmul.f32 %v4676_v25, %v1408_v26  ;;  %v1425_v39 = vmul.f32 %v4689_v59, %v1408_v26  ;;  %v1453_v40 = vmax.f32 %v1437_v57, 0.0  ;;  %v1458_v63 = vmax.f32 %v1442_v23, 0.0  ;;  %v4825_v20 = vld [vmem:[#allocation2 + $0x130] sm:$0xff] }
 0x208   :  { %1512 = vst.msk [vmem:[#allocation2 + $0x71] sm:$0xff] %vm1029_vm4, %v1454_v30  ;;  %1513 = vst.msk [vmem:[#allocation2 + $0x81] sm:$0xff] %vm1029_vm4, %v1455_v43  ;;  %v1459_v31 = vmax.f32 %v1443_v53, 0.0  ;;  %v1456_v52 = vmax.f32 %v1440_v22, 0.0  ;;  %v1457_v4 = vmax.f32 %v1441_v55, 0.0  ;;  %v1460_v5 = vmax.f32 %v1444_v60, 0.0 }
 0x209   :  { %v1446_v10 = vadd.f32 %v1430_v50, %v1424_v61  ;;  %v1447_v16 = vadd.f32 %v1430_v50, %v1425_v39  ;;  %1511 = vst.msk [vmem:[#allocation2 + $0x61] sm:$0xff] %vm1029_vm4, %v1453_v40  ;;  %1516 = vst.msk [vmem:[#allocation2 + $0xd1] sm:$0xff] %vm1029_vm4, %v1458_v63  ;;  %v1594_v46 = vrot.slane %v4806_v15, 1  ;;  %v1595_v1 = vrot.slane %v1523_v48, 1 }
 0x20a   :  { %1517 = vst.msk [vmem:[#allocation2 + $0xe1] sm:$0xff] %vm1029_vm4, %v1459_v31  ;;  %1514 = vst.msk [vmem:[#allocation2 + $0xb1] sm:$0xff] %vm1029_vm4, %v1456_v52  ;;  %v1642_v31 = vrot.slane %v4806_v15, 2  ;;  %v1643_v52 = vrot.slane %v1523_v48, 2  ;;  %v3503_v48 = vld [vmem:[%s5387_s4 + $0x18] sm:$0xff]  }
 0x20b   :  { %1515 = vst.msk [vmem:[#allocation2 + $0xc1] sm:$0xff] %vm1029_vm4, %v1457_v4  ;;  %1518 = vst.msk [vmem:[#allocation2 + $0xf1] sm:$0xff] %vm1029_vm4, %v1460_v5  ;;  %v1462_v25 = vmax.f32 %v1446_v10, 0.0  ;;  %v1463_v59 = vmax.f32 %v1447_v16, 0.0  ;;  %v1596_v57 = vsel %vm498_vm1, %v1594_v46, %v1595_v1 }
 0x20c   :  { %v4744_v34 = vld [vmem:[#allocation2 + $0x30] sm:$0xff]  ;;  %v1529_v44 = vld [vmem:[#allocation2 + $0x38] sm:$0x3]  ;;  %v4815_v0 = vld [vmem:[#allocation2 + $0x100] sm:$0xff] }
 0x20d   :  { %v4746_v58 = vld [vmem:[#allocation2 + $0x40] sm:$0xff]  ;;  %v4748_v54 = vld [vmem:[#allocation2 + $0x10] sm:$0xff]  ;;  %1520 = vst.msk [vmem:[#allocation2 + $0x111] sm:$0xff] %vm1029_vm4, %v1462_v25  ;;  %1521 = vst.msk [vmem:[#allocation2 + $0x121] sm:$0xff] %vm1029_vm4, %v1463_v59  ;;  %v1603_v45 = vrot.slane %v4744_v34, 1  ;;  %v1604_v41 = vrot.slane %v1529_v44, 1 }
 0x20e   :  { %v3184_v51 = vpack.i.bf16 %v4746_v58, %v4744_v34  ;;  %v4754_v49 = vld [vmem:[#allocation2 + $0x20] sm:$0xff]  ;;  %v4758_v62 = vld [vmem:[#allocation2 + $0x50] sm:$0xff]  ;;  %v1527_v14 = vld [vmem:[#allocation2 + $0x28] sm:$0x3]  ;;  %v1597_v30 = vrot.slane %v4748_v54, 1  ;;  %v1651_v23 = vrot.slane %v4744_v34, 2 }
 0x20f   :  { %v3179_v11 = vpack.i.bf16 %v4754_v49, %v4748_v54  ;;  %v3194_v29 = vpack.i.bf16 %v4758_v62, %v4746_v58  ;;  %v3189_v35 = vpack.i.bf16 %v4744_v34, %v4754_v49  ;;  %v4766_v6 = vld [vmem:[#allocation2 + $0x70] sm:$0xff]  ;;  %v4768_v21 = vld [vmem:[#allocation2 + $0x80] sm:$0xff]  ;;  %v1525_v32 = vld [vmem:[#allocation2 + $0x18] sm:$0x3]  ;;  %v1600_v19 = vrot.slane %v4754_v49, 1 }
 0x210   :  { %3185 = vrot.lane.b32.xlu1 %v3184_v51, %s3520_s12  ;;  %v4771_v24 = vld [vmem:[#allocation2 + $0x60] sm:$0xff]  ;;  %v3204_v26 = vpack.i.bf16 %v4768_v21, %v4766_v6  ;;  %v3214_v28 = vpack.i.bf16 %v4778_v27, %v4768_v21  ;;  %v4786_v33 = vld [vmem:[#allocation2 + $0xd0] sm:$0xff]  ;;  %v1601_v3 = vrot.slane %v1527_v14, 1  ;;  %v1598_v43 = vrot.slane %v1525_v32, 1  ;;  %v1531_v10 = vld [vmem:[#allocation2 + $0x48] sm:$0x3] }
 0x211   :  { %3180 = vrot.lane.b32.xlu0 %v3179_v11, %s3520_s12  ;;  %v3199_v17 = vpack.i.bf16 %v4771_v24, %v4758_v62  ;;  %v3209_v2 = vpack.i.bf16 %v4766_v6, %v4771_v24  ;;  %v4788_v56 = vld [vmem:[#allocation2 + $0xe0] sm:$0xff]  ;;  %v4791_v38 = vld [vmem:[#allocation2 + $0xb0] sm:$0xff]  ;;  %v1605_v55 = vsel %vm498_vm1, %v1603_v45, %v1604_v41  ;;  %v1648_v60 = vrot.slane %v4754_v49, 2 }
 0x212   :  { %v4793_v37 = vld [vmem:[#allocation2 + $0xc0] sm:$0xff]  ;;  %v3224_v50 = vpack.i.bf16 %v4788_v56, %v4786_v33  ;;  %v4800_v9 = vld [vmem:[#allocation2 + $0xf0] sm:$0xff]  ;;  %v1602_v22 = vsel %vm498_vm1, %v1600_v19, %v1601_v3  ;;  %v1599_v39 = vsel %vm498_vm1, %v1597_v30, %v1598_v43  ;;  %v1649_v40 = vrot.slane %v1527_v14, 2  ;;  %v1533_v14 = vld [vmem:[#allocation2 + $0x58] sm:$0x3] }
 0x213   :  { %v3219_v42 = vpack.i.bf16 %v4793_v37, %v4791_v38  ;;  %v3234_v7 = vpack.i.bf16 %v4800_v9, %v4788_v56  ;;  %v3229_v18 = vpack.i.bf16 %v4786_v33, %v4793_v37  ;;  %v3239_v47 = vpack.i.bf16 %v4815_v0, %v4800_v9  ;;  %v1537_v30 = vld [vmem:[#allocation2 + $0x78] sm:$0x3]  ;;  %v3505_v43 = vld [vmem:[%s5387_s4 + $0x8] sm:$0xff]  }
 0x214   :  { %3195 = vrot.lane.b32.xlu1 %v3194_v29, %s3524_s2  ;;  %v4810_v36 = vld [vmem:[#allocation2 + $0x110] sm:$0xff]  ;;  %v4812_v13 = vld [vmem:[#allocation2 + $0x120] sm:$0xff]  ;;  %v1652_v63 = vrot.slane %v1529_v44, 2  ;;  %v1645_v4 = vrot.slane %v4748_v54, 2  ;;  %v1646_v5 = vrot.slane %v1525_v32, 2  ;;  %v3264_v16 = vpack.i.bf16 %v1605_v55, %v1602_v22 }
 0x215   :  { %3190 = vrot.lane.b32.xlu0 %v3189_v35, %s3524_s2  ;;  %v3244_v8 = vpack.i.bf16 %v4812_v13, %v4810_v36  ;;  %v3254_v53 = vpack.i.bf16 %v4825_v20, %v4812_v13  ;;  %v3249_v61 = vpack.i.bf16 %v4810_v36, %v4815_v0  ;;  %v3259_v25 = vpack.i.bf16 %v1599_v39, %v1596_v57 }
 0x216   :  { %v1650_v59 = vsel %vm547_vm0, %v1648_v60, %v1649_v40  ;;  %v1653_v51 = vsel %vm547_vm0, %v1651_v23, %v1652_v63  ;;  %v1606_v11 = vrot.slane %v4746_v58, 1  ;;  %v1607_v29 = vrot.slane %v1531_v10, 1 }
 0x217   :  { %v1644_v35 = vsel %vm547_vm0, %v1642_v31, %v1643_v52  ;;  %v3279_v32 = vpack.i.bf16 %v1602_v22, %v1599_v39  ;;  %v1609_v46 = vrot.slane %v4758_v62, 1  ;;  %v1610_v1 = vrot.slane %v1533_v14, 1  ;;  %v3506_v39 = vld [vmem:[%s5387_s4] sm:$0xff]  }
 0x218   :  { %3205 = vrot.lane.b32.xlu1 %v3204_v26, %s3520_s12  ;;  %v1647_v26 = vsel %vm547_vm0, %v1645_v4, %v1646_v5  ;;  %v1612_v57 = vrot.slane %v4771_v24, 1  ;;  %v1615_v22 = vrot.slane %v4766_v6, 1  ;;  %v1657_v60 = vrot.slane %v4758_v62, 2 }
 0x219   :  { %3200 = vrot.lane.b32.xlu0 %v3199_v17, %s3520_s12  ;;  %v3274_v17 = vpack.i.bf16 %v1653_v51, %v1650_v59  ;;  %v3289_v3 = vpack.i.bf16 %v1650_v59, %v1647_v26  ;;  %v1611_v41 = vsel %vm498_vm1, %v1609_v46, %v1610_v1  ;;  %v1660_v31 = vrot.slane %v4771_v24, 2 }
 0x21a   :  { %v1663_v4 = vrot.slane %v4766_v6, 2  ;;  %v1664_v5 = vrot.slane %v1537_v30, 2  ;;  %v1694_v59 = vrot.slane %v4768_v21, 1 }
 0x21c   :  { %3215 = vrot.lane.b32.xlu1 %v3214_v28, %s3524_s2  ;;  %v3502_v28 = vld [vmem:[%s5387_s4 + $0x20] ss:$0 sps:$4 sm:$0xff]  }
 0x21d   :  { %3210 = vrot.lane.b32.xlu0 %v3209_v2, %s3524_s2  ;;  %v3269_v2 = vpack.i.bf16 %v1647_v26, %v1644_v35  ;;  %2845 = vmatprep.subr.msk.bf16.mxu1 %vm2307_vm13, %v3502_v28  ;;  %v2309_v44 = vsel %vm2307_vm13, %v3502_v28, 0  ;;  %v1700_v28 = vrot.slane %v4768_v21, 2  ;;  %v1545_v21 = vld [vmem:[#allocation2 + $0xb8] sm:$0x3] }
 0x21e   :  { %2819 = vmatpush3.bf16.msra.mxu1 %v2309_v44  ;;  %v4900_v44 = vld [vmem:[#allocation2 + $0xa0] sm:$0xff] }
 0x21f   :  { %2820 = vmatprep.subr.bf16.mxu1 %v3503_v48  ;;  %v1618_v46 = vrot.slane %v4900_v44, 1 }
 0x220   :  { %3225 = vrot.lane.b32.xlu1 %v3224_v50, %s3520_s12  ;;  %v1608_v50 = vsel %vm498_vm1, %v1606_v11, %v1607_v29  ;;  %v1665_v29 = vsel %vm547_vm0, %v1663_v4, %v1664_v5  ;;  %v1675_v5 = vrot.slane %v4786_v33, 2 }
 0x221   :  { %3220 = vrot.lane.b32.xlu0 %v3219_v42, %s3520_s12  ;;  %v1654_v42 = vrot.slane %v4746_v58, 2  ;;  %v3304_v23 = vpack.i.bf16 %v1611_v41, %v1608_v50 }
 0x222   :  { %2821 = vmatpush3.bf16.msra.mxu1 %v3503_v48 }
 0x224   :  { %3235 = vrot.lane.b32.xlu1 %v3234_v7, %s3524_s2  ;;  %v1655_v7 = vrot.slane %v1531_v10, 2 }
 0x225   :  { %3230 = vrot.lane.b32.xlu0 %v3229_v18, %s3524_s2  ;;  %v3284_v18 = vpack.i.bf16 %v1608_v50, %v1605_v55  ;;  %v1616_v55 = vrot.slane %v1537_v30, 1  ;;  %v1541_v50 = vld [vmem:[#allocation2 + $0x98] sm:$0x3] }
 0x226   :  { %v1656_v45 = vsel %vm547_vm0, %v1654_v42, %v1655_v7  ;;  %v1710_v7 = vrot.slane %v4778_v27, 1  ;;  %v1549_v30 = vld [vmem:[#allocation2 + $0xd8] sm:$0x3] }
 0x227   :  { %v3294_v19 = vpack.i.bf16 %v1656_v45, %v1653_v51  ;;  %v1617_v63 = vsel %vm498_vm1, %v1615_v22, %v1616_v55  ;;  %v1624_v22 = vrot.slane %v4793_v37, 1 }
 0x228   :  { %3245 = vrot.lane.b32.xlu1 %v3244_v8, %s3520_s12  ;;  %v3504_v8 = vld [vmem:[%s5387_s4 + $0x10] sm:$0xff]   ;;  %s3527_s4 = smov 64  }
 0x229   :  { %3240 = vrot.lane.b32.xlu0 %v3239_v47, %s3520_s12  ;;  %v1535_v47 = vld [vmem:[#allocation2 + $0x68] sm:$0x3]  ;;  %2822 = vmatprep.subr.bf16.mxu1 %v3504_v8 }
 0x22a   :  { %2823 = vmatpush3.bf16.msra.mxu1 %v3504_v8  ;;  %v1661_v52 = vrot.slane %v1535_v47, 2  ;;  %v1621_v8 = vrot.slane %v4791_v38, 1 }
 0x22b   :  { %2824 = vmatprep.subr.bf16.mxu1 %v3505_v43 }
 0x22c   :  { %3255 = vrot.lane.b32.xlu1 %v3254_v53, %s3524_s2  ;;  %v1613_v53 = vrot.slane %v1535_v47, 1  ;;  %v1662_v11 = vsel %vm547_vm0, %v1660_v31, %v1661_v52  ;;  %v1547_v47 = vld [vmem:[#allocation2 + $0xc8] sm:$0x3]  ;;  %v1672_v31 = vrot.slane %v4793_v37, 2 }
 0x22d   :  { %3250 = vrot.lane.b32.xlu0 %v3249_v61, %s3524_s2  ;;  %v1658_v61 = vrot.slane %v1533_v14, 2  ;;  %v3334_v26 = vpack.i.bf16 %v1665_v29, %v1662_v11  ;;  %v1711_v14 = vrot.slane %v1541_v50, 1  ;;  %v1625_v55 = vrot.slane %v1547_v47, 1 }
 0x22e   :  { %v1614_v40 = vsel %vm498_vm1, %v1612_v57, %v1613_v53  ;;  %2825 = vmatpush3.bf16.msra.mxu1 %v3505_v43  ;;  %v1716_v43 = vrot.slane %v4778_v27, 2  ;;  %v1717_v57 = vrot.slane %v1541_v50, 2  ;;  %v1673_v4 = vrot.slane %v1547_v47, 2  ;;  %v1555_v47 = vld [vmem:[#allocation2 + $0x108] sm:$0x3] }
 0x22f   :  { %v1659_v10 = vsel %vm547_vm0, %v1657_v60, %v1658_v61  ;;  %2826 = vmatprep.subr.bf16.mxu1 %v3506_v39  ;;  %v3339_v48 = vpack.i.bf16 %v1614_v40, %v1611_v41  ;;  %v1622_v41 = vrot.slane %v1545_v21, 1  ;;  %v1627_v61 = vrot.slane %v4786_v33, 1 }
 0x230   :  { %3265 = vrot.lane.b32.xlu1 %v3264_v16, %s3516_s16  ;;  %v3319_v51 = vpack.i.bf16 %v1659_v10, %v1656_v45  ;;  %v1718_v27 = vsel %vm547_vm0, %v1716_v43, %v1717_v57  ;;  %v1636_v43 = vrot.slane %v4815_v0, 1 }
 0x231   :  { %3260 = vrot.lane.b32.xlu0 %v3259_v25, %s3516_s16  ;;  %v1539_v25 = vld [vmem:[#allocation2 + $0x88] sm:$0x3]  ;;  %v1623_v60 = vsel %vm498_vm1, %v1621_v8, %v1622_v41  ;;  %v1633_v8 = vrot.slane %v4800_v9, 1 }
 0x232   :  { %v1695_v35 = vrot.slane %v1539_v25, 1  ;;  %2827 = vmatpush3.bf16.msra.mxu1 %v3506_v39  ;;  %v1628_v39 = vrot.slane %v1549_v30, 1 }
 0x234   :  { %3275 = vrot.lane.b32.xlu1 %v3274_v17, %s3518_s14  ;;  %v1629_v52 = vsel %vm498_vm1, %v1627_v61, %v1628_v39 }
 0x235   :  { %3270 = vrot.lane.b32.xlu0 %v3269_v2, %s3518_s14  ;;  %v1696_v2 = vsel %vm498_vm1, %v1694_v59, %v1695_v35  ;;  %v1666_v59 = vrot.slane %v4900_v44, 2 }
 0x236   :  { %v3344_v42 = vpack.i.bf16 %v1696_v2, %v1617_v63 }
 0x238   :  { %3285 = vrot.lane.b32.xlu1 %v3284_v18, %s3522_s27 }
 0x239   :  { %3280 = vrot.lane.b32.xlu0 %v3279_v32, %s3522_s27  ;;  %v1543_v32 = vld [vmem:[#allocation2 + $0xa8] sm:$0x3] }
 0x23a   :  { %v1619_v1 = vrot.slane %v1543_v32, 1 }
 0x23c   :  { %3295 = vrot.lane.b32.xlu1 %v3294_v19, %s3525_s29  ;;  %v1712_v19 = vsel %vm498_vm1, %v1710_v7, %v1711_v14  ;;  %v1620_v53 = vsel %vm498_vm1, %v1618_v46, %v1619_v1 }
 0x23d   :  { %3290 = vrot.lane.b32.xlu0 %v3289_v3, %s3525_s29  ;;  %v3349_v3 = vpack.i.bf16 %v1662_v11, %v1659_v10  ;;  %v1676_v10 = vrot.slane %v1549_v30, 2  ;;  %v1551_v11 = vld [vmem:[#allocation2 + $0xe8] sm:$0x3]  ;;  %v1557_v30 = vld [vmem:[#allocation2 + $0x118] sm:$0x3] }
 0x23e   :  { %v1631_v50 = vrot.slane %v1551_v11, 1 }
 0x240   :  { %3305 = vrot.lane.b32.xlu1 %v3304_v23, %s3526_s9 }
 0x241   :  { %3300 = vrot.lane.b32.xlu0 %v3264_v16, %s3526_s9  ;;  %v3324_v16 = vpack.i.bf16 %v1617_v63, %v1614_v40  ;;  %v3374_v40 = vpack.i.bf16 %v1623_v60, %v1620_v53  ;;  %v1626_v63 = vsel %vm498_vm1, %v1624_v22, %v1625_v55  ;;  %v1639_v53 = vrot.slane %v4810_v36, 1 }
 0x242   :  { %v3399_v46 = vpack.i.bf16 %v1626_v63, %v1623_v60  ;;  %v1640_v22 = vrot.slane %v1557_v30, 1  ;;  %v1681_v55 = vrot.slane %v4800_v9, 2  ;;  %v1697_v9 = vrot.slane %v4812_v13, 1 }
 0x244   :  { %3315 = vrot.lane.b32.xlu1 %v3304_v23, %s3516_s16  ;;  %v3364_v23 = vpack.i.bf16 %v1712_v19, %v1696_v2  ;;  %v1677_v2 = vsel %vm547_vm0, %v1675_v5, %v1676_v10  ;;  %v1641_v39 = vsel %vm498_vm1, %v1639_v53, %v1640_v22 }
 0x245   :  { %3310 = vrot.lane.b32.xlu0 %v3274_v17, %s3527_s4  ;;  %v1701_v17 = vrot.slane %v1539_v25, 2  ;;  %v1669_v25 = vrot.slane %v4791_v38, 2 }
 0x247   :  { %v1702_v18 = vsel %vm547_vm0, %v1700_v28, %v1701_v17  ;;  %v1674_v28 = vsel %vm547_vm0, %v1672_v31, %v1673_v4  ;;  %v1630_v17 = vrot.slane %v4788_v56, 1  ;;  %v1688_v31 = vrot.slane %v1557_v30, 2  ;;  %v1559_v4 = vld [vmem:[#allocation2 + $0x128] sm:$0x3] }
 0x248   :  { %3325 = vrot.lane.b32.xlu1 %v3324_v16, %s3516_s16  ;;  %v3354_v45 = vpack.i.bf16 %v1702_v18, %v1665_v29  ;;  %v3384_v29 = vpack.i.bf16 %v1629_v52, %v1626_v63  ;;  %v3379_v35 = vpack.i.bf16 %v1718_v27, %v1702_v18  ;;  %v3394_v14 = vpack.i.bf16 %v1677_v2, %v1674_v28 }
 0x249   :  { %3320 = vrot.lane.b32.xlu0 %v3319_v51, %s3527_s4  ;;  %v1678_v18 = vrot.slane %v4788_v56, 2  ;;  %v1684_v27 = vrot.slane %v4815_v0, 2  ;;  %v1687_v63 = vrot.slane %v4810_v36, 2  ;;  %v1698_v0 = vrot.slane %v1559_v4, 1 }
 0x24c   :  { %3335 = vrot.lane.b32.xlu1 %v3334_v26, %s3518_s14 }
 0x24d   :  { %3330 = vrot.lane.b32.xlu0 %v3319_v51, %s3518_s14  ;;  %v1670_v51 = vrot.slane %v1545_v21, 2  ;;  %v1553_v21 = vld [vmem:[#allocation2 + $0xf8] sm:$0x3] }
 0x24e   :  { %v1634_v19 = vrot.slane %v1553_v21, 1  ;;  %v1682_v60 = vrot.slane %v1553_v21, 2 }
 0x24f   :  { %v1671_v7 = vsel %vm547_vm0, %v1669_v25, %v1670_v51  ;;  %v1699_v51 = vsel %vm498_vm1, %v1697_v9, %v1698_v0 }
 0x250   :  { %3345 = vrot.lane.b32.xlu1 %v3344_v42, %s3522_s27  ;;  %v3409_v41 = vpack.i.bf16 %v1674_v28, %v1671_v7  ;;  %v1635_v56 = vsel %vm498_vm1, %v1633_v8, %v1634_v19  ;;  %v1713_v28 = vrot.slane %v4825_v20, 1 }
 0x251   :  { %3340 = vrot.lane.b32.xlu0 %v3339_v48, %s3522_s27 }
 0x254   :  { %3355 = vrot.lane.b32.xlu1 %v3354_v45, %s3525_s29 }
 0x255   :  { %3350 = vrot.lane.b32.xlu0 %v3349_v3, %s3525_s29 }
 0x258   :  { %3365 = vrot.lane.b32.xlu1 %v3364_v23, %s3526_s9  ;;  %v1637_v23 = vrot.slane %v1555_v47, 1 }
 0x259   :  { %3360 = vrot.lane.b32.xlu0 %v3324_v16, %s3526_s9  ;;  %v1667_v16 = vrot.slane %v1543_v32, 2  ;;  %v1679_v32 = vrot.slane %v1551_v11, 2  ;;  %v1704_v11 = vrot.slane %v1559_v4, 2 }
 0x25a   :  { %v1638_v61 = vsel %vm498_vm1, %v1636_v43, %v1637_v23 }
 0x25b   :  { %v1668_v42 = vsel %vm547_vm0, %v1666_v59, %v1667_v16  ;;  %v1680_v1 = vsel %vm547_vm0, %v1678_v18, %v1679_v32  ;;  %v3444_v5 = vpack.i.bf16 %v1641_v39, %v1638_v61  ;;  %v1689_v59 = vsel %vm547_vm0, %v1687_v63, %v1688_v31 }
 0x25c   :  { %3375 = vrot.lane.b32.xlu1 %v3374_v40, %s3516_s16  ;;  %v3389_v48 = vpack.i.bf16 %v1671_v7, %v1668_v42  ;;  %v3414_v3 = vpack.i.bf16 %v1680_v1, %v1677_v2  ;;  %v1685_v40 = vrot.slane %v1555_v47, 2  ;;  %v1703_v16 = vrot.slane %v4812_v13, 2 }
 0x25d   :  { %3370 = vrot.lane.b32.xlu0 %v3334_v26, %s3527_s4  ;;  %v1632_v26 = vsel %vm498_vm1, %v1630_v17, %v1631_v50  ;;  %v3459_v2 = vpack.i.bf16 %v1638_v61, %v1635_v56  ;;  %v1719_v7 = vrot.slane %v4825_v20, 2 }
 0x25e   :  { %v3404_v45 = vpack.i.bf16 %v1632_v26, %v1629_v52  ;;  %v3424_v57 = vpack.i.bf16 %v1635_v56, %v1632_v26  ;;  %v1683_v52 = vsel %vm547_vm0, %v1681_v55, %v1682_v60  ;;  %v1686_v25 = vsel %vm547_vm0, %v1684_v27, %v1685_v40 }
 0x25f   :  { %v3439_v10 = vpack.i.bf16 %v1683_v52, %v1680_v1  ;;  %v3454_v36 = vpack.i.bf16 %v1689_v59, %v1686_v25  ;;  %v1705_v17 = vsel %vm547_vm0, %v1703_v16, %v1704_v11 }
 0x260   :  { %3385 = vrot.lane.b32.xlu1 %v3384_v29, %s3516_s16  ;;  %v3474_v42 = vpack.i.bf16 %v1705_v17, %v1689_v59 }
 0x261   :  { %3380 = vrot.lane.b32.xlu0 %v3379_v35, %s3527_s4  ;;  %v3464_v35 = vpack.i.bf16 %v1699_v51, %v1641_v39 }
 0x264   :  { %3395 = vrot.lane.b32.xlu1 %v3394_v14, %s3518_s14 }
 0x265   :  { %3390 = vrot.lane.b32.xlu0 %v3389_v48, %s3518_s14  ;;  %v3469_v48 = vpack.i.bf16 %v1686_v25, %v1683_v52 }
 0x268   :  { %3405 = vrot.lane.b32.xlu1 %v3404_v45, %s3522_s27 }
 0x269   :  { %3400 = vrot.lane.b32.xlu0 %v3399_v46, %s3522_s27 }
 0x26c   :  { %3415 = vrot.lane.b32.xlu1 %v3414_v3, %s3525_s29 }
 0x26d   :  { %3410 = vrot.lane.b32.xlu0 %v3409_v41, %s3525_s29 }
 0x270   :  { %3425 = vrot.lane.b32.xlu1 %v3424_v57, %s3526_s9 }
 0x271   :  { %3420 = vrot.lane.b32.xlu0 %v3384_v29, %s3526_s9  ;;  %v1561_v29 = vld [vmem:[#allocation2 + $0x138] sm:$0x3] }
 0x272   :  { %v1714_v50 = vrot.slane %v1561_v29, 1  ;;  %v1720_v18 = vrot.slane %v1561_v29, 2 }
 0x274   :  { %3435 = vrot.lane.b32.xlu1 %v3424_v57, %s3516_s16  ;;  %v1715_v26 = vsel %vm498_vm1, %v1713_v28, %v1714_v50  ;;  %v1721_v46 = vsel %vm547_vm0, %v1719_v7, %v1720_v18  ;;  %vm2204_vm0 = vcmask 457728   ;;  %vm2221_vm1 = vcmask 523264  }
 0x275   :  { %3430 = vrot.lane.b32.xlu0 %v3394_v14, %s3527_s4  ;;  %v3484_v21 = vpack.i.bf16 %v1715_v26, %v1699_v51  ;;  %v3494_v1 = vpack.i.bf16 %v1721_v46, %v1705_v17 }
 0x278   :  { %3445 = vrot.lane.b32.xlu1 %v3444_v5, %s3516_s16 }
 0x279   :  { %3440 = vrot.lane.b32.xlu0 %v3439_v10, %s3527_s4 }
 0x27c   :  { %3455 = vrot.lane.b32.xlu1 %v3454_v36, %s3518_s14 }
 0x27d   :  { %3450 = vrot.lane.b32.xlu0 %v3439_v10, %s3518_s14 }
 0x280   :  { %3465 = vrot.lane.b32.xlu1 %v3464_v35, %s3522_s27 }
 0x281   :  { %3460 = vrot.lane.b32.xlu0 %v3459_v2, %s3522_s27 }
 0x282   :  { %v4968_v13 = vpop.permute.xlu1 %3185 }
 0x283   :  { %v4971_v14 = vpop.permute.xlu0 %3180 }
 0x284   :  { %3475 = vrot.lane.b32.xlu1 %v3474_v42, %s3525_s29  ;;  %v3183_v25 = vunpack.i.h.bf16 %v4971_v14  ;;  %v3182_v59 = vunpack.i.l.bf16 %v4971_v14 }
 0x285   :  { %3470 = vrot.lane.b32.xlu0 %v3469_v48, %s3525_s29 }
 0x286   :  { %v4976_v32 = vpop.permute.xlu1 %3195 }
 0x287   :  { %v4978_v45 = vpop.permute.xlu0 %3190 }
 0x288   :  { %3485 = vrot.lane.b32.xlu1 %v3484_v21, %s3526_s9 }
 0x289   :  { %3480 = vrot.lane.b32.xlu0 %v3444_v5, %s3526_s9 }
 0x28a   :  { %v4983_v20 = vpop.permute.xlu1 %3205 }
 0x28b   :  { %v4985_v8 = vpop.permute.xlu0 %3200 }
 0x28c   :  { %3495 = vrot.lane.b32.xlu1 %v3494_v1, %s3527_s4 }
 0x28d   :  { %3490 = vrot.lane.b32.xlu0 %v3454_v36, %s3527_s4 }
 0x28e   :  { %v4989_v19 = vpop.permute.xlu1 %3215 }
 0x28f   :  { %v4991_v3 = vpop.permute.xlu0 %3210 }
 0x292   :  { %v4993_v41 = vpop.permute.xlu1 %3225 }
 0x293   :  { %v4995_v56 = vpop.permute.xlu0 %3220 }
 0x296   :  { %v4997_v47 = vpop.permute.xlu1 %3235 }
 0x297   :  { %v4999_v30 = vpop.permute.xlu0 %3230 }
 0x29a   :  { %v5001_v43 = vpop.permute.xlu1 %3245 }
 0x29b   :  { %v5003_v57 = vpop.permute.xlu0 %3240 }
 0x29e   :  { %v5005_v23 = vpop.permute.xlu1 %3255 }
 0x29f   :  { %v5007_v53 = vpop.permute.xlu0 %3250 }
 0x2a2   :  { %v3266_v22 = vpop.permute.xlu1 %3265 }
 0x2a3   :  { %v3261_v55 = vpop.permute.xlu0 %3260  ;;  %v3268_v27 = vunpack.i.h.bf16 %v3266_v22  ;;  %v3267_v40 = vunpack.i.l.bf16 %v3266_v22 }
 0x2a4   :  { %v3263_v63 = vunpack.i.h.bf16 %v3261_v55  ;;  %v3262_v31 = vunpack.i.l.bf16 %v3261_v55 }
 0x2a5   :  { %v2109_v36 = vsel %vm1029_vm4, %v4744_v34, %v3268_v27  ;;  %v2108_v16 = vsel %vm1029_vm4, %v4754_v49, %v3267_v40  ;;  %v3188_v49 = vunpack.i.h.bf16 %v4968_v13 }
 0x2a6   :  { %v3276_v60 = vpop.permute.xlu1 %3275  ;;  %v2107_v51 = vsel %vm1029_vm4, %v4748_v54, %v3263_v63  ;;  %v2106_v11 = vsel %vm1029_vm4, %v4806_v15, %v3262_v31  ;;  %v3187_v54 = vunpack.i.l.bf16 %v4968_v13  ;;  %v3193_v63 = vunpack.i.h.bf16 %v4978_v45 }
 0x2a7   :  { %v3271_v61 = vpop.permute.xlu0 %3270  ;;  %v3278_v5 = vunpack.i.h.bf16 %v3276_v60  ;;  %v3277_v10 = vunpack.i.l.bf16 %v3276_v60  ;;  %v3192_v31 = vunpack.i.l.bf16 %v4978_v45 }
 0x2a8   :  { %v3273_v4 = vunpack.i.h.bf16 %v3271_v61  ;;  %v3272_v9 = vunpack.i.l.bf16 %v3271_v61 }
 0x2a9   :  { %v2124_v50 = vsel %vm1063_vm6, %v2108_v16, %v3277_v10  ;;  %v2125_v34 = vsel %vm1063_vm6, %v2109_v36, %v3278_v5 }
 0x2aa   :  { %v3286_v39 = vpop.permute.xlu1 %3285  ;;  %v2122_v35 = vsel %vm1063_vm6, %v2106_v11, %v3272_v9  ;;  %v2123_v28 = vsel %vm1063_vm6, %v2107_v51, %v3273_v4  ;;  %v2140_v22 = vsel %vm1097_vm8, %v2124_v50, %v3187_v54  ;;  %v2141_v55 = vsel %vm1097_vm8, %v2125_v34, %v3188_v49 }
 0x2ab   :  { %v3281_v52 = vpop.permute.xlu0 %3280  ;;  %v3288_v14 = vunpack.i.h.bf16 %v3286_v39  ;;  %v3287_v48 = vunpack.i.l.bf16 %v3286_v39  ;;  %v2138_v26 = vsel %vm1097_vm8, %v2122_v35, %v3182_v59  ;;  %v2139_v18 = vsel %vm1097_vm8, %v2123_v28, %v3183_v25 }
 0x2ac   :  { %v3283_v2 = vunpack.i.h.bf16 %v3281_v52  ;;  %v3282_v17 = vunpack.i.l.bf16 %v3281_v52  ;;  %v3198_v35 = vunpack.i.h.bf16 %v4976_v32  ;;  %v3197_v28 = vunpack.i.l.bf16 %v4976_v32 }
 0x2ad   :  { %v2156_v52 = vsel %vm1131_vm10, %v2140_v22, %v3287_v48  ;;  %v2157_v4 = vsel %vm1131_vm10, %v2141_v55, %v3288_v14 }
 0x2ae   :  { %v3296_v0 = vpop.permute.xlu1 %3295  ;;  %v2154_v60 = vsel %vm1131_vm10, %v2138_v26, %v3282_v17  ;;  %v2155_v61 = vsel %vm1131_vm10, %v2139_v18, %v3283_v2 }
 0x2af   :  { %v3291_v29 = vpop.permute.xlu0 %3290  ;;  %v3298_v21 = vunpack.i.h.bf16 %v3296_v0  ;;  %v3297_v46 = vunpack.i.l.bf16 %v3296_v0 }
 0x2b0   :  { %v3293_v42 = vunpack.i.h.bf16 %v3291_v29  ;;  %v3292_v7 = vunpack.i.l.bf16 %v3291_v29 }
 0x2b1   :  { %v2173_v5 = vsel %vm2170_vm14, %v2156_v52, %v3297_v46  ;;  %v2174_v10 = vsel %vm2170_vm14, %v2157_v4, %v3298_v21 }
 0x2b2   :  { %v3306_v15 = vpop.permute.xlu1 %3305  ;;  %v2171_v13 = vsel %vm2170_vm14, %v2154_v60, %v3292_v7  ;;  %v2172_v39 = vsel %vm2170_vm14, %v2155_v61, %v3293_v42  ;;  %v2190_v7 = vsel %vm2187_vm15, %v2173_v5, %v3197_v28  ;;  %v2191_v49 = vsel %vm2187_vm15, %v2174_v10, %v3198_v35 }
 0x2b3   :  { %v3301_v1 = vpop.permute.xlu0 %3300  ;;  %v2188_v36 = vsel %vm2187_vm15, %v2171_v13, %v3192_v31  ;;  %v2189_v16 = vsel %vm2187_vm15, %v2172_v39, %v3193_v63  ;;  %v3308_v51 = vunpack.i.h.bf16 %v3306_v15  ;;  %v3307_v45 = vunpack.i.l.bf16 %v3306_v15 }
 0x2b4   :  { %v3303_v27 = vunpack.i.h.bf16 %v3301_v1  ;;  %v3302_v40 = vunpack.i.l.bf16 %v3301_v1  ;;  %v3208_v63 = vunpack.i.h.bf16 %v4983_v20  ;;  %v3207_v31 = vunpack.i.l.bf16 %v4983_v20 }
 0x2b5   :  { %v2207_v48 = vsel %vm2204_vm0, %v2190_v7, %v3307_v45  ;;  %v2208_v15 = vsel %vm2204_vm0, %v2191_v49, %v3308_v51 }
 0x2b6   :  { %v3316_v9 = vpop.permute.xlu1 %3315  ;;  %v2205_v11 = vsel %vm2204_vm0, %v2188_v36, %v3302_v40  ;;  %v2206_v29 = vsel %vm2204_vm0, %v2189_v16, %v3303_v27  ;;  %v3202_v36 = vunpack.i.l.bf16 %v4985_v8  ;;  %v3218_v16 = vunpack.i.h.bf16 %v4989_v19 }
 0x2b7   :  { %v3311_v25 = vpop.permute.xlu0 %3310  ;;  %v3318_v61 = vunpack.i.h.bf16 %v3316_v9  ;;  %v3317_v13 = vunpack.i.l.bf16 %v3316_v9 }
 0x2b8   :  { %v3313_v59 = vunpack.i.h.bf16 %v3311_v25  ;;  %v3312_v0 = vunpack.i.l.bf16 %v3311_v25 }
 0x2b9   :  { %v2111_v20 = vsel %vm1029_vm4, %v4758_v62, %v3318_v61 }
 0x2ba   :  { %v3326_v2 = vpop.permute.xlu1 %3325  ;;  %v2222_v17 = vsel %vm2221_vm1, %v2205_v11, %v3312_v0  ;;  %v2223_v50 = vsel %vm2221_vm1, %v2206_v29, %v3313_v59  ;;  %v3203_v0 = vunpack.i.h.bf16 %v4985_v8 }
 0x2bb   :  { %v3321_v34 = vpop.permute.xlu0 %3320  ;;  %v2238_v42 = vpack.c.bf16 %v2223_v50, %v2222_v17  ;;  %v3328_v21 = vunpack.i.h.bf16 %v3326_v2  ;;  %v3327_v46 = vunpack.i.l.bf16 %v3326_v2 }
 0x2bc   :  { %v3323_v54 = vunpack.i.h.bf16 %v3321_v34  ;;  %v3322_v14 = vunpack.i.l.bf16 %v3321_v34 }
 0x2bd   :  { %2828 = vmatprep.mubr.msk.bf16.mxu1 %vm2282_vm2, %v2238_v42  ;;  %v2113_v52 = vsel %vm1029_vm4, %v4766_v6, %v3328_v21  ;;  %v2112_v4 = vsel %vm1029_vm4, %v4771_v24, %v3327_v46  ;;  %v2110_v6 = vsel %vm1029_vm4, %v4746_v58, %v3317_v13  ;;  %v3217_v24 = vunpack.i.l.bf16 %v4989_v19 }
 0x2be   :  { %v2225_v32 = vsel %vm2221_vm1, %v2208_v15, %v3323_v54  ;;  %v2224_v26 = vsel %vm2221_vm1, %v2207_v48, %v3322_v14  ;;  %v3336_v18 = vpop.permute.xlu1 %3335 }
 0x2bf   :  { %v2239_v1 = vpack.c.bf16 %v2225_v32, %v2224_v26  ;;  %v3331_v22 = vpop.permute.xlu0 %3330  ;;  %v3338_v55 = vunpack.i.h.bf16 %v3336_v18  ;;  %v3337_v60 = vunpack.i.l.bf16 %v3336_v18 }
 0x2c0   :  { %v3333_v39 = vunpack.i.h.bf16 %v3331_v22  ;;  %v3332_v27 = vunpack.i.l.bf16 %v3331_v22 }
 0x2c1   :  { %2829 = vmatmul.mubr.msk.bf16.vlgmr.msra.gmra.mxu1 %vm2282_vm2, %v2239_v1  ;;  %v2128_v10 = vsel %vm1063_vm6, %v2112_v4, %v3337_v60  ;;  %v2129_v9 = vsel %vm1063_vm6, %v2113_v52, %v3338_v55  ;;  %v3213_v55 = vunpack.i.h.bf16 %v4991_v3  ;;  %v3212_v60 = vunpack.i.l.bf16 %v4991_v3 }
 0x2c2   :  { %v3346_v40 = vpop.permute.xlu1 %3345  ;;  %v2127_v51 = vsel %vm1063_vm6, %v2111_v20, %v3333_v39  ;;  %v2126_v45 = vsel %vm1063_vm6, %v2110_v6, %v3332_v27  ;;  %v2144_v29 = vsel %vm1097_vm8, %v2128_v10, %v3207_v31  ;;  %v2145_v35 = vsel %vm1097_vm8, %v2129_v9, %v3208_v63 }
 0x2c3   :  { %v3341_v5 = vpop.permute.xlu0 %3340  ;;  %v3348_v25 = vunpack.i.h.bf16 %v3346_v40  ;;  %v3347_v59 = vunpack.i.l.bf16 %v3346_v40  ;;  %v2142_v48 = vsel %vm1097_vm8, %v2126_v45, %v3202_v36  ;;  %v2143_v15 = vsel %vm1097_vm8, %v2127_v51, %v3203_v0 }
 0x2c4   :  { %v3343_v17 = vunpack.i.h.bf16 %v3341_v5  ;;  %v3342_v50 = vunpack.i.l.bf16 %v3341_v5 }
 0x2c5   :  { %v2160_v62 = vsel %vm1131_vm10, %v2144_v29, %v3347_v59  ;;  %v2161_v58 = vsel %vm1131_vm10, %v2145_v35, %v3348_v25 }
 0x2c6   :  { %v3356_v11 = vpop.permute.xlu1 %3355  ;;  %v2158_v26 = vsel %vm1131_vm10, %v2142_v48, %v3342_v50  ;;  %v2159_v18 = vsel %vm1131_vm10, %v2143_v15, %v3343_v17  ;;  %v3228_v50 = vunpack.i.h.bf16 %v4993_v41 }
 0x2c7   :  { %v3358_v8 = vunpack.i.h.bf16 %v3356_v11  ;;  %v3357_v28 = vunpack.i.l.bf16 %v3356_v11  ;;  %v3351_v2 = vpop.permute.xlu0 %3350 }
 0x2c8   :  { %v3353_v42 = vunpack.i.h.bf16 %v3351_v2  ;;  %v3352_v7 = vunpack.i.l.bf16 %v3351_v2 }
 0x2c9   :  { %v2177_v19 = vsel %vm2170_vm14, %v2160_v62, %v3357_v28  ;;  %v2178_v34 = vsel %vm2170_vm14, %v2161_v58, %v3358_v8 }
 0x2ca   :  { %v3366_v49 = vpop.permute.xlu1 %3365  ;;  %v2194_v54 = vsel %vm2187_vm15, %v2177_v19, %v3217_v24  ;;  %v2195_v14 = vsel %vm2187_vm15, %v2178_v34, %v3218_v16  ;;  %v2175_v21 = vsel %vm2170_vm14, %v2158_v26, %v3352_v7  ;;  %v2176_v46 = vsel %vm2170_vm14, %v2159_v18, %v3353_v42 }
 0x2cb   :  { %v3361_v32 = vpop.permute.xlu0 %3360  ;;  %v2192_v39 = vsel %vm2187_vm15, %v2175_v21, %v3212_v60  ;;  %v2193_v27 = vsel %vm2187_vm15, %v2176_v46, %v3213_v55  ;;  %v3368_v31 = vunpack.i.h.bf16 %v3366_v49  ;;  %v3367_v52 = vunpack.i.l.bf16 %v3366_v49 }
 0x2cc   :  { %v3363_v1 = vunpack.i.h.bf16 %v3361_v32  ;;  %v3362_v22 = vunpack.i.l.bf16 %v3361_v32  ;;  %v3227_v19 = vunpack.i.l.bf16 %v4993_v41  ;;  %v3223_v34 = vunpack.i.h.bf16 %v4995_v56 }
 0x2cd   :  { %v2211_v20 = vsel %vm2204_vm0, %v2194_v54, %v3367_v52  ;;  %v2212_v6 = vsel %vm2204_vm0, %v2195_v14, %v3368_v31  ;;  %v3222_v42 = vunpack.i.l.bf16 %v4995_v56  ;;  %v3237_v21 = vunpack.i.l.bf16 %v4997_v47 }
 0x2ce   :  { %v3376_v61 = vpop.permute.xlu1 %3375  ;;  %v2209_v4 = vsel %vm2204_vm0, %v2192_v39, %v3362_v22  ;;  %v2210_v5 = vsel %vm2204_vm0, %v2193_v27, %v3363_v1  ;;  %v3233_v1 = vunpack.i.h.bf16 %v4999_v30 }
 0x2cf   :  { %v3371_v13 = vpop.permute.xlu0 %3370  ;;  %v3378_v16 = vunpack.i.h.bf16 %v3376_v61  ;;  %v3377_v35 = vunpack.i.l.bf16 %v3376_v61 }
 0x2d0   :  { %v3373_v40 = vunpack.i.h.bf16 %v3371_v13  ;;  %v3372_v63 = vunpack.i.l.bf16 %v3371_v13 }
 0x2d1   :  { %v2115_v14 = vsel %vm1029_vm4, %v4791_v38, %v3378_v16  ;;  %v2114_v48 = vsel %vm1029_vm4, %v4900_v44, %v3377_v35  ;;  %v3232_v44 = vunpack.i.l.bf16 %v4999_v30 }
 0x2d2   :  { %v2226_v10 = vsel %vm2221_vm1, %v2209_v4, %v3372_v63  ;;  %v2227_v9 = vsel %vm2221_vm1, %v2210_v5, %v3373_v40  ;;  %v3386_v25 = vpop.permute.xlu1 %3385 }
 0x2d3   :  { %v2240_v3 = vpack.c.bf16 %v2227_v9, %v2226_v10  ;;  %v3381_v59 = vpop.permute.xlu0 %3380  ;;  %v3388_v24 = vunpack.i.h.bf16 %v3386_v25  ;;  %v3387_v51 = vunpack.i.l.bf16 %v3386_v25 }
 0x2d4   :  { %v3383_v0 = vunpack.i.h.bf16 %v3381_v59  ;;  %v3382_v36 = vunpack.i.l.bf16 %v3381_v59 }
 0x2d5   :  { %2832 = vmatprep.mubr.msk.bf16.mxu1 %vm2282_vm2, %v2240_v3  ;;  %v2117_v7 = vsel %vm1029_vm4, %v4786_v33, %v3388_v24  ;;  %v2116_v49 = vsel %vm1029_vm4, %v4793_v37, %v3387_v51  ;;  %v3238_v37 = vunpack.i.h.bf16 %v4997_v47 }
 0x2d6   :  { %v2229_v45 = vsel %vm2221_vm1, %v2212_v6, %v3383_v0  ;;  %v2228_v11 = vsel %vm2221_vm1, %v2211_v20, %v3382_v36  ;;  %v3396_v29 = vpop.permute.xlu1 %3395 }
 0x2d7   :  { %v2241_v8 = vpack.c.bf16 %v2229_v45, %v2228_v11  ;;  %v3398_v28 = vunpack.i.h.bf16 %v3396_v29  ;;  %v3397_v2 = vunpack.i.l.bf16 %v3396_v29  ;;  %v3391_v62 = vpop.permute.xlu0 %3390 }
 0x2d8   :  { %v3393_v58 = vunpack.i.h.bf16 %v3391_v62  ;;  %v3392_v17 = vunpack.i.l.bf16 %v3391_v62 }
 0x2d9   :  { %2833 = vmatmul.mubr.msk.bf16.gmra.mxu1 %vm2282_vm2, %v2241_v8  ;;  %v2132_v41 = vsel %vm1063_vm6, %v2116_v49, %v3397_v2  ;;  %v2133_v15 = vsel %vm1063_vm6, %v2117_v7, %v3398_v28 }
 0x2da   :  { %v3406_v54 = vpop.permute.xlu1 %3405  ;;  %v2131_v56 = vsel %vm1063_vm6, %v2115_v14, %v3393_v58  ;;  %v2130_v26 = vsel %vm1063_vm6, %v2114_v48, %v3392_v17  ;;  %v2148_v22 = vsel %vm1097_vm8, %v2132_v41, %v3227_v19  ;;  %v2149_v55 = vsel %vm1097_vm8, %v2133_v15, %v3228_v50 }
 0x2db   :  { %v3401_v32 = vpop.permute.xlu0 %3400  ;;  %v3408_v33 = vunpack.i.h.bf16 %v3406_v54  ;;  %v3407_v18 = vunpack.i.l.bf16 %v3406_v54  ;;  %v2146_v61 = vsel %vm1097_vm8, %v2130_v26, %v3222_v42  ;;  %v2147_v13 = vsel %vm1097_vm8, %v2131_v56, %v3223_v34 }
 0x2dc   :  { %v3403_v46 = vunpack.i.h.bf16 %v3401_v32  ;;  %v3402_v38 = vunpack.i.l.bf16 %v3401_v32 }
 0x2dd   :  { %v2164_v47 = vsel %vm1131_vm10, %v2148_v22, %v3407_v18  ;;  %v2165_v63 = vsel %vm1131_vm10, %v2149_v55, %v3408_v33  ;;  %v3242_v22 = vunpack.i.l.bf16 %v5003_v57  ;;  %v3511_v55 = vld [vmem:[#allocation2 + $0x110] sm:$0xff] }
 0x2de   :  { %v3416_v60 = vpop.permute.xlu1 %3415  ;;  %v2162_v30 = vsel %vm1131_vm10, %v2146_v61, %v3402_v38  ;;  %v2163_v4 = vsel %vm1131_vm10, %v2147_v13, %v3403_v46  ;;  %v3248_v38 = vunpack.i.h.bf16 %v5001_v43  ;;  %v3512_v61 = vld [vmem:[#allocation2 + $0x100] sm:$0xff] }
 0x2df   :  { %v3418_v39 = vunpack.i.h.bf16 %v3416_v60  ;;  %v3417_v27 = vunpack.i.l.bf16 %v3416_v60  ;;  %v3411_v40 = vpop.permute.xlu0 %3410 }
 0x2e0   :  { %v3413_v31 = vunpack.i.h.bf16 %v3411_v40  ;;  %v3412_v52 = vunpack.i.l.bf16 %v3411_v40 }
 0x2e1   :  { %v2181_v5 = vsel %vm2170_vm14, %v2164_v47, %v3417_v27  ;;  %v2182_v10 = vsel %vm2170_vm14, %v2165_v63, %v3418_v39  ;;  %v3513_v27 = vld [vmem:[#allocation2 + $0xf0] sm:$0xff]  ;;  %v3514_v47 = vld [vmem:[#allocation2 + $0xe0] sm:$0xff] }
 0x2e2   :  { %v2179_v9 = vsel %vm2170_vm14, %v2162_v30, %v3412_v52  ;;  %v2180_v25 = vsel %vm2170_vm14, %v2163_v4, %v3413_v31  ;;  %v3426_v3 = vpop.permute.xlu1 %3425  ;;  %v2198_v59 = vsel %vm2187_vm15, %v2181_v5, %v3237_v21  ;;  %v2199_v0 = vsel %vm2187_vm15, %v2182_v10, %v3238_v37 }
 0x2e3   :  { %v3421_v36 = vpop.permute.xlu0 %3420  ;;  %v2196_v20 = vsel %vm2187_vm15, %v2179_v9, %v3232_v44  ;;  %v2197_v6 = vsel %vm2187_vm15, %v2180_v25, %v3233_v1  ;;  %v3428_v35 = vunpack.i.h.bf16 %v3426_v3  ;;  %v3427_v8 = vunpack.i.l.bf16 %v3426_v3 }
 0x2e4   :  { %v3423_v16 = vunpack.i.h.bf16 %v3421_v36  ;;  %v3422_v24 = vunpack.i.l.bf16 %v3421_v36  ;;  %v3247_v1 = vunpack.i.l.bf16 %v5001_v43  ;;  %v3243_v44 = vunpack.i.h.bf16 %v5003_v57 }
 0x2e5   :  { %v2215_v7 = vsel %vm2204_vm0, %v2198_v59, %v3427_v8  ;;  %v2216_v49 = vsel %vm2204_vm0, %v2199_v0, %v3428_v35  ;;  %v3258_v10 = vunpack.i.h.bf16 %v5005_v23  ;;  %v3257_v9 = vunpack.i.l.bf16 %v5005_v23 }
 0x2e6   :  { %v3436_v51 = vpop.permute.xlu1 %3435  ;;  %v2213_v28 = vsel %vm2204_vm0, %v2196_v20, %v3422_v24  ;;  %v2214_v2 = vsel %vm2204_vm0, %v2197_v6, %v3423_v16  ;;  %v3253_v59 = vunpack.i.h.bf16 %v5007_v53  ;;  %v3252_v0 = vunpack.i.l.bf16 %v5007_v53 }
 0x2e7   :  { %v3431_v45 = vpop.permute.xlu0 %3430  ;;  %v3438_v54 = vunpack.i.h.bf16 %v3436_v51  ;;  %v3437_v56 = vunpack.i.l.bf16 %v3436_v51 }
 0x2e8   :  { %v3433_v11 = vunpack.i.h.bf16 %v3431_v45  ;;  %v3432_v29 = vunpack.i.l.bf16 %v3431_v45 }
 0x2e9   :  { %v2119_v40 = vsel %vm1029_vm4, %v3513_v27, %v3438_v54  ;;  %v2118_v63 = vsel %vm1029_vm4, %v3514_v47, %v3437_v56 }
 0x2ea   :  { %v2230_v62 = vsel %vm2221_vm1, %v2213_v28, %v3432_v29  ;;  %v2231_v58 = vsel %vm2221_vm1, %v2214_v2, %v3433_v11  ;;  %v3446_v17 = vpop.permute.xlu1 %3445 }
 0x2eb   :  { %v2242_v50 = vpack.c.bf16 %v2231_v58, %v2230_v62  ;;  %v3441_v19 = vpop.permute.xlu0 %3440  ;;  %v3448_v14 = vunpack.i.h.bf16 %v3446_v17  ;;  %v3447_v48 = vunpack.i.l.bf16 %v3446_v17 }
 0x2ec   :  { %v3443_v34 = vunpack.i.h.bf16 %v3441_v19  ;;  %v3442_v42 = vunpack.i.l.bf16 %v3441_v19 }
 0x2ed   :  { %2836 = vmatprep.mubr.msk.bf16.mxu1 %vm2282_vm2, %v2242_v50  ;;  %v2121_v60 = vsel %vm1029_vm4, %v3511_v55, %v3448_v14  ;;  %v2120_v13 = vsel %vm1029_vm4, %v3512_v61, %v3447_v48 }
 0x2ee   :  { %v2233_v41 = vsel %vm2221_vm1, %v2216_v49, %v3443_v34  ;;  %v2232_v15 = vsel %vm2221_vm1, %v2215_v7, %v3442_v42  ;;  %v3456_v32 = vpop.permute.xlu1 %3455 }
 0x2ef   :  { %v2243_v26 = vpack.c.bf16 %v2233_v41, %v2232_v15  ;;  %v3458_v33 = vunpack.i.h.bf16 %v3456_v32  ;;  %v3457_v18 = vunpack.i.l.bf16 %v3456_v32  ;;  %v3451_v37 = vpop.permute.xlu0 %3450 }
 0x2f0   :  { %v3453_v21 = vunpack.i.h.bf16 %v3451_v37  ;;  %v3452_v46 = vunpack.i.l.bf16 %v3451_v37 }
 0x2f1   :  { %2837 = vmatmul.mubr.msk.bf16.gmra.mxu1 %vm2282_vm2, %v2243_v26  ;;  %v2136_v43 = vsel %vm1063_vm6, %v2120_v13, %v3457_v18  ;;  %v2137_v31 = vsel %vm1063_vm6, %v2121_v60, %v3458_v33 }
 0x2f2   :  { %v3466_v39 = vpop.permute.xlu1 %3465  ;;  %v2135_v57 = vsel %vm1063_vm6, %v2119_v40, %v3453_v21  ;;  %v2134_v30 = vsel %vm1063_vm6, %v2118_v63, %v3452_v46  ;;  %v2152_v36 = vsel %vm1097_vm8, %v2136_v43, %v3247_v1  ;;  %v2153_v20 = vsel %vm1097_vm8, %v2137_v31, %v3248_v38 }
 0x2f3   :  { %v3461_v52 = vpop.permute.xlu0 %3460  ;;  %v3468_v4 = vunpack.i.h.bf16 %v3466_v39  ;;  %v3467_v5 = vunpack.i.l.bf16 %v3466_v39  ;;  %v2150_v16 = vsel %vm1097_vm8, %v2134_v30, %v3242_v22  ;;  %v2151_v24 = vsel %vm1097_vm8, %v2135_v57, %v3243_v44 }
 0x2f4   :  { %v3463_v25 = vunpack.i.h.bf16 %v3461_v52  ;;  %v3462_v3 = vunpack.i.l.bf16 %v3461_v52 }
 0x2f5   :  { %v2168_v23 = vsel %vm1131_vm10, %v2152_v36, %v3467_v5  ;;  %v2169_v29 = vsel %vm1131_vm10, %v2153_v20, %v3468_v4 }
 0x2f6   :  { %v3476_v6 = vpop.permute.xlu1 %3475  ;;  %v2166_v53 = vsel %vm1131_vm10, %v2150_v16, %v3462_v3  ;;  %v2167_v28 = vsel %vm1131_vm10, %v2151_v24, %v3463_v25 }
 0x2f7   :  { %v3478_v51 = vunpack.i.h.bf16 %v3476_v6  ;;  %v3477_v45 = vunpack.i.l.bf16 %v3476_v6  ;;  %v3471_v11 = vpop.permute.xlu0 %3470 }
 0x2f8   :  { %v3473_v35 = vunpack.i.h.bf16 %v3471_v11  ;;  %v3472_v8 = vunpack.i.l.bf16 %v3471_v11 }
 0x2f9   :  { %v2185_v2 = vsel %vm2170_vm14, %v2168_v23, %v3477_v45  ;;  %v2186_v62 = vsel %vm2170_vm14, %v2169_v29, %v3478_v51 }
 0x2fa   :  { %v2183_v58 = vsel %vm2170_vm14, %v2166_v53, %v3472_v8  ;;  %v2184_v17 = vsel %vm2170_vm14, %v2167_v28, %v3473_v35  ;;  %v3486_v50 = vpop.permute.xlu1 %3485  ;;  %v2202_v19 = vsel %vm2187_vm15, %v2185_v2, %v3257_v9  ;;  %v2203_v34 = vsel %vm2187_vm15, %v2186_v62, %v3258_v10 }
 0x2fb   :  { %v3481_v42 = vpop.permute.xlu0 %3480  ;;  %v2200_v7 = vsel %vm2187_vm15, %v2183_v58, %v3252_v0  ;;  %v2201_v49 = vsel %vm2187_vm15, %v2184_v17, %v3253_v59  ;;  %v3488_v54 = vunpack.i.h.bf16 %v3486_v50  ;;  %v3487_v14 = vunpack.i.l.bf16 %v3486_v50 }
 0x2fc   :  { %v3483_v48 = vunpack.i.h.bf16 %v3481_v42  ;;  %v3482_v41 = vunpack.i.l.bf16 %v3481_v42 }
 0x2fd   :  { %v2219_v33 = vsel %vm2204_vm0, %v2202_v19, %v3487_v14  ;;  %v2220_v18 = vsel %vm2204_vm0, %v2203_v34, %v3488_v54 }
 0x2fe   :  { %v3496_v15 = vpop.permute.xlu1 %3495  ;;  %v2217_v46 = vsel %vm2204_vm0, %v2200_v7, %v3482_v41  ;;  %v2218_v38 = vsel %vm2204_vm0, %v2201_v49, %v3483_v48 }
 0x2ff   :  { %v3498_v32 = vunpack.i.h.bf16 %v3496_v15  ;;  %v3497_v56 = vunpack.i.l.bf16 %v3496_v15  ;;  %v3491_v26 = vpop.permute.xlu0 %3490 }
 0x300   :  { %v3493_v37 = vunpack.i.h.bf16 %v3491_v26  ;;  %v3492_v21 = vunpack.i.l.bf16 %v3491_v26 }
 0x301   :  { %v2236_v1 = vsel %vm2221_vm1, %v2219_v33, %v3497_v56  ;;  %v2237_v44 = vsel %vm2221_vm1, %v2220_v18, %v3498_v32 }
 0x302   :  { %v2245_v22 = vpack.c.bf16 %v2237_v44, %v2236_v1  ;;  %v2234_v55 = vsel %vm2221_vm1, %v2217_v46, %v3492_v21  ;;  %v2235_v60 = vsel %vm2221_vm1, %v2218_v38, %v3493_v37 }
 0x303   :  { %v2244_v61 = vpack.c.bf16 %v2235_v60, %v2234_v55 }
 0x305   :  { %2840 = vmatprep.mubr.msk.bf16.mxu1 %vm2282_vm2, %v2244_v61 }
 0x306   :  { %2841 = vmatmul.mubr.msk.bf16.gmra.mxu1 %vm2282_vm2, %v2245_v22 }
 0x381   :  { %v5189_v13 = vpop.f32.mrf.mxu1 }
 0x382   :  { %v2448_v10 = vmul.f32 %v5189_v13, %v5189_v13  ;;  %v2411_v3 = vsel %vm1029_vm4, %v5189_v13, 0.0 }
 0x383   :  { %v5191_v39 = vpop.f32.mrf.mxu1 }
 0x384   :  { %v2446_v31 = vmul.f32 %v5191_v39, %v5191_v39  ;;  %v2408_v57 = vsel %vm1029_vm4, %v5191_v39, 0.0  ;;  %v2465_v36 = vsel %vm1029_vm4, %v2448_v10, 0.0 }
 0x385   :  { %v5193_v27 = vpop.f32.mrf.mxu1 }
 0x386   :  { %v2462_v9 = vsel %vm1029_vm4, %v2446_v31, 0.0  ;;  %v2449_v20 = vmul.f32 %v5193_v27, %v5193_v27  ;;  %v2413_v24 = vsel %vm1029_vm4, %v5193_v27, 0.0 }
 0x387   :  { %v5195_v40 = vpop.f32.mrf.mxu1 }
 0x388   :  { %v2447_v63 = vmul.f32 %v5195_v40, %v5195_v40  ;;  %v2409_v52 = vsel %vm1029_vm4, %v5195_v40, 0.0  ;;  %v2467_v29 = vsel %vm1029_vm4, %v2449_v20, 0.0 }
 0x389   :  { %v2410_v4 = vadd.f32 %v2409_v52, %v2408_v57 }
 0x38a   :  { %v2463_v30 = vsel %vm1029_vm4, %v2447_v63, 0.0 }
 0x38b   :  { %v2464_v25 = vadd.f32 %v2463_v30, %v2462_v9  ;;  %v2412_v59 = vadd.f32 %v2411_v3, %v2410_v4 }
 0x38d   :  { %v2466_v16 = vadd.f32 %v2465_v36, %v2464_v25  ;;  %v2414_v23 = vadd.f32 %v2413_v24, %v2412_v59 }
 0x38f   :  { %v2468_v2 = vadd.f32 %v2467_v29, %v2466_v16 }
 0x399   :  { %v5197_v47 = vpop.f32.mrf.mxu1 }
 0x39a   :  { %v2452_v19 = vmul.f32 %v5197_v47, %v5197_v47  ;;  %v2419_v42 = vsel %vm1029_vm4, %v5197_v47, 0.0 }
 0x39b   :  { %v5201_v43 = vpop.f32.mrf.mxu1 }
 0x39c   :  { %v2450_v6 = vmul.f32 %v5201_v43, %v5201_v43  ;;  %v2415_v51 = vsel %vm1029_vm4, %v5201_v43, 0.0  ;;  %v2473_v54 = vsel %vm1029_vm4, %v2452_v19, 0.0 }
 0x39d   :  { %v5210_v5 = vpop.f32.mrf.mxu1  ;;  %v2416_v28 = vadd.f32 %v2415_v51, %v2414_v23 }
 0x39e   :  { %v2469_v35 = vsel %vm1029_vm4, %v2450_v6, 0.0  ;;  %v2453_v14 = vmul.f32 %v5210_v5, %v5210_v5  ;;  %v2421_v15 = vsel %vm1029_vm4, %v5210_v5, 0.0 }
 0x39f   :  { %v5217_v0 = vpop.f32.mrf.mxu1  ;;  %v2470_v58 = vadd.f32 %v2469_v35, %v2468_v2 }
 0x3a0   :  { %v2451_v45 = vmul.f32 %v5217_v0, %v5217_v0  ;;  %v2417_v8 = vsel %vm1029_vm4, %v5217_v0, 0.0  ;;  %v2475_v33 = vsel %vm1029_vm4, %v2453_v14, 0.0 }
 0x3a1   :  { %v2418_v17 = vadd.f32 %v2417_v8, %v2416_v28 }
 0x3a2   :  { %v2471_v62 = vsel %vm1029_vm4, %v2451_v45, 0.0 }
 0x3a3   :  { %v2472_v34 = vadd.f32 %v2471_v62, %v2470_v58  ;;  %v2420_v7 = vadd.f32 %v2419_v42, %v2418_v17 }
 0x3a5   :  { %v2474_v41 = vadd.f32 %v2473_v54, %v2472_v34  ;;  %v2422_v26 = vadd.f32 %v2421_v15, %v2420_v7 }
 0x3a7   :  { %v2476_v46 = vadd.f32 %v2475_v33, %v2474_v41 }
 0x3b1   :  { %v5230_v11 = vpop.f32.mrf.mxu1 }
 0x3b2   :  { %v2456_v22 = vmul.f32 %v5230_v11, %v5230_v11  ;;  %v2427_v60 = vsel %vm1029_vm4, %v5230_v11, 0.0 }
 0x3b3   :  { %v5236_v53 = vpop.f32.mrf.mxu1 }
 0x3b4   :  { %v2454_v48 = vmul.f32 %v5236_v53, %v5236_v53  ;;  %v2423_v32 = vsel %vm1029_vm4, %v5236_v53, 0.0  ;;  %v2481_v31 = vsel %vm1029_vm4, %v2456_v22, 0.0 }
 0x3b5   :  { %v5239_v50 = vpop.f32.mrf.mxu1  ;;  %v2424_v21 = vadd.f32 %v2423_v32, %v2422_v26 }
 0x3b6   :  { %v2477_v18 = vsel %vm1029_vm4, %v2454_v48, 0.0  ;;  %v2457_v52 = vmul.f32 %v5239_v50, %v5239_v50  ;;  %v2429_v4 = vsel %vm1029_vm4, %v5239_v50, 0.0 }
 0x3b7   :  { %v5245_v49 = vpop.f32.mrf.mxu1  ;;  %v2478_v1 = vadd.f32 %v2477_v18, %v2476_v46 }
 0x3b8   :  { %v2455_v56 = vmul.f32 %v5245_v49, %v5245_v49  ;;  %v2425_v37 = vsel %vm1029_vm4, %v5245_v49, 0.0  ;;  %v2483_v59 = vsel %vm1029_vm4, %v2457_v52, 0.0 }
 0x3b9   :  { %v2426_v44 = vadd.f32 %v2425_v37, %v2424_v21 }
 0x3ba   :  { %v2479_v38 = vsel %vm1029_vm4, %v2455_v56, 0.0 }
 0x3bb   :  { %v2480_v55 = vadd.f32 %v2479_v38, %v2478_v1  ;;  %v2428_v61 = vadd.f32 %v2427_v60, %v2426_v44 }
 0x3bd   :  { %v2482_v57 = vadd.f32 %v2481_v31, %v2480_v55  ;;  %v2430_v25 = vadd.f32 %v2429_v4, %v2428_v61  ;;  %v2502_v55 = vld [vmem:[%s5388_s5] sm:$0x1] }
 0x3be   :  { %v2506_v31 = vld [vmem:[%s5389_s6] sm:$0x1] }
 0x3bf   :  { %v2484_v6 = vadd.f32 %v2483_v59, %v2482_v57 }
 0x3c6   :  { %v5267_v63 = vpop.f32.mrf.mxu1 }
 0x3c7   :  { %v2460_v24 = vmul.f32 %v5267_v63, %v5267_v63  ;;  %v2435_v35 = vsel %vm1029_vm4, %v5267_v63, 0.0 }
 0x3c8   :  { %v5272_v30 = vpop.f32.mrf.mxu1 }
 0x3c9   :  { %v2431_v10 = vsel %vm1029_vm4, %v5272_v30, 0.0  ;;  %v2458_v9 = vmul.f32 %v5272_v30, %v5272_v30  ;;  %v2489_v58 = vsel %vm1029_vm4, %v2460_v24, 0.0 }
 0x3ca   :  { %v5280_v3 = vpop.f32.mrf.mxu1  ;;  %v2432_v20 = vadd.f32 %v2431_v10, %v2430_v25 }
 0x3cb   :  { %v2485_v36 = vsel %vm1029_vm4, %v2458_v9, 0.0  ;;  %v2461_v8 = vmul.f32 %v5280_v3, %v5280_v3  ;;  %v2437_v17 = vsel %vm1029_vm4, %v5280_v3, 0.0 }
 0x3cc   :  { %v2396_v16 = vpop.f32.mrf.mxu1  ;;  %v2486_v23 = vadd.f32 %v2485_v36, %v2484_v6 }
 0x3cd   :  { %v2433_v51 = vsel %vm1029_vm4, %v2396_v16, 0.0  ;;  %v2459_v45 = vmul.f32 %v2396_v16, %v2396_v16  ;;  %v2491_v42 = vsel %vm1029_vm4, %v2461_v8, 0.0 }
 0x3ce   :  { %v2434_v29 = vadd.f32 %v2433_v51, %v2432_v20 }
 0x3cf   :  { %v2487_v28 = vsel %vm1029_vm4, %v2459_v45, 0.0 }
 0x3d0   :  { %v2436_v2 = vadd.f32 %v2435_v35, %v2434_v29  ;;  %v2488_v62 = vadd.f32 %v2487_v28, %v2486_v23 }
 0x3d2   :  { %v2438_v19 = vadd.f32 %v2437_v17, %v2436_v2  ;;  %v2490_v34 = vadd.f32 %v2489_v58, %v2488_v62 }
 0x3d4   :  { %v2439_v7 = vrot.slane %v2438_v19, 4  ;;  %v2492_v54 = vadd.f32 %v2491_v42, %v2490_v34 }
 0x3d6   :  { %v2440_v14 = vadd.f32 %v2439_v7, %v2438_v19  ;;  %v2493_v48 = vrot.slane %v2492_v54, 4 }
 0x3d8   :  { %v2441_v41 = vrot.slane %v2440_v14, 2  ;;  %v2494_v15 = vadd.f32 %v2493_v48, %v2492_v54 }
 0x3da   :  { %v2442_v32 = vadd.f32 %v2441_v41, %v2440_v14  ;;  %v2495_v56 = vrot.slane %v2494_v15, 2 }
 0x3dc   :  { %v2443_v26 = vrot.slane %v2442_v32, 1  ;;  %v2496_v33 = vadd.f32 %v2495_v56, %v2494_v15 }
 0x3de   :  { %v2444_v18 = vadd.f32 %v2443_v26, %v2442_v32  ;;  %v2497_v37 = vrot.slane %v2496_v33, 1 }
 0x3e0   :  { %v2445_v21 = vmul.f32 0.0078125, %v2444_v18  ;;  %v2498_v46 = vadd.f32 %v2497_v37, %v2496_v33 }
 0x3e2   :  { %v2499_v38 = vmul.f32 0.0078125, %v2498_v46  ;;  %v2500_v1 = vmul.f32 %v2445_v21, %v2445_v21 }
 0x3e4   :  { %v2501_v44 = vsub.f32 %v2499_v38, %v2500_v1 }
 0x3e6   :  { %v2503_v22 = vadd.f32 1e-05, %v2501_v44 }
 0x3e8   :  { %3509 = vrsqrt.f32 %v2503_v22 }
 0x3f5   :  { %v3510_v60 = vpop.eup %3509 }
 0x3f6   :  { %v2505_v61 = vmul.f32 %v3510_v60, %v2502_v55 }
 0x3f8   :  { %v2507_v52 = vmul.f32 %v2505_v61, %v2445_v21  ;;  %v2513_v57 = vrot.slane %v2505_v61, %v4708_v12 }
 0x3fa   :  { %v2508_v4 = vsub.f32 %v2506_v31, %v2507_v52  ;;  %v2515_v10 = vmul.f32 %v2513_v57, %v5191_v39  ;;  %v2516_v9 = vmul.f32 %v2513_v57, %v5195_v40  ;;  %v2517_v25 = vmul.f32 %v5189_v13, %v2513_v57 }
 0x3fb   :  { %v2518_v59 = vmul.f32 %v5193_v27, %v2513_v57  ;;  %v2519_v36 = vmul.f32 %v2513_v57, %v5201_v43  ;;  %v2520_v20 = vmul.f32 %v2513_v57, %v5217_v0  ;;  %v2521_v6 = vmul.f32 %v5197_v47, %v2513_v57 }
 0x3fc   :  { %v2522_v24 = vmul.f32 %v5210_v5, %v2513_v57  ;;  %v2523_v51 = vmul.f32 %v2513_v57, %v5236_v53  ;;  %v2524_v45 = vmul.f32 %v2513_v57, %v5245_v49  ;;  %v2525_v39 = vmul.f32 %v5230_v11, %v2513_v57 }
 0x3fd   :  { %v2526_v40 = vmul.f32 %v5239_v50, %v2513_v57  ;;  %v2535_v13 = vrot.slane %v2508_v4, %v4708_v12  ;;  %v2527_v27 = vmul.f32 %v2513_v57, %v5272_v30  ;;  %v2528_v23 = vmul.f32 %v2513_v57, %v2396_v16 }
 0x3fe   :  { %v2529_v43 = vmul.f32 %v5267_v63, %v2513_v57  ;;  %v2530_v0 = vmul.f32 %v5280_v3, %v2513_v57 }
 0x3ff   :  { %v2537_v47 = vadd.f32 %v2535_v13, %v2515_v10  ;;  %v2538_v29 = vadd.f32 %v2535_v13, %v2516_v9  ;;  %v2539_v5 = vadd.f32 %v2535_v13, %v2517_v25  ;;  %v2540_v35 = vadd.f32 %v2535_v13, %v2518_v59 }
 0x400   :  { %v2541_v53 = vadd.f32 %v2535_v13, %v2519_v36  ;;  %v2542_v8 = vadd.f32 %v2535_v13, %v2520_v20  ;;  %v2543_v49 = vadd.f32 %v2535_v13, %v2521_v6  ;;  %v2544_v28 = vadd.f32 %v2535_v13, %v2522_v24 }
 0x401   :  { %v2545_v11 = vadd.f32 %v2535_v13, %v2523_v51  ;;  %v2546_v2 = vadd.f32 %v2535_v13, %v2524_v45  ;;  %v2547_v50 = vadd.f32 %v2535_v13, %v2525_v39  ;;  %v2548_v62 = vadd.f32 %v2535_v13, %v2526_v40 }
 0x402   :  { %v2549_v12 = vadd.f32 %v2535_v13, %v2527_v27  ;;  %v2550_v58 = vadd.f32 %v2535_v13, %v2528_v23  ;;  %v2551_v30 = vadd.f32 %v2535_v13, %v2529_v43  ;;  %v2552_v16 = vadd.f32 %v2535_v13, %v2530_v0 }
 0x403   :  { %v2553_v17 = vmax.f32 %v2537_v47, 0.0  ;;  %v2554_v63 = vmax.f32 %v2538_v29, 0.0  ;;  %v2555_v19 = vmax.f32 %v2539_v5, 0.0  ;;  %v2556_v3 = vmax.f32 %v2540_v35, 0.0 }
 0x404   :  { %v2557_v34 = vmax.f32 %v2541_v53, 0.0  ;;  %v2558_v42 = vmax.f32 %v2542_v8, 0.0  ;;  %v2559_v7 = vmax.f32 %v2543_v49, 0.0  ;;  %v2560_v54 = vmax.f32 %v2544_v28, 0.0 }
 0x405   :  { %v2561_v14 = vmax.f32 %v2545_v11, 0.0  ;;  %v2562_v48 = vmax.f32 %v2546_v2, 0.0  ;;  %v2563_v41 = vmax.f32 %v2547_v50, 0.0  ;;  %v2564_v15 = vmax.f32 %v2548_v62, 0.0  ;;  %2569 = vst.msk [vmem:[%s5390_s7] sm:$0xff] %vm1029_vm4, %v2553_v17  ;;  %2570 = vst.msk [vmem:[%s5390_s7 + $0x8] sm:$0xff] %vm1029_vm4, %v2554_v63 }
 0x406   :  { %2571 = vst.msk [vmem:[%s5390_s7 + $0x10] sm:$0xff] %vm1029_vm4, %v2555_v19  ;;  %2572 = vst.msk [vmem:[%s5390_s7 + $0x18] sm:$0xff] %vm1029_vm4, %v2556_v3  ;;  %v2565_v32 = vmax.f32 %v2549_v12, 0.0  ;;  %v2566_v56 = vmax.f32 %v2550_v58, 0.0  ;;  %v2567_v26 = vmax.f32 %v2551_v30, 0.0  ;;  %v2568_v33 = vmax.f32 %v2552_v16, 0.0 }
 0x407   :  { %2573 = vst.msk [vmem:[%s5390_s7 + $0x20] sm:$0xff] %vm1029_vm4, %v2557_v34  ;;  %2574 = vst.msk [vmem:[%s5390_s7 + $0x28] sm:$0xff] %vm1029_vm4, %v2558_v42 }
 0x408   :  { %2575 = vst.msk [vmem:[%s5390_s7 + $0x30] sm:$0xff] %vm1029_vm4, %v2559_v7  ;;  %2576 = vst.msk [vmem:[%s5390_s7 + $0x38] sm:$0xff] %vm1029_vm4, %v2560_v54 }
 0x409   :  { %2577 = vst.msk [vmem:[%s5390_s7 + $0x40] sm:$0xff] %vm1029_vm4, %v2561_v14  ;;  %2578 = vst.msk [vmem:[%s5390_s7 + $0x48] sm:$0xff] %vm1029_vm4, %v2562_v48 }
 0x40a   :  { %2579 = vst.msk [vmem:[%s5390_s7 + $0x50] sm:$0xff] %vm1029_vm4, %v2563_v41  ;;  %2580 = vst.msk [vmem:[%s5390_s7 + $0x58] sm:$0xff] %vm1029_vm4, %v2564_v15 }
 0x40b   :  { %2581 = vst.msk [vmem:[%s5390_s7 + $0x60] sm:$0xff] %vm1029_vm4, %v2565_v32  ;;  %2582 = vst.msk [vmem:[%s5390_s7 + $0x68] sm:$0xff] %vm1029_vm4, %v2566_v56 }
 0x40c   :  { %2583 = vst.msk [vmem:[%s5390_s7 + $0x70] sm:$0xff] %vm1029_vm4, %v2567_v26  ;;  %2584 = vst.msk [vmem:[%s5390_s7 + $0x78] sm:$0xff] %vm1029_vm4, %v2568_v33 }

</bundles_post_ra>
